<compile_context>
chip_gen: v7x
topology: tpu7x:2x2x1
jax: 0.10.0
libtpu: 0.0.40
codegen_flags: <defaults>
</compile_context>

<pallas_src>
import math
import functools

import jax
import jax.numpy as jnp
from jax.experimental import pallas as pl
from jax.experimental.pallas import tpu as pltpu


# ----------------------------------------------------------------------------
# Compiler / tiling helpers
# ----------------------------------------------------------------------------

def _vmem_limit_bytes():
    try:
        cap = int(pltpu.get_tpu_info().vmem_capacity_bytes)
        # ~80% of physical VMEM (v5e/v6e: 128 MiB, v7x: 64 MiB per core).
        return min(int(cap * 0.8), 100 * 1024 * 1024)
    except Exception:  # pragma: no cover - fall back to compiler default
        return None


_VMEM_LIMIT = _vmem_limit_bytes()


def _compiler_params(*sem):
    return pltpu.CompilerParams(dimension_semantics=sem,
                                vmem_limit_bytes=_VMEM_LIMIT)


def _seq_tile(n, max_tile=256):
    """Largest 8-aligned divisor of n that is <= max_tile (or n itself)."""
    if n <= max_tile:
        return n
    t = max_tile
    while t >= 8:
        if n % t == 0:
            return t
        t -= 8
    return n


def _ff_tile(dff, max_tile=1024):
    """Largest 128-aligned divisor of dff that is <= max_tile (or dff itself)."""
    if dff <= max_tile:
        return dff
    t = max_tile
    while t >= 128:
        if dff % t == 0:
            return t
        t -= 128
    return dff


# ----------------------------------------------------------------------------
# In-kernel math helpers (traced inside Pallas kernels; f32 math)
# ----------------------------------------------------------------------------

def _layernorm(x):
    # LayerNorm(eps=1e-6, elementwise_affine=False)
    mu = jnp.mean(x, axis=-1, keepdims=True)
    var = jnp.mean(jnp.square(x - mu), axis=-1, keepdims=True)
    return (x - mu) * jax.lax.rsqrt(var + 1e-6)


def _gelu(x):
    # Exact (erf-based) GELU, matching torch.nn.functional.gelu default.
    return 0.5 * x * (1.0 + jax.lax.erf(x * (1.0 / math.sqrt(2.0))))


def _split_heads(x_f32, num_heads, head_dim):
    """(T, H*Dh) f32 -> (H, T, Dh) bf16 (scale already applied by caller)."""
    t = x_f32.shape[0]
    xh = jnp.swapaxes(x_f32.reshape(t, num_heads, head_dim), 0, 1)
    return xh.astype(jnp.bfloat16)


def _mha_heads(q, k, v):
    """Batched-over-heads attention.

    q: (H, Tq, Dh) bf16 (softmax scale folded in), k/v: (H, Nk, Dh) bf16.
    Returns (Tq, H*Dh) f32.
    """
    s = jnp.einsum('hqd,hkd->hqk', q, k, preferred_element_type=jnp.float32)
    s = s - jnp.max(s, axis=-1, keepdims=True)
    p = jnp.exp(s)
    p = p / jnp.sum(p, axis=-1, keepdims=True)
    o = jnp.einsum('hqk,hkd->hqd', p.astype(jnp.bfloat16), v,
                   preferred_element_type=jnp.float32)
    h, tq, dh = o.shape
    return jnp.swapaxes(o, 0, 1).reshape(tq, h * dh)


# ----------------------------------------------------------------------------
# Fused Pallas kernels
# ----------------------------------------------------------------------------

def _proj_in_kernel(x_ref, w_ref, b_ref, pos_ref, o_ref):
    x = x_ref[0].astype(jnp.bfloat16)                        # (tn, Din)
    acc = jnp.dot(x, w_ref[...], preferred_element_type=jnp.float32)
    o_ref[0] = (acc + b_ref[...] + pos_ref[0]).astype(o_ref.dtype)


def proj_in_block(x, w, b, pos):
    """x: (B, N, Din) f32 -> (B, N, D) bf16; fused linear + bias + pos_embed."""
    bsz, n, din = x.shape
    d = w.shape[1]
    tn = _seq_tile(n)
    nt = n // tn
    return pl.pallas_call(
        _proj_in_kernel,
        out_shape=jax.ShapeDtypeStruct((bsz, n, d), jnp.bfloat16),
        grid=(bsz, nt),
        in_specs=[
            pl.BlockSpec((1, tn, din), lambda i, j: (i, j, 0)),
            pl.BlockSpec((din, d), lambda i, j: (0, 0)),
            pl.BlockSpec((1, d), lambda i, j: (0, 0)),
            pl.BlockSpec((1, tn, d), lambda i, j: (0, j, 0)),
        ],
        out_specs=pl.BlockSpec((1, tn, d), lambda i, j: (i, j, 0)),
        compiler_params=_compiler_params("parallel", "parallel"),
    )(x, w, b, pos)


def _self_attn_block_kernel(x_ref, mods_ref, wq_ref, bq_ref, wkv_ref, bkv_ref,
                            wo_ref, bo_ref, o_ref, xn_scr, k_scr, v_scr,
                            *, num_heads, head_dim, tq):
    j = pl.program_id(1)
    d = num_heads * head_dim
    n = x_ref.shape[1]
    m = mods_ref[0].astype(jnp.float32)                      # (6, D)

    # Once per batch element: full-sequence LN + adaLN mod and the fused KV
    # projection into head-major VMEM scratch, reused by every q-tile.
    @pl.when(j == 0)
    def _():
        x = x_ref[0].astype(jnp.float32)                     # (N, D)
        shift, scale = m[0:1], m[1:2]
        xn = _layernorm(x) * (1.0 + scale) + shift
        xn_scr[...] = xn.astype(jnp.bfloat16)
        kv = jnp.dot(xn.astype(jnp.bfloat16), wkv_ref[...],
                     preferred_element_type=jnp.float32) + bkv_ref[...]
        k_scr[...] = _split_heads(kv[:, :d], num_heads, head_dim)
        v_scr[...] = _split_heads(kv[:, d:], num_heads, head_dim)

    # Per q-tile work (flash-lite: scores are (H, tq, N), never (N, N)).
    # TODO(synk): add a KV-chunked online-softmax inner loop for very long N.
    start = pl.multiple_of(j * tq, tq)
    xn_t = xn_scr[pl.ds(start, tq), :]                       # (tq, D) bf16
    q = jnp.dot(xn_t, wq_ref[...],
                preferred_element_type=jnp.float32) + bq_ref[...]
    q = q * (1.0 / math.sqrt(head_dim))                      # scale folded into q
    qh = _split_heads(q, num_heads, head_dim)
    attn = _mha_heads(qh, k_scr[...], v_scr[...])            # (tq, D) f32
    out = jnp.dot(attn.astype(jnp.bfloat16), wo_ref[...],
                  preferred_element_type=jnp.float32) + bo_ref[...]
    gate = m[2:3]
    # Reference overwrites x with the normalized+modulated value before the
    # residual add, so the residual carries xn (matches the given module).
    o_ref[0] = (xn_t.astype(jnp.float32) + gate * out).astype(o_ref.dtype)


def self_attn_block(x, mods, p, num_heads):
    bsz, n, d = x.shape
    assert d % num_heads == 0
    head_dim = d // num_heads
    tq = _seq_tile(n, max_tile=128)
    nt = n // tq
    kern = functools.partial(_self_attn_block_kernel, num_heads=num_heads,
                             head_dim=head_dim, tq=tq)
    return pl.pallas_call(
        kern,
        out_shape=jax.ShapeDtypeStruct((bsz, n, d), jnp.bfloat16),
        grid=(bsz, nt),
        in_specs=[
            pl.BlockSpec((1, n, d), lambda i, j: (i, 0, 0)),   # full-seq x (DMA'd once per i)
            pl.BlockSpec((1, 6, d), lambda i, j: (i, 0, 0)),
            pl.BlockSpec((d, d), lambda i, j: (0, 0)),         # wq
            pl.BlockSpec((1, d), lambda i, j: (0, 0)),
            pl.BlockSpec((d, 2 * d), lambda i, j: (0, 0)),     # wkv (fused)
            pl.BlockSpec((1, 2 * d), lambda i, j: (0, 0)),
            pl.BlockSpec((d, d), lambda i, j: (0, 0)),         # wo
            pl.BlockSpec((1, d), lambda i, j: (0, 0)),
        ],
        out_specs=pl.BlockSpec((1, tq, d), lambda i, j: (i, j, 0)),
        scratch_shapes=[
            pltpu.VMEM((n, d), jnp.bfloat16),                  # xn (residual + Q source)
            pltpu.VMEM((num_heads, n, head_dim), jnp.bfloat16),  # K (head-major)
            pltpu.VMEM((num_heads, n, head_dim), jnp.bfloat16),  # V (head-major)
        ],
        # q-tile axis depends on the j==0 scratch fill -> must stay "arbitrary".
        compiler_params=_compiler_params("parallel", "arbitrary"),
    )(x, mods, p["wq"], p["bq"], p["wkv"], p["bkv"], p["wo"], p["bo"])


def _cross_attn_block_kernel(x_ref, c_ref, wq_ref, bq_ref, wkv_ref, bkv_ref,
                             wo_ref, bo_ref, o_ref, k_scr, v_scr,
                             *, num_heads, head_dim):
    j = pl.program_id(1)
    d = num_heads * head_dim

    # Context KV is computed once per batch element and reused for every q-tile.
    @pl.when(j == 0)
    def _():
        ctx = c_ref[0].astype(jnp.bfloat16)                   # (M, Dc)
        kv = jnp.dot(ctx, wkv_ref[...],
                     preferred_element_type=jnp.float32) + bkv_ref[...]
        k_scr[...] = _split_heads(kv[:, :d], num_heads, head_dim)
        v_scr[...] = _split_heads(kv[:, d:], num_heads, head_dim)

    x = x_ref[0]                                              # (tq, D) bf16
    q = jnp.dot(x, wq_ref[...],
                preferred_element_type=jnp.float32) + bq_ref[...]
    q = q * (1.0 / math.sqrt(head_dim))
    qh = _split_heads(q, num_heads, head_dim)
    attn = _mha_heads(qh, k_scr[...], v_scr[...])
    out = jnp.dot(attn.astype(jnp.bfloat16), wo_ref[...],
                  preferred_element_type=jnp.float32) + bo_ref[...]
    # Matches reference: no pre-LN, no adaLN gate on the cross-attention branch.
    o_ref[0] = (x.astype(jnp.float32) + out).astype(o_ref.dtype)


def cross_attn_block(x, c, p, num_heads):
    bsz, n, d = x.shape
    m_len, dc = c.shape[1], c.shape[2]
    head_dim = d // num_heads
    tq = _seq_tile(n)
    nt = n // tq
    kern = functools.partial(_cross_attn_block_kernel, num_heads=num_heads,
                             head_dim=head_dim)
    return pl.pallas_call(
        kern,
        out_shape=jax.ShapeDtypeStruct((bsz, n, d), jnp.bfloat16),
        grid=(bsz, nt),
        in_specs=[
            pl.BlockSpec((1, tq, d), lambda i, j: (i, j, 0)),
            pl.BlockSpec((1, m_len, dc), lambda i, j: (i, 0, 0)),
            pl.BlockSpec((d, d), lambda i, j: (0, 0)),
            pl.BlockSpec((1, d), lambda i, j: (0, 0)),
            pl.BlockSpec((dc, 2 * d), lambda i, j: (0, 0)),
            pl.BlockSpec((1, 2 * d), lambda i, j: (0, 0)),
            pl.BlockSpec((d, d), lambda i, j: (0, 0)),
            pl.BlockSpec((1, d), lambda i, j: (0, 0)),
        ],
        out_specs=pl.BlockSpec((1, tq, d), lambda i, j: (i, j, 0)),
        scratch_shapes=[
            pltpu.VMEM((num_heads, m_len, head_dim), jnp.bfloat16),
            pltpu.VMEM((num_heads, m_len, head_dim), jnp.bfloat16),
        ],
        compiler_params=_compiler_params("parallel", "arbitrary"),
    )(x, c, p["wq"], p["bq"], p["wkv"], p["bkv"], p["wo"], p["bo"])


def _ffn_block_kernel(x_ref, mods_ref, w1a_ref, b1a_ref, w1g_ref, b1g_ref,
                      w2_ref, b2_ref, o_ref, xn_scr, acc_scr):
    k = pl.program_id(2)
    m = mods_ref[0].astype(jnp.float32)                       # (6, D)

    @pl.when(k == 0)
    def _():
        x = x_ref[0].astype(jnp.float32)                      # (tn, D)
        shift, scale = m[3:4], m[4:5]
        xn = _layernorm(x) * (1.0 + scale) + shift
        xn_scr[...] = xn.astype(jnp.bfloat16)
        acc_scr[...] = jnp.zeros_like(acc_scr)

    xb = xn_scr[...]                                          # (tn, D) bf16
    a = jnp.dot(xb, w1a_ref[...],
                preferred_element_type=jnp.float32) + b1a_ref[...]
    g = jnp.dot(xb, w1g_ref[...],
                preferred_element_type=jnp.float32) + b1g_ref[...]
    h = a * _gelu(g)                                          # GEGLU (dff slice)
    acc_scr[...] += jnp.dot(h.astype(jnp.bfloat16), w2_ref[...],
                            preferred_element_type=jnp.float32)

    @pl.when(k == pl.num_programs(2) - 1)
    def _():
        gate = m[5:6]
        ff = acc_scr[...] + b2_ref[...]
        # Residual onto xn (reference overwrote x with norm2(x)*(1+scale)+shift).
        o_ref[0] = (xn_scr[...].astype(jnp.float32) + gate * ff).astype(o_ref.dtype)


def ffn_block(x, mods, lp):
    bsz, n, d = x.shape
    dff = lp["ff_w1a"].shape[1]                               # 4*D
    tn = _seq_tile(n)
    nt = n // tn
    dk = _ff_tile(dff)                                        # dff split for VMEM (v7x)
    nk = dff // dk
    return pl.pallas_call(
        _ffn_block_kernel,
        out_shape=jax.ShapeDtypeStruct((bsz, n, d), jnp.bfloat16),
        grid=(bsz, nt, nk),
        in_specs=[
            pl.BlockSpec((1, tn, d), lambda i, j, k: (i, j, 0)),
            pl.BlockSpec((1, 6, d), lambda i, j, k: (i, 0, 0)),
            pl.BlockSpec((d, dk), lambda i, j, k: (0, k)),
            pl.BlockSpec((1, dk), lambda i, j, k: (0, k)),
            pl.BlockSpec((d, dk), lambda i, j, k: (0, k)),
            pl.BlockSpec((1, dk), lambda i, j, k: (0, k)),
            pl.BlockSpec((dk, d), lambda i, j, k: (k, 0)),
            pl.BlockSpec((1, d), lambda i, j, k: (0, 0)),
        ],
        out_specs=pl.BlockSpec((1, tn, d), lambda i, j, k: (i, j, 0)),
        scratch_shapes=[
            pltpu.VMEM((tn, d), jnp.bfloat16),                # xn cache
            pltpu.VMEM((tn, d), jnp.float32),                 # W2 partial-sum accumulator
        ],
        compiler_params=_compiler_params("parallel", "parallel", "arbitrary"),
    )(x, mods, lp["ff_w1a"], lp["ff_b1a"], lp["ff_w1g"], lp["ff_b1g"],
      lp["ff_w2"], lp["ff_b2"])


def _final_kernel(x_ref, mods_ref, w_ref, b_ref, o_ref):
    x = x_ref[0].astype(jnp.float32)                          # (tn, D)
    m = mods_ref[0].astype(jnp.float32)                       # (2, D)
    shift, scale = m[0:1], m[1:2]
    xn = _layernorm(x) * (1.0 + scale) + shift
    o_ref[0] = jnp.dot(xn.astype(jnp.bfloat16), w_ref[...],
                       preferred_element_type=jnp.float32) + b_ref[...]


def final_block(x, mods, w_pad, b_pad):
    bsz, n, d = x.shape
    dpad = w_pad.shape[1]                                     # lane-dense (>=128)
    tn = _seq_tile(n)
    nt = n // tn
    return pl.pallas_call(
        _final_kernel,
        out_shape=jax.ShapeDtypeStruct((bsz, n, dpad), jnp.float32),
        grid=(bsz, nt),
        in_specs=[
            pl.BlockSpec((1, tn, d), lambda i, j: (i, j, 0)),
            pl.BlockSpec((1, 2, d), lambda i, j: (i, 0, 0)),
            pl.BlockSpec((d, dpad), lambda i, j: (0, 0)),
            pl.BlockSpec((1, dpad), lambda i, j: (0, 0)),
        ],
        out_specs=pl.BlockSpec((1, tn, dpad), lambda i, j: (i, j, 0)),
        compiler_params=_compiler_params("parallel", "parallel"),
    )(x, mods, w_pad, b_pad)


# ----------------------------------------------------------------------------
# Model glue (tiny scalar-path math left to XLA on purpose)
# ----------------------------------------------------------------------------

def timesteps_embed(t, num_channels=256, max_period=10000.0):
    half = num_channels // 2
    exponent = -math.log(max_period) * jnp.arange(half, dtype=jnp.float32) / half
    freqs = jnp.exp(exponent)
    emb = t[:, None].astype(jnp.float32) * freqs[None, :]
    return jnp.concatenate([jnp.sin(emb), jnp.cos(emb)], axis=-1)   # (B, 256)


def dit_forward(params, x, c, t, *, num_heads, out_dim):
    b = x.shape[0]
    hidden = params["pos_embed"].shape[-1]

    # proj_in + pos_embed (fused); activations travel between kernels in bf16.
    x = proj_in_block(x, params["proj_in_w"], params["proj_in_b"],
                      params["pos_embed"])
    c = c.astype(jnp.bfloat16)       # cast context once; reused by every layer

    # Timestep embedding + adaLN MLPs: a few thousand FLOPs -> plain XLA.
    t_emb = timesteps_embed(t)
    t_emb = t_emb @ params["te_w1"] + params["te_b1"]
    t_emb = jax.nn.silu(t_emb)
    t_emb = t_emb @ params["te_w2"] + params["te_b2"]                 # (B, H)
    t_adaln = jax.nn.silu(t_emb) @ params["adaln_w"] + params["adaln_b"]
    t_adaln = t_adaln.reshape(b, 6, hidden)

    # TODO(synk): on v5e/v6e a full DiTLayer could be fused into one pallas_call
    # (x never leaves VMEM); kept as three kernels so the per-kernel weight
    # working set also fits v7x's 64 MiB VMEM.
    for lp in params["layers"]:
        mods = lp["scale_shift_table"][None] + t_adaln                # (B, 6, H)
        x = self_attn_block(x, mods, lp["attn1"], num_heads)
        x = cross_attn_block(x, c, lp["attn2"], num_heads)
        x = ffn_block(x, mods, lp)

    final_mods = params["scale_shift_table"][None] + t_emb[:, None]   # (B, 2, H)
    out = final_block(x, final_mods, params["proj_out_w"], params["proj_out_b"])
    return out[..., :out_dim]                                         # strip pad


# ----------------------------------------------------------------------------
# Deterministic parameter init (matmul weights pre-cast to bf16 once)
# ----------------------------------------------------------------------------

def _lin(key, din, dout, std=0.02, dtype=jnp.bfloat16):
    kw, kb = jax.random.split(key)
    w = (jax.random.normal(kw, (din, dout), jnp.float32) * std).astype(dtype)
    b = (jax.random.normal(kb, (dout,), jnp.float32) * 0.001).reshape(1, dout)
    return w, b


def init_params(key, hidden_dim, num_heads, latent_size, latent_dim, num_layers):
    keys = jax.random.split(key, 8 + num_layers)
    p = {}
    p["proj_in_w"], p["proj_in_b"] = _lin(keys[0], latent_dim, hidden_dim)
    p["pos_embed"] = jax.random.normal(keys[1], (1, latent_size, hidden_dim),
                                       jnp.float32) / math.sqrt(hidden_dim)
    # Tiny MLPs stay f32 (handled by XLA).
    p["te_w1"], p["te_b1"] = _lin(keys[2], 256, hidden_dim, dtype=jnp.float32)
    p["te_w2"], p["te_b2"] = _lin(keys[3], hidden_dim, hidden_dim, dtype=jnp.float32)
    p["adaln_w"], p["adaln_b"] = _lin(keys[4], hidden_dim, hidden_dim * 6,
                                      dtype=jnp.float32)
    p["scale_shift_table"] = jax.random.normal(keys[5], (2, hidden_dim),
                                               jnp.float32) / math.sqrt(hidden_dim)
    # proj_out: pad the narrow output dim up to a lane-dense multiple of 128 so
    # the final kernel emits unmasked stores; the wrapper slices it back.
    dout_pad = max(128, ((latent_dim + 127) // 128) * 128)
    w, bias = _lin(keys[6], hidden_dim, latent_dim)
    p["proj_out_w"] = jnp.zeros((hidden_dim, dout_pad),
                                jnp.bfloat16).at[:, :latent_dim].set(w)
    p["proj_out_b"] = jnp.zeros((1, dout_pad),
                                jnp.float32).at[:, :latent_dim].set(bias)

    layers = []
    for li in range(num_layers):
        lk = jax.random.split(keys[8 + li], 12)
        wq1, bq1 = _lin(lk[0], hidden_dim, hidden_dim)
        wkv1, bkv1 = _lin(lk[1], hidden_dim, hidden_dim * 2)     # fused k,v
        wo1, bo1 = _lin(lk[2], hidden_dim, hidden_dim)
        wq2, bq2 = _lin(lk[3], hidden_dim, hidden_dim)
        wkv2, bkv2 = _lin(lk[4], hidden_dim, hidden_dim * 2)     # fused k,v
        wo2, bo2 = _lin(lk[5], hidden_dim, hidden_dim)
        w1a, b1a = _lin(lk[6], hidden_dim, hidden_dim * 4)       # GEGLU value half
        w1g, b1g = _lin(lk[7], hidden_dim, hidden_dim * 4)       # GEGLU gate half
        w2, b2 = _lin(lk[8], hidden_dim * 4, hidden_dim)
        layers.append({
            "attn1": {"wq": wq1, "bq": bq1, "wkv": wkv1, "bkv": bkv1,
                      "wo": wo1, "bo": bo1},
            "attn2": {"wq": wq2, "bq": bq2, "wkv": wkv2, "bkv": bkv2,
                      "wo": wo2, "bo": bo2},
            "ff_w1a": w1a, "ff_b1a": b1a,
            "ff_w1g": w1g, "ff_b1g": b1g,
            "ff_w2": w2, "ff_b2": b2,
            "scale_shift_table": jax.random.normal(
                lk[9], (6, hidden_dim), jnp.float32) / math.sqrt(hidden_dim),
        })
    p["layers"] = layers
    return p


# ----------------------------------------------------------------------------
# Main
# ----------------------------------------------------------------------------

if __name__ == "__main__":
    # Small config consistent with the module's constructor arguments.
    HIDDEN_DIM = 32
    NUM_HEADS = 4
    LATENT_SIZE = 8      # sequence length N (must match pos_embed)
    LATENT_DIM = 16
    NUM_LAYERS = 2
    B = 2
    CTX_LEN = 8          # cross-attention context length

    key = jax.random.PRNGKey(0)
    kp, kx, kc, kt = jax.random.split(key, 4)

    params = init_params(kp, HIDDEN_DIM, NUM_HEADS, LATENT_SIZE, LATENT_DIM,
                         NUM_LAYERS)

    x = jax.random.normal(kx, (B, LATENT_SIZE, LATENT_DIM), jnp.float32)
    c = jax.random.normal(kc, (B, CTX_LEN, HIDDEN_DIM), jnp.float32)
    t = jax.random.uniform(kt, (B,), jnp.float32, 0.0, 1000.0)

    fwd = jax.jit(functools.partial(dit_forward, num_heads=NUM_HEADS,
                                    out_dim=LATENT_DIM))
    out = jax.block_until_ready(fwd(params, x, c, t))

    assert out.shape == (B, LATENT_SIZE, LATENT_DIM), out.shape
    assert bool(jnp.all(jnp.isfinite(out)))
    print("KERNEL_OK")
</pallas_src>

<mosaic_0001>
module attributes {stable_mosaic.version = 11 : i64} {
  func.func @_proj_in_kernel(%arg0: i32, %arg1: i32, %arg2: memref<1x8x16xf32, #tpu.memory_space<vmem>>, %arg3: memref<16x32xbf16, #tpu.memory_space<vmem>>, %arg4: memref<1x32xf32, #tpu.memory_space<vmem>>, %arg5: memref<1x8x32xf32, #tpu.memory_space<vmem>>, %arg6: memref<1x8x32xbf16, #tpu.memory_space<vmem>>) attributes {dimension_semantics = [#tpu.dimension_semantics<parallel>, #tpu.dimension_semantics<parallel>], iteration_bounds = array<i64: 2, 1>, scalar_prefetch = 0 : i64, scratch_operands = 0 : i64, tpu.core_type = #tpu.core_type<tc>, window_params = [{transform_indices = @transform_0, window_bounds = array<i64: 1, 8, 16>}, {pipeline_mode = #tpu.pipeline_mode<synchronous>, transform_indices = @transform_1, window_bounds = array<i64: 16, 32>}, {pipeline_mode = #tpu.pipeline_mode<synchronous>, transform_indices = @transform_2, window_bounds = array<i64: 1, 32>}, {transform_indices = @transform_3, window_bounds = array<i64: 1, 8, 32>}, {transform_indices = @transform_4, window_bounds = array<i64: 1, 8, 32>}]} {
    %c0 = arith.constant 0 : index
    %c0_0 = arith.constant 0 : index
    %c0_1 = arith.constant 0 : index
    %0 = vector.load %arg2[%c0, %c0_0, %c0_1] : memref<1x8x16xf32, #tpu.memory_space<vmem>>, vector<1x8x16xf32>
    %1 = vector.shape_cast %0 : vector<1x8x16xf32> to vector<8x16xf32>
    %2 = arith.truncf %1 : vector<8x16xf32> to vector<8x16xbf16>
    %c0_2 = arith.constant 0 : index
    %c0_3 = arith.constant 0 : index
    %3 = vector.load %arg3[%c0_2, %c0_3] : memref<16x32xbf16, #tpu.memory_space<vmem>>, vector<16x32xbf16>
    %cst = arith.constant dense<0.000000e+00> : vector<8x32xf32>
    %4 = tpu.matmul %2, %3, %cst {dimension_numbers = #tpu.dot_dimension_numbers<[1], [0], [0], [1], [0, 0, 1, 1], [], []>} : vector<8x16xbf16>, vector<16x32xbf16>, vector<8x32xf32> -> vector<8x32xf32>
    %c0_4 = arith.constant 0 : index
    %c0_5 = arith.constant 0 : index
    %5 = vector.load %arg4[%c0_4, %c0_5] : memref<1x32xf32, #tpu.memory_space<vmem>>, vector<1x32xf32>
    %6 = vector.broadcast %5 : vector<1x32xf32> to vector<8x32xf32>
    %7 = arith.addf %4, %6 : vector<8x32xf32>
    %c0_6 = arith.constant 0 : index
    %c0_7 = arith.constant 0 : index
    %c0_8 = arith.constant 0 : index
    %8 = vector.load %arg5[%c0_6, %c0_7, %c0_8] : memref<1x8x32xf32, #tpu.memory_space<vmem>>, vector<1x8x32xf32>
    %9 = vector.shape_cast %8 : vector<1x8x32xf32> to vector<8x32xf32>
    %10 = arith.addf %7, %9 : vector<8x32xf32>
    %11 = arith.truncf %10 : vector<8x32xf32> to vector<8x32xbf16>
    %c0_9 = arith.constant 0 : index
    %c0_10 = arith.constant 0 : index
    %c0_11 = arith.constant 0 : index
    %12 = vector.load %arg6[%c0_9, %c0_10, %c0_11] : memref<1x8x32xbf16, #tpu.memory_space<vmem>>, vector<1x8x32xbf16>
    %13 = vector.shape_cast %12 : vector<1x8x32xbf16> to vector<8x32xbf16>
    %14 = vector.shape_cast %11 : vector<8x32xbf16> to vector<1x8x32xbf16>
    tpu.vector_store %arg6[%c0_9, %c0_10, %c0_11], %14 {strides = array<i32>} : memref<1x8x32xbf16, #tpu.memory_space<vmem>>, vector<1x8x32xbf16>,
    return
  }
  func.func @transform_0(%arg0: i32, %arg1: i32) -> (i32, i32, i32) {
    %c0_i32 = arith.constant 0 : i32
    %c0_i32_0 = arith.constant 0 : i32
    return %arg0, %arg1, %c0_i32 : i32, i32, i32
  }
  func.func @transform_1(%arg0: i32, %arg1: i32) -> (i32, i32) {
    %c0_i32 = arith.constant 0 : i32
    %c0_i32_0 = arith.constant 0 : i32
    %c0_i32_1 = arith.constant 0 : i32
    return %c0_i32, %c0_i32_0 : i32, i32
  }
  func.func @transform_2(%arg0: i32, %arg1: i32) -> (i32, i32) {
    %c0_i32 = arith.constant 0 : i32
    %c0_i32_0 = arith.constant 0 : i32
    %c0_i32_1 = arith.constant 0 : i32
    return %c0_i32, %c0_i32_0 : i32, i32
  }
  func.func @transform_3(%arg0: i32, %arg1: i32) -> (i32, i32, i32) {
    %c0_i32 = arith.constant 0 : i32
    %c0_i32_0 = arith.constant 0 : i32
    %c0_i32_1 = arith.constant 0 : i32
    return %c0_i32, %arg1, %c0_i32_0 : i32, i32, i32
  }
  func.func @transform_4(%arg0: i32, %arg1: i32) -> (i32, i32, i32) {
    %c0_i32 = arith.constant 0 : i32
    %c0_i32_0 = arith.constant 0 : i32
    return %arg0, %arg1, %c0_i32 : i32, i32, i32
  }
}

module attributes {stable_mosaic.version = 11 : i64} {
  func.func @_cross_attn_block_kernel(%arg0: i32, %arg1: i32, %arg2: memref<1x8x32xbf16, #tpu.memory_space<vmem>>, %arg3: memref<1x8x32xbf16, #tpu.memory_space<vmem>>, %arg4: memref<32x32xbf16, #tpu.memory_space<vmem>>, %arg5: memref<1x32xf32, #tpu.memory_space<vmem>>, %arg6: memref<32x64xbf16, #tpu.memory_space<vmem>>, %arg7: memref<1x64xf32, #tpu.memory_space<vmem>>, %arg8: memref<32x32xbf16, #tpu.memory_space<vmem>>, %arg9: memref<1x32xf32, #tpu.memory_space<vmem>>, %arg10: memref<1x8x32xbf16, #tpu.memory_space<vmem>>, %arg11: memref<4x8x8xbf16, #tpu.memory_space<vmem>>, %arg12: memref<4x8x8xbf16, #tpu.memory_space<vmem>>) attributes {dimension_semantics = [#tpu.dimension_semantics<parallel>, #tpu.dimension_semantics<arbitrary>], iteration_bounds = array<i64: 2, 1>, scalar_prefetch = 0 : i64, scratch_operands = 2 : i64, tpu.core_type = #tpu.core_type<tc>, window_params = [{transform_indices = @transform_0, window_bounds = array<i64: 1, 8, 32>}, {transform_indices = @transform_1, window_bounds = array<i64: 1, 8, 32>}, {pipeline_mode = #tpu.pipeline_mode<synchronous>, transform_indices = @transform_2, window_bounds = array<i64: 32, 32>}, {pipeline_mode = #tpu.pipeline_mode<synchronous>, transform_indices = @transform_3, window_bounds = array<i64: 1, 32>}, {pipeline_mode = #tpu.pipeline_mode<synchronous>, transform_indices = @transform_4, window_bounds = array<i64: 32, 64>}, {pipeline_mode = #tpu.pipeline_mode<synchronous>, transform_indices = @transform_5, window_bounds = array<i64: 1, 64>}, {pipeline_mode = #tpu.pipeline_mode<synchronous>, transform_indices = @transform_6, window_bounds = array<i64: 32, 32>}, {pipeline_mode = #tpu.pipeline_mode<synchronous>, transform_indices = @transform_7, window_bounds = array<i64: 1, 32>}, {transform_indices = @transform_8, window_bounds = array<i64: 1, 8, 32>}]} {
    %c0_i32 = arith.constant 0 : i32
    %0 = arith.cmpi eq, %arg1, %c0_i32 : i32
    %1 = arith.extui %0 : i1 to i32
    %c0_i32_0 = arith.constant 0 : i32
    %2 = arith.cmpi ne, %1, %c0_i32_0 : i32
    scf.if %2 {
      %c0_26 = arith.constant 0 : index
      %c0_27 = arith.constant 0 : index
      %c0_28 = arith.constant 0 : index
      %43 = vector.load %arg3[%c0_26, %c0_27, %c0_28] : memref<1x8x32xbf16, #tpu.memory_space<vmem>>, vector<1x8x32xbf16>
      %44 = vector.shape_cast %43 : vector<1x8x32xbf16> to vector<8x32xbf16>
      %c0_29 = arith.constant 0 : index
      %c0_30 = arith.constant 0 : index
      %45 = vector.load %arg6[%c0_29, %c0_30] : memref<32x64xbf16, #tpu.memory_space<vmem>>, vector<32x64xbf16>
      %cst_31 = arith.constant dense<0.000000e+00> : vector<8x64xf32>
      %46 = tpu.matmul %44, %45, %cst_31 {dimension_numbers = #tpu.dot_dimension_numbers<[1], [0], [0], [1], [0, 0, 1, 1], [], []>} : vector<8x32xbf16>, vector<32x64xbf16>, vector<8x64xf32> -> vector<8x64xf32>
      %c0_32 = arith.constant 0 : index
      %c0_33 = arith.constant 0 : index
      %47 = vector.load %arg7[%c0_32, %c0_33] : memref<1x64xf32, #tpu.memory_space<vmem>>, vector<1x64xf32>
      %48 = vector.broadcast %47 : vector<1x64xf32> to vector<8x64xf32>
      %49 = arith.addf %46, %48 : vector<8x64xf32>
      %50 = vector.extract_strided_slice %49 {offsets = [0, 0], sizes = [8, 32], strides = [1, 1]} : vector<8x64xf32> to vector<8x32xf32>
      %51 = vector.shape_cast %50 : vector<8x32xf32> to vector<8x4x8xf32>
      %52 = tpu.transpose %51, [1, 0, 2] : vector<8x4x8xf32> -> vector<4x8x8xf32>
      %53 = arith.truncf %52 : vector<4x8x8xf32> to vector<4x8x8xbf16>
      %c0_34 = arith.constant 0 : index
      %c0_35 = arith.constant 0 : index
      %c0_36 = arith.constant 0 : index
      %54 = vector.load %arg11[%c0_34, %c0_35, %c0_36] : memref<4x8x8xbf16, #tpu.memory_space<vmem>>, vector<4x8x8xbf16>
      tpu.vector_store %arg11[%c0_34, %c0_35, %c0_36], %53 {strides = array<i32>} : memref<4x8x8xbf16, #tpu.memory_space<vmem>>, vector<4x8x8xbf16>,
      %55 = vector.extract_strided_slice %49 {offsets = [0, 32], sizes = [8, 32], strides = [1, 1]} : vector<8x64xf32> to vector<8x32xf32>
      %56 = vector.shape_cast %55 : vector<8x32xf32> to vector<8x4x8xf32>
      %57 = tpu.transpose %56, [1, 0, 2] : vector<8x4x8xf32> -> vector<4x8x8xf32>
      %58 = arith.truncf %57 : vector<4x8x8xf32> to vector<4x8x8xbf16>
      %c0_37 = arith.constant 0 : index
      %c0_38 = arith.constant 0 : index
      %c0_39 = arith.constant 0 : index
      %59 = vector.load %arg12[%c0_37, %c0_38, %c0_39] : memref<4x8x8xbf16, #tpu.memory_space<vmem>>, vector<4x8x8xbf16>
      tpu.vector_store %arg12[%c0_37, %c0_38, %c0_39], %58 {strides = array<i32>} : memref<4x8x8xbf16, #tpu.memory_space<vmem>>, vector<4x8x8xbf16>,
    } else {
    }
    %c0 = arith.constant 0 : index
    %c0_1 = arith.constant 0 : index
    %c0_2 = arith.constant 0 : index
    %3 = vector.load %arg2[%c0, %c0_1, %c0_2] : memref<1x8x32xbf16, #tpu.memory_space<vmem>>, vector<1x8x32xbf16>
    %4 = vector.shape_cast %3 : vector<1x8x32xbf16> to vector<8x32xbf16>
    %c0_3 = arith.constant 0 : index
    %c0_4 = arith.constant 0 : index
    %5 = vector.load %arg4[%c0_3, %c0_4] : memref<32x32xbf16, #tpu.memory_space<vmem>>, vector<32x32xbf16>
    %cst = arith.constant dense<0.000000e+00> : vector<8x32xf32>
    %6 = tpu.matmul %4, %5, %cst {dimension_numbers = #tpu.dot_dimension_numbers<[1], [0], [0], [1], [0, 0, 1, 1], [], []>} : vector<8x32xbf16>, vector<32x32xbf16>, vector<8x32xf32> -> vector<8x32xf32>
    %c0_5 = arith.constant 0 : index
    %c0_6 = arith.constant 0 : index
    %7 = vector.load %arg5[%c0_5, %c0_6] : memref<1x32xf32, #tpu.memory_space<vmem>>, vector<1x32xf32>
    %8 = vector.broadcast %7 : vector<1x32xf32> to vector<8x32xf32>
    %9 = arith.addf %6, %8 : vector<8x32xf32>
    %cst_7 = arith.constant 0.353553385 : f32
    %10 = vector.broadcast %cst_7 : f32 to vector<8x32xf32>
    %11 = arith.mulf %9, %10 : vector<8x32xf32>
    %12 = vector.shape_cast %11 : vector<8x32xf32> to vector<8x4x8xf32>
    %13 = tpu.transpose %12, [1, 0, 2] : vector<8x4x8xf32> -> vector<4x8x8xf32>
    %14 = arith.truncf %13 : vector<4x8x8xf32> to vector<4x8x8xbf16>
    %c0_8 = arith.constant 0 : index
    %c0_9 = arith.constant 0 : index
    %c0_10 = arith.constant 0 : index
    %15 = vector.load %arg11[%c0_8, %c0_9, %c0_10] : memref<4x8x8xbf16, #tpu.memory_space<vmem>>, vector<4x8x8xbf16>
    %c0_11 = arith.constant 0 : index
    %c0_12 = arith.constant 0 : index
    %c0_13 = arith.constant 0 : index
    %16 = vector.load %arg12[%c0_11, %c0_12, %c0_13] : memref<4x8x8xbf16, #tpu.memory_space<vmem>>, vector<4x8x8xbf16>
    "tpu.trace_start"() <{level = 10 : i32, message = "hqd,hkd->hqk"}> : () -> ()
    %cst_14 = arith.constant dense<0.000000e+00> : vector<4x8x8xf32>
    %17 = tpu.matmul %14, %15, %cst_14 {dimension_numbers = #tpu.dot_dimension_numbers<[2], [2], [1], [1], [0, 0, 0, 1, 1, 1], [0], [0]>} : vector<4x8x8xbf16>, vector<4x8x8xbf16>, vector<4x8x8xf32> -> vector<4x8x8xf32>
    "tpu.trace_stop"() : () -> ()
    %cst_15 = arith.constant dense<0xFF800000> : vector<4x8xf32>
    %18 = vector.multi_reduction <maximumf>, %17, %cst_15 [2] : vector<4x8x8xf32> to vector<4x8xf32>
    %19 = vector.shape_cast %18 : vector<4x8xf32> to vector<4x8x1xf32>
    %20 = vector.broadcast %19 : vector<4x8x1xf32> to vector<4x8x8xf32>
    %21 = arith.subf %17, %20 : vector<4x8x8xf32>
    %22 = math.exp %21 : vector<4x8x8xf32>
    %cst_16 = arith.constant dense<0.000000e+00> : vector<4x8xf32>
    %23 = vector.multi_reduction <add>, %22, %cst_16 [2] : vector<4x8x8xf32> to vector<4x8xf32>
    %24 = vector.shape_cast %23 : vector<4x8xf32> to vector<4x8x1xf32>
    %25 = vector.broadcast %24 : vector<4x8x1xf32> to vector<4x8x8xf32>
    %26 = arith.divf %22, %25 : vector<4x8x8xf32>
    %27 = arith.truncf %26 : vector<4x8x8xf32> to vector<4x8x8xbf16>
    "tpu.trace_start"() <{level = 10 : i32, message = "hqk,hkd->hqd"}> : () -> ()
    %cst_17 = arith.constant dense<0.000000e+00> : vector<4x8x8xf32>
    %28 = tpu.matmul %27, %16, %cst_17 {dimension_numbers = #tpu.dot_dimension_numbers<[2], [1], [1], [2], [0, 0, 0, 1, 1, 2], [0], [0]>} : vector<4x8x8xbf16>, vector<4x8x8xbf16>, vector<4x8x8xf32> -> vector<4x8x8xf32>
    "tpu.trace_stop"() : () -> ()
    %29 = tpu.transpose %28, [1, 0, 2] : vector<4x8x8xf32> -> vector<8x4x8xf32>
    %30 = vector.shape_cast %29 : vector<8x4x8xf32> to vector<8x32xf32>
    %31 = arith.truncf %30 : vector<8x32xf32> to vector<8x32xbf16>
    %c0_18 = arith.constant 0 : index
    %c0_19 = arith.constant 0 : index
    %32 = vector.load %arg8[%c0_18, %c0_19] : memref<32x32xbf16, #tpu.memory_space<vmem>>, vector<32x32xbf16>
    %cst_20 = arith.constant dense<0.000000e+00> : vector<8x32xf32>
    %33 = tpu.matmul %31, %32, %cst_20 {dimension_numbers = #tpu.dot_dimension_numbers<[1], [0], [0], [1], [0, 0, 1, 1], [], []>} : vector<8x32xbf16>, vector<32x32xbf16>, vector<8x32xf32> -> vector<8x32xf32>
    %c0_21 = arith.constant 0 : index
    %c0_22 = arith.constant 0 : index
    %34 = vector.load %arg9[%c0_21, %c0_22] : memref<1x32xf32, #tpu.memory_space<vmem>>, vector<1x32xf32>
    %35 = vector.broadcast %34 : vector<1x32xf32> to vector<8x32xf32>
    %36 = arith.addf %33, %35 : vector<8x32xf32>
    %37 = arith.extf %4 : vector<8x32xbf16> to vector<8x32xf32>
    %38 = arith.addf %37, %36 : vector<8x32xf32>
    %39 = arith.truncf %38 : vector<8x32xf32> to vector<8x32xbf16>
    %c0_23 = arith.constant 0 : index
    %c0_24 = arith.constant 0 : index
    %c0_25 = arith.constant 0 : index
    %40 = vector.load %arg10[%c0_23, %c0_24, %c0_25] : memref<1x8x32xbf16, #tpu.memory_space<vmem>>, vector<1x8x32xbf16>
    %41 = vector.shape_cast %40 : vector<1x8x32xbf16> to vector<8x32xbf16>
    %42 = vector.shape_cast %39 : vector<8x32xbf16> to vector<1x8x32xbf16>
    tpu.vector_store %arg10[%c0_23, %c0_24, %c0_25], %42 {strides = array<i32>} : memref<1x8x32xbf16, #tpu.memory_space<vmem>>, vector<1x8x32xbf16>,
    return
  }
  func.func @transform_0(%arg0: i32, %arg1: i32) -> (i32, i32, i32) {
    %c0_i32 = arith.constant 0 : i32
    %c0_i32_0 = arith.constant 0 : i32
    return %arg0, %arg1, %c0_i32 : i32, i32, i32
  }
  func.func @transform_1(%arg0: i32, %arg1: i32) -> (i32, i32, i32) {
    %c0_i32 = arith.constant 0 : i32
    %c0_i32_0 = arith.constant 0 : i32
    %c0_i32_1 = arith.constant 0 : i32
    return %arg0, %c0_i32, %c0_i32_0 : i32, i32, i32
  }
  func.func @transform_2(%arg0: i32, %arg1: i32) -> (i32, i32) {
    %c0_i32 = arith.constant 0 : i32
    %c0_i32_0 = arith.constant 0 : i32
    %c0_i32_1 = arith.constant 0 : i32
    return %c0_i32, %c0_i32_0 : i32, i32
  }
  func.func @transform_3(%arg0: i32, %arg1: i32) -> (i32, i32) {
    %c0_i32 = arith.constant 0 : i32
    %c0_i32_0 = arith.constant 0 : i32
    %c0_i32_1 = arith.constant 0 : i32
    return %c0_i32, %c0_i32_0 : i32, i32
  }
  func.func @transform_4(%arg0: i32, %arg1: i32) -> (i32, i32) {
    %c0_i32 = arith.constant 0 : i32
    %c0_i32_0 = arith.constant 0 : i32
    %c0_i32_1 = arith.constant 0 : i32
    return %c0_i32, %c0_i32_0 : i32, i32
  }
  func.func @transform_5(%arg0: i32, %arg1: i32) -> (i32, i32) {
    %c0_i32 = arith.constant 0 : i32
    %c0_i32_0 = arith.constant 0 : i32
    %c0_i32_1 = arith.constant 0 : i32
    return %c0_i32, %c0_i32_0 : i32, i32
  }
  func.func @transform_6(%arg0: i32, %arg1: i32) -> (i32, i32) {
    %c0_i32 = arith.constant 0 : i32
    %c0_i32_0 = arith.constant 0 : i32
    %c0_i32_1 = arith.constant 0 : i32
    return %c0_i32, %c0_i32_0 : i32, i32
  }
  func.func @transform_7(%arg0: i32, %arg1: i32) -> (i32, i32) {
    %c0_i32 = arith.constant 0 : i32
    %c0_i32_0 = arith.constant 0 : i32
    %c0_i32_1 = arith.constant 0 : i32
    return %c0_i32, %c0_i32_0 : i32, i32
  }
  func.func @transform_8(%arg0: i32, %arg1: i32) -> (i32, i32, i32) {
    %c0_i32 = arith.constant 0 : i32
    %c0_i32_0 = arith.constant 0 : i32
    return %arg0, %arg1, %c0_i32 : i32, i32, i32
  }
}

module attributes {stable_mosaic.version = 11 : i64} {
  func.func @_self_attn_block_kernel(%arg0: i32, %arg1: i32, %arg2: memref<1x8x32xbf16, #tpu.memory_space<vmem>>, %arg3: memref<1x6x32xf32, #tpu.memory_space<vmem>>, %arg4: memref<32x32xbf16, #tpu.memory_space<vmem>>, %arg5: memref<1x32xf32, #tpu.memory_space<vmem>>, %arg6: memref<32x64xbf16, #tpu.memory_space<vmem>>, %arg7: memref<1x64xf32, #tpu.memory_space<vmem>>, %arg8: memref<32x32xbf16, #tpu.memory_space<vmem>>, %arg9: memref<1x32xf32, #tpu.memory_space<vmem>>, %arg10: memref<1x8x32xbf16, #tpu.memory_space<vmem>>, %arg11: memref<8x32xbf16, #tpu.memory_space<vmem>>, %arg12: memref<4x8x8xbf16, #tpu.memory_space<vmem>>, %arg13: memref<4x8x8xbf16, #tpu.memory_space<vmem>>) attributes {dimension_semantics = [#tpu.dimension_semantics<parallel>, #tpu.dimension_semantics<arbitrary>], iteration_bounds = array<i64: 2, 1>, scalar_prefetch = 0 : i64, scratch_operands = 3 : i64, tpu.core_type = #tpu.core_type<tc>, window_params = [{transform_indices = @transform_0, window_bounds = array<i64: 1, 8, 32>}, {transform_indices = @transform_1, window_bounds = array<i64: 1, 6, 32>}, {pipeline_mode = #tpu.pipeline_mode<synchronous>, transform_indices = @transform_2, window_bounds = array<i64: 32, 32>}, {pipeline_mode = #tpu.pipeline_mode<synchronous>, transform_indices = @transform_3, window_bounds = array<i64: 1, 32>}, {pipeline_mode = #tpu.pipeline_mode<synchronous>, transform_indices = @transform_4, window_bounds = array<i64: 32, 64>}, {pipeline_mode = #tpu.pipeline_mode<synchronous>, transform_indices = @transform_5, window_bounds = array<i64: 1, 64>}, {pipeline_mode = #tpu.pipeline_mode<synchronous>, transform_indices = @transform_6, window_bounds = array<i64: 32, 32>}, {pipeline_mode = #tpu.pipeline_mode<synchronous>, transform_indices = @transform_7, window_bounds = array<i64: 1, 32>}, {transform_indices = @transform_8, window_bounds = array<i64: 1, 8, 32>}]} {
    %c0 = arith.constant 0 : index
    %c0_0 = arith.constant 0 : index
    %c0_1 = arith.constant 0 : index
    %0 = vector.load %arg3[%c0, %c0_0, %c0_1] : memref<1x6x32xf32, #tpu.memory_space<vmem>>, vector<1x6x32xf32>
    %1 = vector.shape_cast %0 : vector<1x6x32xf32> to vector<6x32xf32>
    %c0_i32 = arith.constant 0 : i32
    %2 = arith.cmpi eq, %arg1, %c0_i32 : i32
    %3 = arith.extui %2 : i1 to i32
    %c0_i32_2 = arith.constant 0 : i32
    %4 = arith.cmpi ne, %3, %c0_i32_2 : i32
    scf.if %4 {
      %c0_27 = arith.constant 0 : index
      %c0_28 = arith.constant 0 : index
      %c0_29 = arith.constant 0 : index
      %50 = vector.load %arg2[%c0_27, %c0_28, %c0_29] : memref<1x8x32xbf16, #tpu.memory_space<vmem>>, vector<1x8x32xbf16>
      %51 = vector.shape_cast %50 : vector<1x8x32xbf16> to vector<8x32xbf16>
      %52 = arith.extf %51 : vector<8x32xbf16> to vector<8x32xf32>
      %53 = vector.extract_strided_slice %1 {offsets = [0, 0], sizes = [1, 32], strides = [1, 1]} : vector<6x32xf32> to vector<1x32xf32>
      %54 = vector.extract_strided_slice %1 {offsets = [1, 0], sizes = [1, 32], strides = [1, 1]} : vector<6x32xf32> to vector<1x32xf32>
      %cst_30 = arith.constant dense<0.000000e+00> : vector<8xf32>
      %55 = vector.multi_reduction <add>, %52, %cst_30 [1] : vector<8x32xf32> to vector<8xf32>
      %56 = vector.shape_cast %55 : vector<8xf32> to vector<8x1xf32>
      %cst_31 = arith.constant 3.200000e+01 : f32
      %57 = vector.broadcast %cst_31 : f32 to vector<8x1xf32>
      %58 = arith.divf %56, %57 : vector<8x1xf32>
      %59 = vector.broadcast %58 : vector<8x1xf32> to vector<8x32xf32>
      %60 = arith.subf %52, %59 : vector<8x32xf32>
      %61 = arith.mulf %60, %60 : vector<8x32xf32>
      %cst_32 = arith.constant dense<0.000000e+00> : vector<8xf32>
      %62 = vector.multi_reduction <add>, %61, %cst_32 [1] : vector<8x32xf32> to vector<8xf32>
      %63 = vector.shape_cast %62 : vector<8xf32> to vector<8x1xf32>
      %cst_33 = arith.constant 3.200000e+01 : f32
      %64 = vector.broadcast %cst_33 : f32 to vector<8x1xf32>
      %65 = arith.divf %63, %64 : vector<8x1xf32>
      %66 = vector.broadcast %58 : vector<8x1xf32> to vector<8x32xf32>
      %67 = arith.subf %52, %66 : vector<8x32xf32>
      %cst_34 = arith.constant 9.99999997E-7 : f32
      %68 = vector.broadcast %cst_34 : f32 to vector<8x1xf32>
      %69 = arith.addf %65, %68 : vector<8x1xf32>
      %70 = math.rsqrt %69 : vector<8x1xf32>
      %71 = vector.broadcast %70 : vector<8x1xf32> to vector<8x32xf32>
      %72 = arith.mulf %67, %71 : vector<8x32xf32>
      %cst_35 = arith.constant 1.000000e+00 : f32
      %73 = vector.broadcast %cst_35 : f32 to vector<1x32xf32>
      %74 = arith.addf %73, %54 : vector<1x32xf32>
      %75 = vector.broadcast %74 : vector<1x32xf32> to vector<8x32xf32>
      %76 = arith.mulf %72, %75 : vector<8x32xf32>
      %77 = vector.broadcast %53 : vector<1x32xf32> to vector<8x32xf32>
      %78 = arith.addf %76, %77 : vector<8x32xf32>
      %79 = arith.truncf %78 : vector<8x32xf32> to vector<8x32xbf16>
      %c0_36 = arith.constant 0 : index
      %c0_37 = arith.constant 0 : index
      %80 = vector.load %arg11[%c0_36, %c0_37] : memref<8x32xbf16, #tpu.memory_space<vmem>>, vector<8x32xbf16>
      tpu.vector_store %arg11[%c0_36, %c0_37], %79 {strides = array<i32>} : memref<8x32xbf16, #tpu.memory_space<vmem>>, vector<8x32xbf16>,
      %81 = arith.truncf %78 : vector<8x32xf32> to vector<8x32xbf16>
      %c0_38 = arith.constant 0 : index
      %c0_39 = arith.constant 0 : index
      %82 = vector.load %arg6[%c0_38, %c0_39] : memref<32x64xbf16, #tpu.memory_space<vmem>>, vector<32x64xbf16>
      %cst_40 = arith.constant dense<0.000000e+00> : vector<8x64xf32>
      %83 = tpu.matmul %81, %82, %cst_40 {dimension_numbers = #tpu.dot_dimension_numbers<[1], [0], [0], [1], [0, 0, 1, 1], [], []>} : vector<8x32xbf16>, vector<32x64xbf16>, vector<8x64xf32> -> vector<8x64xf32>
      %c0_41 = arith.constant 0 : index
      %c0_42 = arith.constant 0 : index
      %84 = vector.load %arg7[%c0_41, %c0_42] : memref<1x64xf32, #tpu.memory_space<vmem>>, vector<1x64xf32>
      %85 = vector.broadcast %84 : vector<1x64xf32> to vector<8x64xf32>
      %86 = arith.addf %83, %85 : vector<8x64xf32>
      %87 = vector.extract_strided_slice %86 {offsets = [0, 0], sizes = [8, 32], strides = [1, 1]} : vector<8x64xf32> to vector<8x32xf32>
      %88 = vector.shape_cast %87 : vector<8x32xf32> to vector<8x4x8xf32>
      %89 = tpu.transpose %88, [1, 0, 2] : vector<8x4x8xf32> -> vector<4x8x8xf32>
      %90 = arith.truncf %89 : vector<4x8x8xf32> to vector<4x8x8xbf16>
      %c0_43 = arith.constant 0 : index
      %c0_44 = arith.constant 0 : index
      %c0_45 = arith.constant 0 : index
      %91 = vector.load %arg12[%c0_43, %c0_44, %c0_45] : memref<4x8x8xbf16, #tpu.memory_space<vmem>>, vector<4x8x8xbf16>
      tpu.vector_store %arg12[%c0_43, %c0_44, %c0_45], %90 {strides = array<i32>} : memref<4x8x8xbf16, #tpu.memory_space<vmem>>, vector<4x8x8xbf16>,
      %92 = vector.extract_strided_slice %86 {offsets = [0, 32], sizes = [8, 32], strides = [1, 1]} : vector<8x64xf32> to vector<8x32xf32>
      %93 = vector.shape_cast %92 : vector<8x32xf32> to vector<8x4x8xf32>
      %94 = tpu.transpose %93, [1, 0, 2] : vector<8x4x8xf32> -> vector<4x8x8xf32>
      %95 = arith.truncf %94 : vector<4x8x8xf32> to vector<4x8x8xbf16>
      %c0_46 = arith.constant 0 : index
      %c0_47 = arith.constant 0 : index
      %c0_48 = arith.constant 0 : index
      %96 = vector.load %arg13[%c0_46, %c0_47, %c0_48] : memref<4x8x8xbf16, #tpu.memory_space<vmem>>, vector<4x8x8xbf16>
      tpu.vector_store %arg13[%c0_46, %c0_47, %c0_48], %95 {strides = array<i32>} : memref<4x8x8xbf16, #tpu.memory_space<vmem>>, vector<4x8x8xbf16>,
    } else {
    }
    %c8_i32 = arith.constant 8 : i32
    %5 = arith.muli %arg1, %c8_i32 : i32
    %6 = tpu.assume_multiple %5, 8 : i32
    %7 = arith.index_cast %6 : i32 to index
    %c0_3 = arith.constant 0 : index
    %8 = vector.load %arg11[%7, %c0_3] : memref<8x32xbf16, #tpu.memory_space<vmem>>, vector<8x32xbf16>
    %c0_4 = arith.constant 0 : index
    %c0_5 = arith.constant 0 : index
    %9 = vector.load %arg4[%c0_4, %c0_5] : memref<32x32xbf16, #tpu.memory_space<vmem>>, vector<32x32xbf16>
    %cst = arith.constant dense<0.000000e+00> : vector<8x32xf32>
    %10 = tpu.matmul %8, %9, %cst {dimension_numbers = #tpu.dot_dimension_numbers<[1], [0], [0], [1], [0, 0, 1, 1], [], []>} : vector<8x32xbf16>, vector<32x32xbf16>, vector<8x32xf32> -> vector<8x32xf32>
    %c0_6 = arith.constant 0 : index
    %c0_7 = arith.constant 0 : index
    %11 = vector.load %arg5[%c0_6, %c0_7] : memref<1x32xf32, #tpu.memory_space<vmem>>, vector<1x32xf32>
    %12 = vector.broadcast %11 : vector<1x32xf32> to vector<8x32xf32>
    %13 = arith.addf %10, %12 : vector<8x32xf32>
    %cst_8 = arith.constant 0.353553385 : f32
    %14 = vector.broadcast %cst_8 : f32 to vector<8x32xf32>
    %15 = arith.mulf %13, %14 : vector<8x32xf32>
    %16 = vector.shape_cast %15 : vector<8x32xf32> to vector<8x4x8xf32>
    %17 = tpu.transpose %16, [1, 0, 2] : vector<8x4x8xf32> -> vector<4x8x8xf32>
    %18 = arith.truncf %17 : vector<4x8x8xf32> to vector<4x8x8xbf16>
    %c0_9 = arith.constant 0 : index
    %c0_10 = arith.constant 0 : index
    %c0_11 = arith.constant 0 : index
    %19 = vector.load %arg12[%c0_9, %c0_10, %c0_11] : memref<4x8x8xbf16, #tpu.memory_space<vmem>>, vector<4x8x8xbf16>
    %c0_12 = arith.constant 0 : index
    %c0_13 = arith.constant 0 : index
    %c0_14 = arith.constant 0 : index
    %20 = vector.load %arg13[%c0_12, %c0_13, %c0_14] : memref<4x8x8xbf16, #tpu.memory_space<vmem>>, vector<4x8x8xbf16>
    "tpu.trace_start"() <{level = 10 : i32, message = "hqd,hkd->hqk"}> : () -> ()
    %cst_15 = arith.constant dense<0.000000e+00> : vector<4x8x8xf32>
    %21 = tpu.matmul %18, %19, %cst_15 {dimension_numbers = #tpu.dot_dimension_numbers<[2], [2], [1], [1], [0, 0, 0, 1, 1, 1], [0], [0]>} : vector<4x8x8xbf16>, vector<4x8x8xbf16>, vector<4x8x8xf32> -> vector<4x8x8xf32>
    "tpu.trace_stop"() : () -> ()
    %cst_16 = arith.constant dense<0xFF800000> : vector<4x8xf32>
    %22 = vector.multi_reduction <maximumf>, %21, %cst_16 [2] : vector<4x8x8xf32> to vector<4x8xf32>
    %23 = vector.shape_cast %22 : vector<4x8xf32> to vector<4x8x1xf32>
    %24 = vector.broadcast %23 : vector<4x8x1xf32> to vector<4x8x8xf32>
    %25 = arith.subf %21, %24 : vector<4x8x8xf32>
    %26 = math.exp %25 : vector<4x8x8xf32>
    %cst_17 = arith.constant dense<0.000000e+00> : vector<4x8xf32>
    %27 = vector.multi_reduction <add>, %26, %cst_17 [2] : vector<4x8x8xf32> to vector<4x8xf32>
    %28 = vector.shape_cast %27 : vector<4x8xf32> to vector<4x8x1xf32>
    %29 = vector.broadcast %28 : vector<4x8x1xf32> to vector<4x8x8xf32>
    %30 = arith.divf %26, %29 : vector<4x8x8xf32>
    %31 = arith.truncf %30 : vector<4x8x8xf32> to vector<4x8x8xbf16>
    "tpu.trace_start"() <{level = 10 : i32, message = "hqk,hkd->hqd"}> : () -> ()
    %cst_18 = arith.constant dense<0.000000e+00> : vector<4x8x8xf32>
    %32 = tpu.matmul %31, %20, %cst_18 {dimension_numbers = #tpu.dot_dimension_numbers<[2], [1], [1], [2], [0, 0, 0, 1, 1, 2], [0], [0]>} : vector<4x8x8xbf16>, vector<4x8x8xbf16>, vector<4x8x8xf32> -> vector<4x8x8xf32>
    "tpu.trace_stop"() : () -> ()
    %33 = tpu.transpose %32, [1, 0, 2] : vector<4x8x8xf32> -> vector<8x4x8xf32>
    %34 = vector.shape_cast %33 : vector<8x4x8xf32> to vector<8x32xf32>
    %35 = arith.truncf %34 : vector<8x32xf32> to vector<8x32xbf16>
    %c0_19 = arith.constant 0 : index
    %c0_20 = arith.constant 0 : index
    %36 = vector.load %arg8[%c0_19, %c0_20] : memref<32x32xbf16, #tpu.memory_space<vmem>>, vector<32x32xbf16>
    %cst_21 = arith.constant dense<0.000000e+00> : vector<8x32xf32>
    %37 = tpu.matmul %35, %36, %cst_21 {dimension_numbers = #tpu.dot_dimension_numbers<[1], [0], [0], [1], [0, 0, 1, 1], [], []>} : vector<8x32xbf16>, vector<32x32xbf16>, vector<8x32xf32> -> vector<8x32xf32>
    %c0_22 = arith.constant 0 : index
    %c0_23 = arith.constant 0 : index
    %38 = vector.load %arg9[%c0_22, %c0_23] : memref<1x32xf32, #tpu.memory_space<vmem>>, vector<1x32xf32>
    %39 = vector.broadcast %38 : vector<1x32xf32> to vector<8x32xf32>
    %40 = arith.addf %37, %39 : vector<8x32xf32>
    %41 = vector.extract_strided_slice %1 {offsets = [2, 0], sizes = [1, 32], strides = [1, 1]} : vector<6x32xf32> to vector<1x32xf32>
    %42 = arith.extf %8 : vector<8x32xbf16> to vector<8x32xf32>
    %43 = vector.broadcast %41 : vector<1x32xf32> to vector<8x32xf32>
    %44 = arith.mulf %43, %40 : vector<8x32xf32>
    %45 = arith.addf %42, %44 : vector<8x32xf32>
    %46 = arith.truncf %45 : vector<8x32xf32> to vector<8x32xbf16>
    %c0_24 = arith.constant 0 : index
    %c0_25 = arith.constant 0 : index
    %c0_26 = arith.constant 0 : index
    %47 = vector.load %arg10[%c0_24, %c0_25, %c0_26] : memref<1x8x32xbf16, #tpu.memory_space<vmem>>, vector<1x8x32xbf16>
    %48 = vector.shape_cast %47 : vector<1x8x32xbf16> to vector<8x32xbf16>
    %49 = vector.shape_cast %46 : vector<8x32xbf16> to vector<1x8x32xbf16>
    tpu.vector_store %arg10[%c0_24, %c0_25, %c0_26], %49 {strides = array<i32>} : memref<1x8x32xbf16, #tpu.memory_space<vmem>>, vector<1x8x32xbf16>,
    return
  }
  func.func @transform_0(%arg0: i32, %arg1: i32) -> (i32, i32, i32) {
    %c0_i32 = arith.constant 0 : i32
    %c0_i32_0 = arith.constant 0 : i32
    %c0_i32_1 = arith.constant 0 : i32
    return %arg0, %c0_i32, %c0_i32_0 : i32, i32, i32
  }
  func.func @transform_1(%arg0: i32, %arg1: i32) -> (i32, i32, i32) {
    %c0_i32 = arith.constant 0 : i32
    %c0_i32_0 = arith.constant 0 : i32
    %c0_i32_1 = arith.constant 0 : i32
    return %arg0, %c0_i32, %c0_i32_0 : i32, i32, i32
  }
  func.func @transform_2(%arg0: i32, %arg1: i32) -> (i32, i32) {
    %c0_i32 = arith.constant 0 : i32
    %c0_i32_0 = arith.constant 0 : i32
    %c0_i32_1 = arith.constant 0 : i32
    return %c0_i32, %c0_i32_0 : i32, i32
  }
  func.func @transform_3(%arg0: i32, %arg1: i32) -> (i32, i32) {
    %c0_i32 = arith.constant 0 : i32
    %c0_i32_0 = arith.constant 0 : i32
    %c0_i32_1 = arith.constant 0 : i32
    return %c0_i32, %c0_i32_0 : i32, i32
  }
  func.func @transform_4(%arg0: i32, %arg1: i32) -> (i32, i32) {
    %c0_i32 = arith.constant 0 : i32
    %c0_i32_0 = arith.constant 0 : i32
    %c0_i32_1 = arith.constant 0 : i32
    return %c0_i32, %c0_i32_0 : i32, i32
  }
  func.func @transform_5(%arg0: i32, %arg1: i32) -> (i32, i32) {
    %c0_i32 = arith.constant 0 : i32
    %c0_i32_0 = arith.constant 0 : i32
    %c0_i32_1 = arith.constant 0 : i32
    return %c0_i32, %c0_i32_0 : i32, i32
  }
  func.func @transform_6(%arg0: i32, %arg1: i32) -> (i32, i32) {
    %c0_i32 = arith.constant 0 : i32
    %c0_i32_0 = arith.constant 0 : i32
    %c0_i32_1 = arith.constant 0 : i32
    return %c0_i32, %c0_i32_0 : i32, i32
  }
  func.func @transform_7(%arg0: i32, %arg1: i32) -> (i32, i32) {
    %c0_i32 = arith.constant 0 : i32
    %c0_i32_0 = arith.constant 0 : i32
    %c0_i32_1 = arith.constant 0 : i32
    return %c0_i32, %c0_i32_0 : i32, i32
  }
  func.func @transform_8(%arg0: i32, %arg1: i32) -> (i32, i32, i32) {
    %c0_i32 = arith.constant 0 : i32
    %c0_i32_0 = arith.constant 0 : i32
    return %arg0, %arg1, %c0_i32 : i32, i32, i32
  }
}

module attributes {stable_mosaic.version = 11 : i64} {
  func.func @_ffn_block_kernel(%arg0: i32, %arg1: i32, %arg2: i32, %arg3: memref<1x8x32xbf16, #tpu.memory_space<vmem>>, %arg4: memref<1x6x32xf32, #tpu.memory_space<vmem>>, %arg5: memref<32x128xbf16, #tpu.memory_space<vmem>>, %arg6: memref<1x128xf32, #tpu.memory_space<vmem>>, %arg7: memref<32x128xbf16, #tpu.memory_space<vmem>>, %arg8: memref<1x128xf32, #tpu.memory_space<vmem>>, %arg9: memref<128x32xbf16, #tpu.memory_space<vmem>>, %arg10: memref<1x32xf32, #tpu.memory_space<vmem>>, %arg11: memref<1x8x32xbf16, #tpu.memory_space<vmem>>, %arg12: memref<8x32xbf16, #tpu.memory_space<vmem>>, %arg13: memref<8x32xf32, #tpu.memory_space<vmem>>) attributes {dimension_semantics = [#tpu.dimension_semantics<parallel>, #tpu.dimension_semantics<parallel>, #tpu.dimension_semantics<arbitrary>], iteration_bounds = array<i64: 2, 1, 1>, scalar_prefetch = 0 : i64, scratch_operands = 2 : i64, tpu.core_type = #tpu.core_type<tc>, window_params = [{transform_indices = @transform_0, window_bounds = array<i64: 1, 8, 32>}, {transform_indices = @transform_1, window_bounds = array<i64: 1, 6, 32>}, {transform_indices = @transform_2, window_bounds = array<i64: 32, 128>}, {transform_indices = @transform_3, window_bounds = array<i64: 1, 128>}, {transform_indices = @transform_4, window_bounds = array<i64: 32, 128>}, {transform_indices = @transform_5, window_bounds = array<i64: 1, 128>}, {transform_indices = @transform_6, window_bounds = array<i64: 128, 32>}, {pipeline_mode = #tpu.pipeline_mode<synchronous>, transform_indices = @transform_7, window_bounds = array<i64: 1, 32>}, {transform_indices = @transform_8, window_bounds = array<i64: 1, 8, 32>}]} {
    %c0 = arith.constant 0 : index
    %c0_0 = arith.constant 0 : index
    %c0_1 = arith.constant 0 : index
    %0 = vector.load %arg4[%c0, %c0_0, %c0_1] : memref<1x6x32xf32, #tpu.memory_space<vmem>>, vector<1x6x32xf32>
    %1 = vector.shape_cast %0 : vector<1x6x32xf32> to vector<6x32xf32>
    %c0_i32 = arith.constant 0 : i32
    %2 = arith.cmpi eq, %arg2, %c0_i32 : i32
    %3 = arith.extui %2 : i1 to i32
    %c0_i32_2 = arith.constant 0 : i32
    %4 = arith.cmpi ne, %3, %c0_i32_2 : i32
    scf.if %4 {
      %c0_26 = arith.constant 0 : index
      %c0_27 = arith.constant 0 : index
      %c0_28 = arith.constant 0 : index
      %34 = vector.load %arg3[%c0_26, %c0_27, %c0_28] : memref<1x8x32xbf16, #tpu.memory_space<vmem>>, vector<1x8x32xbf16>
      %35 = vector.shape_cast %34 : vector<1x8x32xbf16> to vector<8x32xbf16>
      %36 = arith.extf %35 : vector<8x32xbf16> to vector<8x32xf32>
      %37 = vector.extract_strided_slice %1 {offsets = [3, 0], sizes = [1, 32], strides = [1, 1]} : vector<6x32xf32> to vector<1x32xf32>
      %38 = vector.extract_strided_slice %1 {offsets = [4, 0], sizes = [1, 32], strides = [1, 1]} : vector<6x32xf32> to vector<1x32xf32>
      %cst_29 = arith.constant dense<0.000000e+00> : vector<8xf32>
      %39 = vector.multi_reduction <add>, %36, %cst_29 [1] : vector<8x32xf32> to vector<8xf32>
      %40 = vector.shape_cast %39 : vector<8xf32> to vector<8x1xf32>
      %cst_30 = arith.constant 3.200000e+01 : f32
      %41 = vector.broadcast %cst_30 : f32 to vector<8x1xf32>
      %42 = arith.divf %40, %41 : vector<8x1xf32>
      %43 = vector.broadcast %42 : vector<8x1xf32> to vector<8x32xf32>
      %44 = arith.subf %36, %43 : vector<8x32xf32>
      %45 = arith.mulf %44, %44 : vector<8x32xf32>
      %cst_31 = arith.constant dense<0.000000e+00> : vector<8xf32>
      %46 = vector.multi_reduction <add>, %45, %cst_31 [1] : vector<8x32xf32> to vector<8xf32>
      %47 = vector.shape_cast %46 : vector<8xf32> to vector<8x1xf32>
      %cst_32 = arith.constant 3.200000e+01 : f32
      %48 = vector.broadcast %cst_32 : f32 to vector<8x1xf32>
      %49 = arith.divf %47, %48 : vector<8x1xf32>
      %50 = vector.broadcast %42 : vector<8x1xf32> to vector<8x32xf32>
      %51 = arith.subf %36, %50 : vector<8x32xf32>
      %cst_33 = arith.constant 9.99999997E-7 : f32
      %52 = vector.broadcast %cst_33 : f32 to vector<8x1xf32>
      %53 = arith.addf %49, %52 : vector<8x1xf32>
      %54 = math.rsqrt %53 : vector<8x1xf32>
      %55 = vector.broadcast %54 : vector<8x1xf32> to vector<8x32xf32>
      %56 = arith.mulf %51, %55 : vector<8x32xf32>
      %cst_34 = arith.constant 1.000000e+00 : f32
      %57 = vector.broadcast %cst_34 : f32 to vector<1x32xf32>
      %58 = arith.addf %57, %38 : vector<1x32xf32>
      %59 = vector.broadcast %58 : vector<1x32xf32> to vector<8x32xf32>
      %60 = arith.mulf %56, %59 : vector<8x32xf32>
      %61 = vector.broadcast %37 : vector<1x32xf32> to vector<8x32xf32>
      %62 = arith.addf %60, %61 : vector<8x32xf32>
      %63 = arith.truncf %62 : vector<8x32xf32> to vector<8x32xbf16>
      %c0_35 = arith.constant 0 : index
      %c0_36 = arith.constant 0 : index
      %64 = vector.load %arg12[%c0_35, %c0_36] : memref<8x32xbf16, #tpu.memory_space<vmem>>, vector<8x32xbf16>
      tpu.vector_store %arg12[%c0_35, %c0_36], %63 {strides = array<i32>} : memref<8x32xbf16, #tpu.memory_space<vmem>>, vector<8x32xbf16>,
      %cst_37 = arith.constant 0.000000e+00 : f32
      %65 = vector.broadcast %cst_37 : f32 to vector<8x32xf32>
      %c0_38 = arith.constant 0 : index
      %c0_39 = arith.constant 0 : index
      %66 = vector.load %arg13[%c0_38, %c0_39] : memref<8x32xf32, #tpu.memory_space<vmem>>, vector<8x32xf32>
      tpu.vector_store %arg13[%c0_38, %c0_39], %65 {strides = array<i32>} : memref<8x32xf32, #tpu.memory_space<vmem>>, vector<8x32xf32>,
    } else {
    }
    %c0_3 = arith.constant 0 : index
    %c0_4 = arith.constant 0 : index
    %5 = vector.load %arg12[%c0_3, %c0_4] : memref<8x32xbf16, #tpu.memory_space<vmem>>, vector<8x32xbf16>
    %c0_5 = arith.constant 0 : index
    %c0_6 = arith.constant 0 : index
    %6 = vector.load %arg5[%c0_5, %c0_6] : memref<32x128xbf16, #tpu.memory_space<vmem>>, vector<32x128xbf16>
    %cst = arith.constant dense<0.000000e+00> : vector<8x128xf32>
    %7 = tpu.matmul %5, %6, %cst {dimension_numbers = #tpu.dot_dimension_numbers<[1], [0], [0], [1], [0, 0, 1, 1], [], []>} : vector<8x32xbf16>, vector<32x128xbf16>, vector<8x128xf32> -> vector<8x128xf32>
    %c0_7 = arith.constant 0 : index
    %c0_8 = arith.constant 0 : index
    %8 = vector.load %arg6[%c0_7, %c0_8] : memref<1x128xf32, #tpu.memory_space<vmem>>, vector<1x128xf32>
    %9 = vector.broadcast %8 : vector<1x128xf32> to vector<8x128xf32>
    %10 = arith.addf %7, %9 : vector<8x128xf32>
    %c0_9 = arith.constant 0 : index
    %c0_10 = arith.constant 0 : index
    %11 = vector.load %arg7[%c0_9, %c0_10] : memref<32x128xbf16, #tpu.memory_space<vmem>>, vector<32x128xbf16>
    %cst_11 = arith.constant dense<0.000000e+00> : vector<8x128xf32>
    %12 = tpu.matmul %5, %11, %cst_11 {dimension_numbers = #tpu.dot_dimension_numbers<[1], [0], [0], [1], [0, 0, 1, 1], [], []>} : vector<8x32xbf16>, vector<32x128xbf16>, vector<8x128xf32> -> vector<8x128xf32>
    %c0_12 = arith.constant 0 : index
    %c0_13 = arith.constant 0 : index
    %13 = vector.load %arg8[%c0_12, %c0_13] : memref<1x128xf32, #tpu.memory_space<vmem>>, vector<1x128xf32>
    %14 = vector.broadcast %13 : vector<1x128xf32> to vector<8x128xf32>
    %15 = arith.addf %12, %14 : vector<8x128xf32>
    %cst_14 = arith.constant 5.000000e-01 : f32
    %16 = vector.broadcast %cst_14 : f32 to vector<8x128xf32>
    %17 = arith.mulf %16, %15 : vector<8x128xf32>
    %cst_15 = arith.constant 0.707106769 : f32
    %18 = vector.broadcast %cst_15 : f32 to vector<8x128xf32>
    %19 = arith.mulf %15, %18 : vector<8x128xf32>
    %20 = math.erf %19 : vector<8x128xf32>
    %cst_16 = arith.constant 1.000000e+00 : f32
    %21 = vector.broadcast %cst_16 : f32 to vector<8x128xf32>
    %22 = arith.addf %21, %20 : vector<8x128xf32>
    %23 = arith.mulf %17, %22 : vector<8x128xf32>
    %24 = arith.mulf %10, %23 : vector<8x128xf32>
    %c0_17 = arith.constant 0 : index
    %c0_18 = arith.constant 0 : index
    %25 = vector.load %arg13[%c0_17, %c0_18] : memref<8x32xf32, #tpu.memory_space<vmem>>, vector<8x32xf32>
    %26 = arith.truncf %24 : vector<8x128xf32> to vector<8x128xbf16>
    %c0_19 = arith.constant 0 : index
    %c0_20 = arith.constant 0 : index
    %27 = vector.load %arg9[%c0_19, %c0_20] : memref<128x32xbf16, #tpu.memory_space<vmem>>, vector<128x32xbf16>
    %cst_21 = arith.constant dense<0.000000e+00> : vector<8x32xf32>
    %28 = tpu.matmul %26, %27, %cst_21 {dimension_numbers = #tpu.dot_dimension_numbers<[1], [0], [0], [1], [0, 0, 1, 1], [], []>} : vector<8x128xbf16>, vector<128x32xbf16>, vector<8x32xf32> -> vector<8x32xf32>
    %29 = arith.addf %25, %28 : vector<8x32xf32>
    %c0_22 = arith.constant 0 : index
    %c0_23 = arith.constant 0 : index
    %30 = vector.load %arg13[%c0_22, %c0_23] : memref<8x32xf32, #tpu.memory_space<vmem>>, vector<8x32xf32>
    tpu.vector_store %arg13[%c0_22, %c0_23], %29 {strides = array<i32>} : memref<8x32xf32, #tpu.memory_space<vmem>>, vector<8x32xf32>,
    %c0_i32_24 = arith.constant 0 : i32
    %31 = arith.cmpi eq, %arg2, %c0_i32_24 : i32
    %32 = arith.extui %31 : i1 to i32
    %c0_i32_25 = arith.constant 0 : i32
    %33 = arith.cmpi ne, %32, %c0_i32_25 : i32
    scf.if %33 {
      %34 = vector.extract_strided_slice %1 {offsets = [5, 0], sizes = [1, 32], strides = [1, 1]} : vector<6x32xf32> to vector<1x32xf32>
      %c0_26 = arith.constant 0 : index
      %c0_27 = arith.constant 0 : index
      %35 = vector.load %arg13[%c0_26, %c0_27] : memref<8x32xf32, #tpu.memory_space<vmem>>, vector<8x32xf32>
      %c0_28 = arith.constant 0 : index
      %c0_29 = arith.constant 0 : index
      %36 = vector.load %arg10[%c0_28, %c0_29] : memref<1x32xf32, #tpu.memory_space<vmem>>, vector<1x32xf32>
      %37 = vector.broadcast %36 : vector<1x32xf32> to vector<8x32xf32>
      %38 = arith.addf %35, %37 : vector<8x32xf32>
      %c0_30 = arith.constant 0 : index
      %c0_31 = arith.constant 0 : index
      %39 = vector.load %arg12[%c0_30, %c0_31] : memref<8x32xbf16, #tpu.memory_space<vmem>>, vector<8x32xbf16>
      %40 = arith.extf %39 : vector<8x32xbf16> to vector<8x32xf32>
      %41 = vector.broadcast %34 : vector<1x32xf32> to vector<8x32xf32>
      %42 = arith.mulf %41, %38 : vector<8x32xf32>
      %43 = arith.addf %40, %42 : vector<8x32xf32>
      %44 = arith.truncf %43 : vector<8x32xf32> to vector<8x32xbf16>
      %c0_32 = arith.constant 0 : index
      %c0_33 = arith.constant 0 : index
      %c0_34 = arith.constant 0 : index
      %45 = vector.load %arg11[%c0_32, %c0_33, %c0_34] : memref<1x8x32xbf16, #tpu.memory_space<vmem>>, vector<1x8x32xbf16>
      %46 = vector.shape_cast %45 : vector<1x8x32xbf16> to vector<8x32xbf16>
      %47 = vector.shape_cast %44 : vector<8x32xbf16> to vector<1x8x32xbf16>
      tpu.vector_store %arg11[%c0_32, %c0_33, %c0_34], %47 {strides = array<i32>} : memref<1x8x32xbf16, #tpu.memory_space<vmem>>, vector<1x8x32xbf16>,
    } else {
    }
    return
  }
  func.func @transform_0(%arg0: i32, %arg1: i32, %arg2: i32) -> (i32, i32, i32) {
    %c0_i32 = arith.constant 0 : i32
    %c0_i32_0 = arith.constant 0 : i32
    return %arg0, %arg1, %c0_i32 : i32, i32, i32
  }
  func.func @transform_1(%arg0: i32, %arg1: i32, %arg2: i32) -> (i32, i32, i32) {
    %c0_i32 = arith.constant 0 : i32
    %c0_i32_0 = arith.constant 0 : i32
    %c0_i32_1 = arith.constant 0 : i32
    return %arg0, %c0_i32, %c0_i32_0 : i32, i32, i32
  }
  func.func @transform_2(%arg0: i32, %arg1: i32, %arg2: i32) -> (i32, i32) {
    %c0_i32 = arith.constant 0 : i32
    %c0_i32_0 = arith.constant 0 : i32
    return %c0_i32, %arg2 : i32, i32
  }
  func.func @transform_3(%arg0: i32, %arg1: i32, %arg2: i32) -> (i32, i32) {
    %c0_i32 = arith.constant 0 : i32
    %c0_i32_0 = arith.constant 0 : i32
    return %c0_i32, %arg2 : i32, i32
  }
  func.func @transform_4(%arg0: i32, %arg1: i32, %arg2: i32) -> (i32, i32) {
    %c0_i32 = arith.constant 0 : i32
    %c0_i32_0 = arith.constant 0 : i32
    return %c0_i32, %arg2 : i32, i32
  }
  func.func @transform_5(%arg0: i32, %arg1: i32, %arg2: i32) -> (i32, i32) {
    %c0_i32 = arith.constant 0 : i32
    %c0_i32_0 = arith.constant 0 : i32
    return %c0_i32, %arg2 : i32, i32
  }
  func.func @transform_6(%arg0: i32, %arg1: i32, %arg2: i32) -> (i32, i32) {
    %c0_i32 = arith.constant 0 : i32
    %c0_i32_0 = arith.constant 0 : i32
    return %arg2, %c0_i32 : i32, i32
  }
  func.func @transform_7(%arg0: i32, %arg1: i32, %arg2: i32) -> (i32, i32) {
    %c0_i32 = arith.constant 0 : i32
    %c0_i32_0 = arith.constant 0 : i32
    %c0_i32_1 = arith.constant 0 : i32
    return %c0_i32, %c0_i32_0 : i32, i32
  }
  func.func @transform_8(%arg0: i32, %arg1: i32, %arg2: i32) -> (i32, i32, i32) {
    %c0_i32 = arith.constant 0 : i32
    %c0_i32_0 = arith.constant 0 : i32
    return %arg0, %arg1, %c0_i32 : i32, i32, i32
  }
}

module attributes {stable_mosaic.version = 11 : i64} {
  func.func @_final_kernel(%arg0: i32, %arg1: i32, %arg2: memref<1x8x32xbf16, #tpu.memory_space<vmem>>, %arg3: memref<1x2x32xf32, #tpu.memory_space<vmem>>, %arg4: memref<32x128xbf16, #tpu.memory_space<vmem>>, %arg5: memref<1x128xf32, #tpu.memory_space<vmem>>, %arg6: memref<1x8x128xf32, #tpu.memory_space<vmem>>) attributes {dimension_semantics = [#tpu.dimension_semantics<parallel>, #tpu.dimension_semantics<parallel>], iteration_bounds = array<i64: 2, 1>, scalar_prefetch = 0 : i64, scratch_operands = 0 : i64, tpu.core_type = #tpu.core_type<tc>, window_params = [{transform_indices = @transform_0, window_bounds = array<i64: 1, 8, 32>}, {transform_indices = @transform_1, window_bounds = array<i64: 1, 2, 32>}, {pipeline_mode = #tpu.pipeline_mode<synchronous>, transform_indices = @transform_2, window_bounds = array<i64: 32, 128>}, {pipeline_mode = #tpu.pipeline_mode<synchronous>, transform_indices = @transform_3, window_bounds = array<i64: 1, 128>}, {transform_indices = @transform_4, window_bounds = array<i64: 1, 8, 128>}]} {
    %c0 = arith.constant 0 : index
    %c0_0 = arith.constant 0 : index
    %c0_1 = arith.constant 0 : index
    %0 = vector.load %arg2[%c0, %c0_0, %c0_1] : memref<1x8x32xbf16, #tpu.memory_space<vmem>>, vector<1x8x32xbf16>
    %1 = vector.shape_cast %0 : vector<1x8x32xbf16> to vector<8x32xbf16>
    %2 = arith.extf %1 : vector<8x32xbf16> to vector<8x32xf32>
    %c0_2 = arith.constant 0 : index
    %c0_3 = arith.constant 0 : index
    %c0_4 = arith.constant 0 : index
    %3 = vector.load %arg3[%c0_2, %c0_3, %c0_4] : memref<1x2x32xf32, #tpu.memory_space<vmem>>, vector<1x2x32xf32>
    %4 = vector.shape_cast %3 : vector<1x2x32xf32> to vector<2x32xf32>
    %5 = vector.extract_strided_slice %4 {offsets = [0, 0], sizes = [1, 32], strides = [1, 1]} : vector<2x32xf32> to vector<1x32xf32>
    %6 = vector.extract_strided_slice %4 {offsets = [1, 0], sizes = [1, 32], strides = [1, 1]} : vector<2x32xf32> to vector<1x32xf32>
    %cst = arith.constant dense<0.000000e+00> : vector<8xf32>
    %7 = vector.multi_reduction <add>, %2, %cst [1] : vector<8x32xf32> to vector<8xf32>
    %8 = vector.shape_cast %7 : vector<8xf32> to vector<8x1xf32>
    %cst_5 = arith.constant 3.200000e+01 : f32
    %9 = vector.broadcast %cst_5 : f32 to vector<8x1xf32>
    %10 = arith.divf %8, %9 : vector<8x1xf32>
    %11 = vector.broadcast %10 : vector<8x1xf32> to vector<8x32xf32>
    %12 = arith.subf %2, %11 : vector<8x32xf32>
    %13 = arith.mulf %12, %12 : vector<8x32xf32>
    %cst_6 = arith.constant dense<0.000000e+00> : vector<8xf32>
    %14 = vector.multi_reduction <add>, %13, %cst_6 [1] : vector<8x32xf32> to vector<8xf32>
    %15 = vector.shape_cast %14 : vector<8xf32> to vector<8x1xf32>
    %cst_7 = arith.constant 3.200000e+01 : f32
    %16 = vector.broadcast %cst_7 : f32 to vector<8x1xf32>
    %17 = arith.divf %15, %16 : vector<8x1xf32>
    %18 = vector.broadcast %10 : vector<8x1xf32> to vector<8x32xf32>
    %19 = arith.subf %2, %18 : vector<8x32xf32>
    %cst_8 = arith.constant 9.99999997E-7 : f32
    %20 = vector.broadcast %cst_8 : f32 to vector<8x1xf32>
    %21 = arith.addf %17, %20 : vector<8x1xf32>
    %22 = math.rsqrt %21 : vector<8x1xf32>
    %23 = vector.broadcast %22 : vector<8x1xf32> to vector<8x32xf32>
    %24 = arith.mulf %19, %23 : vector<8x32xf32>
    %cst_9 = arith.constant 1.000000e+00 : f32
    %25 = vector.broadcast %cst_9 : f32 to vector<1x32xf32>
    %26 = arith.addf %25, %6 : vector<1x32xf32>
    %27 = vector.broadcast %26 : vector<1x32xf32> to vector<8x32xf32>
    %28 = arith.mulf %24, %27 : vector<8x32xf32>
    %29 = vector.broadcast %5 : vector<1x32xf32> to vector<8x32xf32>
    %30 = arith.addf %28, %29 : vector<8x32xf32>
    %31 = arith.truncf %30 : vector<8x32xf32> to vector<8x32xbf16>
    %c0_10 = arith.constant 0 : index
    %c0_11 = arith.constant 0 : index
    %32 = vector.load %arg4[%c0_10, %c0_11] : memref<32x128xbf16, #tpu.memory_space<vmem>>, vector<32x128xbf16>
    %cst_12 = arith.constant dense<0.000000e+00> : vector<8x128xf32>
    %33 = tpu.matmul %31, %32, %cst_12 {dimension_numbers = #tpu.dot_dimension_numbers<[1], [0], [0], [1], [0, 0, 1, 1], [], []>} : vector<8x32xbf16>, vector<32x128xbf16>, vector<8x128xf32> -> vector<8x128xf32>
    %c0_13 = arith.constant 0 : index
    %c0_14 = arith.constant 0 : index
    %34 = vector.load %arg5[%c0_13, %c0_14] : memref<1x128xf32, #tpu.memory_space<vmem>>, vector<1x128xf32>
    %35 = vector.broadcast %34 : vector<1x128xf32> to vector<8x128xf32>
    %36 = arith.addf %33, %35 : vector<8x128xf32>
    %c0_15 = arith.constant 0 : index
    %c0_16 = arith.constant 0 : index
    %c0_17 = arith.constant 0 : index
    %37 = vector.load %arg6[%c0_15, %c0_16, %c0_17] : memref<1x8x128xf32, #tpu.memory_space<vmem>>, vector<1x8x128xf32>
    %38 = vector.shape_cast %37 : vector<1x8x128xf32> to vector<8x128xf32>
    %39 = vector.shape_cast %36 : vector<8x128xf32> to vector<1x8x128xf32>
    tpu.vector_store %arg6[%c0_15, %c0_16, %c0_17], %39 {strides = array<i32>} : memref<1x8x128xf32, #tpu.memory_space<vmem>>, vector<1x8x128xf32>,
    return
  }
  func.func @transform_0(%arg0: i32, %arg1: i32) -> (i32, i32, i32) {
    %c0_i32 = arith.constant 0 : i32
    %c0_i32_0 = arith.constant 0 : i32
    return %arg0, %arg1, %c0_i32 : i32, i32, i32
  }
  func.func @transform_1(%arg0: i32, %arg1: i32) -> (i32, i32, i32) {
    %c0_i32 = arith.constant 0 : i32
    %c0_i32_0 = arith.constant 0 : i32
    %c0_i32_1 = arith.constant 0 : i32
    return %arg0, %c0_i32, %c0_i32_0 : i32, i32, i32
  }
  func.func @transform_2(%arg0: i32, %arg1: i32) -> (i32, i32) {
    %c0_i32 = arith.constant 0 : i32
    %c0_i32_0 = arith.constant 0 : i32
    %c0_i32_1 = arith.constant 0 : i32
    return %c0_i32, %c0_i32_0 : i32, i32
  }
  func.func @transform_3(%arg0: i32, %arg1: i32) -> (i32, i32) {
    %c0_i32 = arith.constant 0 : i32
    %c0_i32_0 = arith.constant 0 : i32
    %c0_i32_1 = arith.constant 0 : i32
    return %c0_i32, %c0_i32_0 : i32, i32
  }
  func.func @transform_4(%arg0: i32, %arg1: i32) -> (i32, i32, i32) {
    %c0_i32 = arith.constant 0 : i32
    %c0_i32_0 = arith.constant 0 : i32
    return %arg0, %arg1, %c0_i32 : i32, i32, i32
  }
}

</mosaic_0001>

<bundles_post_ra>
// kernel: dit_forward.8
= control target key start
LH: loop header
LB: loop body
LE: loop exit
PB: predicated region body
PF: predicated region fallthrough
CT: control target
= control target key end

     0   :  { %s497_s15 = smov 0   ;;  %s499_s16 = smov 0   ;;  %s539_s0 = inlined_call_operand.vmem [shape: f32[2,8,16], index: 0, kind: input, shape index: {}]   ;;  %s540_s1 = inlined_call_operand.vmem [shape: bf16[16,32], index: 1, kind: input, shape index: {}]   ;;  %s541_s2 = inlined_call_operand.vmem [shape: f32[1,32], index: 2, kind: input, shape index: {}]   ;;  %s542_s3 = inlined_call_operand.vmem [shape: f32[1,8,32], index: 3, kind: input, shape index: {}]   ;;  %s543_s4 = inlined_call_operand.vmem [shape: bf16[2,8,32], index: 4, kind: output, shape index: {}]  }
   0x1   :  { %s501_s17 = smov 0  }
   0x2 LB: > { %s26_s18 = sadd.s32 1, %s464_s16  ;;  %p403_p0 = scmp.ge.s32.totalorder %s468_s17, 1  ;;  %s468_s17 = sphi %s501_s17, %s14_s17   ;;  %s464_s16 = sphi %s499_s16, %s545_s16   ;;  %s460_s15 = sphi %s497_s15, %s544_s15  }
   0x3   : > { %p28_p1 = scmp.ge.s32.totalorder %s26_s18, 2  ;;  %p189_p2 = scmp.lt.s32.totalorder %s468_s17, 3 }
   0x5   : > { %s547_s18 = smov (%p28_p1, %s26_s18), 0  ;;  %p190_p3 = pnand %p403_p0, %p189_p2 }
   0x6   : > { %v445_v0 = vld [vmem:[%s540_s1] sm:$0xff] (!%p190_p3)   ;;  %v470_v1 = vmov (!%p190_p3), 0.0   ;;  %p223_p4 = scmp.lt.s32.totalorder (!%p190_p3), %s460_s15, 1  ;;  %vm471_vm0 = vmmov (!%p190_p3), 0   ;;  %vm259_vm1 = vcmask (!%p190_p3), 130048   ;;  %vm306_vm2 = vcmask (!%p190_p3), 257024  }
   0x7   : > { %193 = sbr.rel (%p190_p3) target bundleno = 239 (0xef), region = 36  ;;  %413 = vmatprep.subr.bf16.mxu0 (!%p190_p3), %v470_v1  ;;  %415 = vmatprep.mubr.msk.bf16.mxu0 (!%p190_p3), %vm471_vm0, %v470_v1  ;;  %v406_v4 = vld [vmem:[%s541_s2] ss:$0 sm:$0xff] (!%p190_p3) }
   0x8   : > { %414 = vmatpush3.bf16.msra.mxu0 (!%p190_p3), %v445_v0  ;;  %v303_v6 = vld [vmem:[%s542_s3] sm:$0xff] (!%p190_p3) }
   0xe   : > { %s549_s15 = smov (!%p223_p4, %s460_s15), 1 }
   0xf   : > { %s404_s21 = sshll.u32 %s549_s15, 3  ;;  %s405_s29 = sshll.u32 %s549_s15, 2 }
  0x10   : > { %s229_s24 = scalar_lea.vmem %s539_s0, %s404_s21  ;;  %s240_s6 = scalar_lea.vmem %s543_s4, %s405_s29 }
  0x11   : > { %v242_v2 = vld [vmem:[%s229_s24] sm:$0xff] }
  0x12   : > { %v243_v3 = vpack.c.bf16 %v242_v2, %v242_v2 }
  0x14   : > { %416 = vmatmul.mubr.msk.bf16.vlgmr.msra.gmra.mrb[0].mxu0 %vm259_vm1, %v243_v3 }
  0xe7   : > { %v297_v5 = vpop.f32.mrb[0].mxu0 }
  0xe8   : > { %v298_v7 = vadd.f32 %v406_v4, %v297_v5  ;;  %v417_v8 = vpop.f32.mrb[1].mxu0 }
  0xe9   : > { %v300_v9 = vpop.f32.mrb[2].mxu0 }
  0xea   : > { %v304_v10 = vadd.f32 %v303_v6, %v298_v7  ;;  %v418_v11 = vpop.f32.mrb[3].mxu0 }
  0xec   : > { %v305_v12 = vpack.c.bf16 %v304_v10, %v304_v10 }
  0xee   : > { %307 = vst.msk [vmem:[%s240_s6] sm:$0xf] %vm306_vm2, %v305_v12 }
  0xef PF: > { %s14_s17 = sadd.s32 1, %s468_s17   ;;  %s544_s15 = smov %s464_s16 }
  0xf0   : > { %p11_p5 = scmp.ge.s32.totalorder %s14_s17, 4   ;;  %s545_s16 = smov %s547_s18 }
  0xf2   :  { %13 = sbr.rel (!%p11_p5) target bundleno = 2 (0x2), region = 69 }

// kernel: dit_forward.11
= control target key start
LH: loop header
LB: loop body
LE: loop exit
PB: predicated region body
PF: predicated region fallthrough
CT: control target
= control target key end

     0   :  { %s1101_s27 = smov 0   ;;  %s1103_s28 = smov 0   ;;  %s1204_s0 = inlined_call_operand.vmem [shape: bf16[2,8,32], index: 0, kind: input, shape index: {}]   ;;  %s1205_s1 = inlined_call_operand.vmem [shape: f32[2,6,32], index: 1, kind: input, shape index: {}]   ;;  %s1206_s2 = inlined_call_operand.vmem [shape: bf16[32,128], index: 2, kind: input, shape index: {}]   ;;  %s1207_s3 = inlined_call_operand.vmem [shape: f32[1,128], index: 3, kind: input, shape index: {}]   ;;  %s1208_s4 = inlined_call_operand.vmem [shape: bf16[32,128], index: 4, kind: input, shape index: {}]   ;;  %s1209_s5 = inlined_call_operand.vmem [shape: f32[1,128], index: 5, kind: input, shape index: {}]   ;;  %s1210_s6 = inlined_call_operand.vmem [shape: bf16[128,32], index: 6, kind: input, shape index: {}]   ;;  %s1211_s7 = inlined_call_operand.vmem [shape: f32[1,32], index: 7, kind: input, shape index: {}]   ;;  %s1212_s8 = inlined_call_operand.vmem [shape: bf16[2,8,32], index: 8, kind: output, shape index: {}]  }
   0x1   :  { %s1105_s29 = smov 0  }
   0x2 LB: > { %s37_s30 = sadd.s32 1, %s1048_s28  ;;  %p914_p0 = scmp.ge.s32.totalorder %s1052_s29, 1  ;;  %s1052_s29 = sphi %s1105_s29, %s18_s29   ;;  %s1048_s28 = sphi %s1103_s28, %s1214_s28   ;;  %s1044_s27 = sphi %s1101_s27, %s1213_s27  }
   0x3   : > { %p39_p1 = scmp.ge.s32.totalorder %s37_s30, 2  ;;  %p341_p2 = scmp.lt.s32.totalorder %s1052_s29, 3 }
   0x5   : > { %s1216_s30 = smov (%p39_p1, %s37_s30), 0  ;;  %p342_p3 = pnand %p914_p0, %p341_p2 }
   0x6   : > { %p402_p4 = scmp.lt.s32.totalorder (!%p342_p3), %s1044_s27, 1  ;;  %v464_v0 = vlaneseq (!%p342_p3)  ;;  %vm448_vm0 = vcmask (!%p342_p3), 261120   ;;  %v1014_v13 = vld [vmem:[%s1206_s2] sm:$0xff] (!%p342_p3)   ;;  %v1054_v14 = vmov (!%p342_p3), 0.0   ;;  %v1015_v15 = vld [vmem:[%s1206_s2 + $0x8] sm:$0xff] (!%p342_p3)   ;;  %vm1055_vm1 = vmmov (!%p342_p3), 0  }
   0x7   : > { %345 = sbr.rel (%p342_p3) target bundleno = 818 (0x332), region = 52  ;;  %952 = vmatprep.subr.bf16.mxu1 (!%p342_p3), %v1054_v14  ;;  %477 = vst.msk [vmem:[#allocation3] sm:$0xff] (!%p342_p3), %vm448_vm0, %v1054_v14  ;;  %968 = vmatprep.subr.bf16.mxu0 (!%p342_p3), %v1054_v14  ;;  %vm475_vm2 = vcmask (!%p342_p3), 257024   ;;  %v1016_v29 = vld [vmem:[%s1208_s4] sm:$0xff] (!%p342_p3)   ;;  %v1017_v31 = vld [vmem:[%s1208_s4 + $0x8] sm:$0xff] (!%p342_p3)   ;;  %v1020_v34 = vld [vmem:[%s1210_s6 + $0x10] sm:$0xff] (!%p342_p3)  }
   0x8   : > { %v465_v1 = vshrl.u32 (!%p342_p3), %v464_v0, 7  ;;  %953 = vmatpush3.bf16.msra.mxu1 (!%p342_p3), %v1014_v13  ;;  %956 = vmatprep.mubr.msk.bf16.mxu1 (!%p342_p3), %vm1055_vm1, %v1054_v14  ;;  %v1018_v32 = vld [vmem:[%s1210_s6] sm:$0xff] (!%p342_p3)   ;;  %v1019_v33 = vld [vmem:[%s1210_s6 + $0x8] sm:$0xff] (!%p342_p3)   ;;  %v1021_v35 = vld [vmem:[%s1210_s6 + $0x18] sm:$0xff] (!%p342_p3)  }
   0x9   : > { %954 = vmatprep.subr.bf16.mxu1 (!%p342_p3), %v1054_v14  ;;  %984 = vmatprep.mubr.msk.bf16.mxu0 (!%p342_p3), %vm1055_vm1, %v1054_v14  ;;  %v1022_v36 = vld [vmem:[%s1210_s6 + $0x20] sm:$0xff] (!%p342_p3)   ;;  %v1023_v37 = vld [vmem:[%s1210_s6 + $0x28] sm:$0xff] (!%p342_p3)   ;;  %v1024_v38 = vld [vmem:[%s1210_s6 + $0x30] sm:$0xff] (!%p342_p3)  }
   0xa   : > { %v739_v2 = vsub.s32 (!%p342_p3), 5, %v465_v1  ;;  %v466_v20 = vsub.s32 (!%p342_p3), 4, %v465_v1  ;;  %v471_v21 = vsub.s32 (!%p342_p3), 3, %v465_v1  ;;  %969 = vmatpush3.bf16.msra.mxu0 (!%p342_p3), %v1018_v32  ;;  %v1025_v39 = vld [vmem:[%s1210_s6 + $0x38] sm:$0xff] (!%p342_p3)   ;;  %v922_v44 = vld [vmem:[%s1209_s5] ss:$0 sm:$0xff] (!%p342_p3) }
   0xb   : > { %970 = vmatprep.subr.bf16.mxu0 (!%p342_p3), %v1054_v14  ;;  %v918_v52 = vld [vmem:[%s1207_s3] ss:$0 sm:$0xff] (!%p342_p3) }
   0xc   : > { %955 = vmatpush3.bf16.msra.mxu1 (!%p342_p3), %v1015_v15  ;;  %v934_v1 = vld [vmem:[%s1211_s7] ss:$0 sm:$0xff] (!%p342_p3) }
   0xd   : > { %960 = vmatprep.subr.bf16.mxu1 (!%p342_p3), %v1054_v14 }
   0xe   : > { %s1218_s27 = smov (!%p402_p4, %s1044_s27), 1  ;;  %971 = vmatpush3.bf16.msra.mxu0 %v1019_v33  ;;  %v615_v59 = vld [vmem:[#allocation3] sm:$0xff] }
   0xf   : > { %s915_s9 = sshll.u32 %s1218_s27, 2  ;;  %s916_s10 = sshll.u32 %s1218_s27, 3  ;;  %972 = vmatprep.subr.bf16.mxu0 %v1054_v14 }
  0x10   : > { %s408_s13 = scalar_lea.vmem %s1204_s0, %s915_s9  ;;  %s412_s16 = scalar_lea.vmem %s1205_s1, %s916_s10 }
  0x11   : > { %v441_v3 = vld [vmem:[%s412_s16] sm:$0x3f]  ;;  %s439_s15 = scalar_lea.vmem %s1212_s8, %s915_s9 }
  0x12   : > { %v446_v4 = vld [vmem:[%s408_s13] sm:$0xf]  ;;  %v1131_v6 = vrot.slane %v441_v3, %v739_v2  ;;  %v463_v19 = vadd.f32 1.0, %v441_v3  ;;  %v472_v24 = vrot.slane %v441_v3, %v471_v21  ;;  %973 = vmatpush3.bf16.msra.mxu0 %v1020_v34 }
  0x13   : > { %v447_v5 = vunpack.c.l.bf16 %v446_v4  ;;  %974 = vmatprep.subr.bf16.mxu0 %v1054_v14 }
  0x14   : > { %v467_v22 = vrot.slane %v463_v19, %v466_v20 }
  0x15   : > { %v449_v7 = vsel %vm448_vm0, %v447_v5, 0.0 }
  0x16   : > { %450 = vadd.xlane.f32.xlu0 %v449_v7  ;;  %975 = vmatpush3.bf16.msra.mxu0 %v1021_v35 }
  0x17   : > { %976 = vmatprep.subr.bf16.mxu0 %v1054_v14 }
  0x1a   : > { %977 = vmatpush3.bf16.msra.mxu0 %v1022_v36 }
  0x1b   : > { %978 = vmatprep.subr.bf16.mxu0 %v1054_v14 }
  0x1e   : > { %979 = vmatpush3.bf16.msra.mxu0 %v1023_v37 }
  0x1f   : > { %980 = vmatprep.subr.bf16.mxu0 %v1054_v14 }
  0x22   : > { %981 = vmatpush3.bf16.msra.mxu0 %v1024_v38 }
  0x23   : > { %982 = vmatprep.subr.bf16.mxu0 %v1054_v14 }
  0x26   : > { %983 = vmatpush3.bf16.msra.mxu0 %v1025_v39 }
  0xa3   : > { %v451_v8 = vpop.xlane.xlu0 %450 }
  0xa4   : > { %v453_v9 = vmul.f32 0.03125, %v451_v8 }
  0xa6   : > { %v454_v10 = vsub.f32 %v447_v5, %v453_v9 }
  0xa8   : > { %v455_v11 = vmul.f32 %v454_v10, %v454_v10 }
  0xaa   : > { %v456_v12 = vsel %vm448_vm0, %v455_v11, 0.0 }
  0xab   : > { %457 = vadd.xlane.f32.xlu0 %v456_v12 }
 0x138   : > { %v458_v16 = vpop.xlane.xlu0 %457 }
 0x139   : > { %v459_v17 = vmul.f32 0.03125, %v458_v16 }
 0x13b   : > { %v460_v18 = vadd.f32 1e-06, %v459_v17 }
 0x13d   : > { %1026 = vrsqrt.f32 %v460_v18 }
 0x147   : > { %v1027_v23 = vpop.eup %1026 }
 0x148   : > { %v462_v25 = vmul.f32 %v1027_v23, %v454_v10 }
 0x14a   : > { %v468_v26 = vmul.f32 %v467_v22, %v462_v25 }
 0x14c   : > { %v473_v27 = vadd.f32 %v472_v24, %v468_v26 }
 0x14e   : > { %v474_v28 = vpack.c.bf16 %v473_v27, %v473_v27 }
 0x150   : > { %476 = vst.msk [vmem:[#allocation2] sm:$0xf] %vm475_vm2, %v474_v28 }
 0x157   : > { %v478_v30 = vld [vmem:[#allocation2] sm:$0xf] }
 0x158   : > { %957 = vmatmul.mubr.msk.bf16.vlgmr.msra.gmra.mrb[0].mxu1 %vm448_vm0, %v478_v30  ;;  %v735_v3 = vld [vmem:[#allocation2] sm:$0xf] }
 0x159   : > { %961 = vmatpush3.bf16.msra.mxu1 %v1016_v29  ;;  %964 = vmatprep.mubr.msk.bf16.mxu1 %vm1055_vm1, %v1054_v14  ;;  %v736_v5 = vunpack.c.l.bf16 %v735_v3 }
 0x15a   : > { %962 = vmatprep.subr.bf16.mxu1 %v1054_v14 }
 0x15d   : > { %963 = vmatpush3.bf16.msra.mxu1 %v1017_v31 }
 0x160   : > { %965 = vmatmul.mubr.msk.bf16.vlgmr.msra.gmra.mrb[4].mxu1 %vm448_vm0, %v478_v30 }
 0x22b   : > { %v540_v40 = vpop.f32.mrb[0].mxu1 }
 0x22c   : > { %v958_v41 = vpop.f32.mrb[1].mxu1  ;;  %v541_v55 = vadd.f32 %v918_v52, %v540_v40 }
 0x22d   : > { %v543_v42 = vpop.f32.mrb[2].mxu1 }
 0x22e   : > { %v959_v43 = vpop.f32.mrb[3].mxu1 }
 0x233   : > { %v603_v45 = vpop.f32.mrb[4].mxu1 }
 0x234   : > { %v604_v46 = vadd.f32 %v922_v44, %v603_v45  ;;  %v966_v47 = vpop.f32.mrb[5].mxu1 }
 0x235   : > { %v606_v48 = vpop.f32.mrb[6].mxu1 }
 0x236   : > { %v610_v49 = vmul.f32 0.70710677, %v604_v46  ;;  %v967_v50 = vpop.f32.mrb[7].mxu1  ;;  %v609_v53 = vmul.f32 0.5, %v604_v46 }
 0x238   : > { %1028 = verf.f32 %v610_v49 }
 0x242   : > { %v1029_v51 = vpop.eup %1028 }
 0x243   : > { %v612_v54 = vadd.f32 1.0, %v1029_v51 }
 0x245   : > { %v613_v56 = vmul.f32 %v612_v54, %v609_v53 }
 0x247   : > { %v614_v57 = vmul.f32 %v613_v56, %v541_v55 }
 0x249   : > { %v616_v58 = vpack.c.bf16 %v614_v57, %v614_v57 }
 0x24b   : > { %985 = vmatmul.mubr.bf16.vlgmr.msra.gmra.mrb[0].mxu0 %v616_v58 }
 0x31e   : > { %v715_v60 = vpop.f32.mrb[0].mxu0 }
 0x31f   : > { %v721_v61 = vadd.f32 %v715_v60, %v615_v59  ;;  %v986_v62 = vpop.f32.mrb[1].mxu0 }
 0x320   : > { %v718_v63 = vpop.f32.mrb[2].mxu0 }
 0x321   : > { %722 = vst.msk [vmem:[#allocation3] sm:$0xff] %vm448_vm0, %v721_v61  ;;  %v987_v0 = vpop.f32.mrb[3].mxu0 }
 0x328   : > { %v726_v2 = vld [vmem:[#allocation3] sm:$0xff] }
 0x329   : > { %v734_v4 = vadd.f32 %v934_v1, %v726_v2 }
 0x32b   : > { %v741_v7 = vmul.f32 %v1131_v6, %v734_v4 }
 0x32d   : > { %v742_v8 = vadd.f32 %v741_v7, %v736_v5 }
 0x32f   : > { %v743_v9 = vpack.c.bf16 %v742_v8, %v742_v8 }
 0x331   : > { %745 = vst.msk [vmem:[%s439_s15] sm:$0xf] %vm475_vm2, %v743_v9 }
 0x332 PF: > { %s18_s29 = sadd.s32 1, %s1052_s29   ;;  %s1213_s27 = smov %s1048_s28 }
 0x333   : > { %p15_p5 = scmp.ge.s32.totalorder %s18_s29, 4   ;;  %s1214_s28 = smov %s1216_s30 }
 0x335   :  { %17 = sbr.rel (!%p15_p5) target bundleno = 2 (0x2), region = 108 }

// kernel: dit_forward.10
= control target key start
LH: loop header
LB: loop body
LE: loop exit
PB: predicated region body
PF: predicated region fallthrough
CT: control target
= control target key end

     0   :  { %s1961_s27 = smov 0   ;;  %s1963_s28 = smov 0   ;;  %s2212_s0 = inlined_call_operand.vmem [shape: bf16[2,8,32], index: 0, kind: input, shape index: {}]   ;;  %s2213_s1 = inlined_call_operand.vmem [shape: bf16[2,8,32], index: 1, kind: input, shape index: {}]   ;;  %s2214_s2 = inlined_call_operand.vmem [shape: bf16[32,32], index: 2, kind: input, shape index: {}]   ;;  %s2215_s3 = inlined_call_operand.vmem [shape: f32[1,32], index: 3, kind: input, shape index: {}]   ;;  %s2216_s4 = inlined_call_operand.vmem [shape: bf16[32,64], index: 4, kind: input, shape index: {}]   ;;  %s2217_s5 = inlined_call_operand.vmem [shape: f32[1,64], index: 5, kind: input, shape index: {}]   ;;  %s2218_s6 = inlined_call_operand.vmem [shape: bf16[32,32], index: 6, kind: input, shape index: {}]   ;;  %s2219_s7 = inlined_call_operand.vmem [shape: f32[1,32], index: 7, kind: input, shape index: {}]   ;;  %s2220_s8 = inlined_call_operand.vmem [shape: bf16[2,8,32], index: 8, kind: output, shape index: {}]  }
   0x1   :  { %s1965_s29 = smov 0  }
   0x2 LB: > { %s30_s30 = sadd.s32 1, %s1899_s28  ;;  %p1693_p0 = scmp.ge.s32.totalorder %s1903_s29, 1  ;;  %s1903_s29 = sphi %s1965_s29, %s18_s29   ;;  %s1899_s28 = sphi %s1963_s28, %s2222_s28   ;;  %s1895_s27 = sphi %s1961_s27, %s2221_s27  }
   0x3   : > { %p32_p1 = scmp.ge.s32.totalorder %s30_s30, 2  ;;  %p289_p2 = scmp.lt.s32.totalorder %s1903_s29, 3 }
   0x5   : > { %s2224_s30 = smov (%p32_p1, %s30_s30), 0  ;;  %p290_p3 = pnand %p1693_p0, %p289_p2 }
   0x6   : > { %v1859_v0 = vld [vmem:[%s2216_s4] sm:$0xff] (!%p290_p3)   ;;  %v1905_v1 = vmov (!%p290_p3), 0.0   ;;  %v1861_v3 = vld [vmem:[%s2216_s4 + $0x8] sm:$0xff] (!%p290_p3)   ;;  %vm1906_vm0 = vmmov (!%p290_p3), 0   ;;  %p331_p4 = scmp.lt.s32.totalorder (!%p290_p3), %s1895_s27, 1  ;;  %vm378_vm1 = vcmask (!%p290_p3), 261120   ;;  %v437_v22 = vlaneseq (!%p290_p3) }
   0x7   : > { %293 = sbr.rel (%p290_p3) target bundleno = 1498 (0x5da), region = 52  ;;  %1752 = vmatprep.subr.bf16.mxu0 (!%p290_p3), %v1905_v1  ;;  %1760 = vmatprep.subr.bf16.mxu1 (!%p290_p3), %v1905_v1  ;;  %v1860_v2 = vld [vmem:[%s2214_s2] sm:$0xff] (!%p290_p3)   ;;  %v1862_v4 = vld [vmem:[%s2214_s2 + $0x8] sm:$0xff] (!%p290_p3)   ;;  %s1907_s9 = smov (!%p290_p3), 104   ;;  %v1910_v20 = vmov (!%p290_p3), 1983009808  }
   0x8   : > { %1753 = vmatpush3.bf16.msra.mxu0 (!%p290_p3), %v1859_v0  ;;  %1756 = vmatprep.mubr.msk.bf16.mxu0 (!%p290_p3), %vm1906_vm0, %v1905_v1  ;;  %v1697_v7 = vld [vmem:[%s2217_s5] ss:$0 sm:$0xff] (!%p290_p3)  ;;  %s1908_s10 = smov (!%p290_p3), 120   ;;  %s1909_s11 = smov (!%p290_p3), 112   ;;  %v435_v21 = vunpack.c.l.s4 (!%p290_p3), %v1910_v20  ;;  %v1911_v23 = vmov (!%p290_p3), 1934713408  }
   0x9   : > { %1761 = vmatpush3.bf16.msra.mxu1 (!%p290_p3), %v1860_v2  ;;  %1754 = vmatprep.subr.bf16.mxu0 (!%p290_p3), %v1905_v1  ;;  %v1705_v8 = vld [vmem:[%s2215_s3] ss:$0 sm:$0xff] (!%p290_p3)  ;;  %v467_v24 = vunpack.c.l.s4 (!%p290_p3), %v1911_v23  ;;  %v438_v26 = vshrl.u32 (!%p290_p3), %v437_v22, 7  ;;  %vm572_vm2 = vcmask (!%p290_p3), 60416   ;;  %vm960_vm3 = vcmask (!%p290_p3), 64512   ;;  %s1912_s12 = smov (!%p290_p3), 96  }
   0xa   : > { %1762 = vmatprep.subr.bf16.mxu1 (!%p290_p3), %v1905_v1  ;;  %1764 = vmatprep.mubr.msk.bf16.mxu1 (!%p290_p3), %vm1906_vm0, %v1905_v1  ;;  %v436_v25 = vunpack.c.0.s8 (!%p290_p3), %v435_v21  ;;  %vm1196_vm4 = vcmask (!%p290_p3), 1043456   ;;  %s1913_s18 = smov (!%p290_p3), 16   ;;  %s1914_s19 = smov (!%p290_p3), 8   ;;  %vm1527_vm5 = vcmask (!%p290_p3), 130048   ;;  %vm1529_vm6 = vcmask (!%p290_p3), 195584  }
   0xb   : > { %v468_v29 = vunpack.c.0.s8 (!%p290_p3), %v467_v24  ;;  %vm1601_vm7 = vcmask (!%p290_p3), 257024  }
   0xc   : > { %1755 = vmatpush3.bf16.msra.mxu0 (!%p290_p3), %v1861_v3  ;;  %v2035_v30 = vsub.s32 (!%p290_p3), %v436_v25, %v438_v26 }
   0xd   : > { %1763 = vmatpush3.bf16.msra.mxu1 (!%p290_p3), %v1862_v4  ;;  %1768 = vmatprep.subr.bf16.mxu0 (!%p290_p3), %v1905_v1  ;;  %v2047_v37 = vsub.s32 (!%p290_p3), %v468_v29, %v438_v26 }
   0xe   : > { %s2226_s27 = smov (!%p331_p4, %s1895_s27), 1  ;;  %1774 = vmatprep.subr.bf16.mxu1 %v1905_v1 }
   0xf   : > { %s1999_s17 = sshll.u32 %s2226_s27, 2 }
  0x10   : > { %s341_s20 = scalar_lea.vmem %s2213_s1, %s1999_s17  ;;  %s337_s23 = scalar_lea.vmem %s2212_s0, %s1999_s17 }
  0x11   : > { %v354_v5 = vld [vmem:[%s341_s20] sm:$0xf]  ;;  %s1915_s20 = smov 24   ;;  %s348_s25 = scalar_lea.vmem %s2220_s8, %s1999_s17 }
  0x12   : > { %1757 = vmatmul.mubr.msk.bf16.vlgmr.msra.gmra.mrb[0].mxu0 %vm378_vm1, %v354_v5  ;;  %v2012_v6 = vld [vmem:[%s337_s23] sm:$0xf] }
  0x13   : > { %1765 = vmatmul.mubr.msk.bf16.vlgmr.msra.gmra.mrb[0].mxu1 %vm378_vm1, %v2012_v6  ;;  %1770 = vmatprep.mubr.msk.bf16.mxu0 %vm1906_vm0, %v1905_v1 }
  0x14   : > { %1776 = vmatprep.mubr.msk.bf16.mxu1 %vm1906_vm0, %v1905_v1 }
  0xe5   : > { %v416_v9 = vpop.f32.mrb[0].mxu0 }
  0xe6   : > { %v2026_v10 = vadd.f32 %v1697_v7, %v416_v9  ;;  %v1758_v11 = vpop.f32.mrb[1].mxu0  ;;  %v795_v12 = vpop.f32.mrb[0].mxu1 }
  0xe7   : > { %v419_v13 = vpop.f32.mrb[2].mxu0  ;;  %v796_v14 = vadd.f32 %v1705_v8, %v795_v12  ;;  %v1766_v15 = vpop.f32.mrb[1].mxu1 }
  0xe8   : > { %429 = vrot.lane.b32.xlu1 %v2026_v10, %s1907_s9  ;;  %423 = vrot.lane.b32.xlu0 %v2026_v10, %s1908_s10  ;;  %v1759_v16 = vpop.f32.mrb[3].mxu0  ;;  %v798_v17 = vpop.f32.mrb[2].mxu1 }
  0xe9   : > { %v801_v18 = vmul.f32 0.35355338, %v796_v14  ;;  %v1767_v19 = vpop.f32.mrb[3].mxu1 }
  0xec   : > { %426 = vrot.lane.b32.xlu0 %v2026_v10, %s1909_s11  ;;  %803 = vrot.lane.b32.xlu1 %v801_v18, %s1908_s10 }
  0xf0   : > { %806 = vrot.lane.b32.xlu0 %v801_v18, %s1909_s11  ;;  %809 = vrot.lane.b32.xlu1 %v801_v18, %s1907_s9 }
 0x15a   : > { %v2031_v27 = vpop.permute.xlu1 %429  ;;  %v2033_v28 = vpop.permute.xlu0 %423 }
 0x15b   : > { %v448_v31 = vcombine.low %v2033_v28, %v2031_v27  ;;  %v449_v32 = vcombine.high %v2033_v28, %v2031_v27 }
 0x15d   : > { %v456_v38 = vrot.slane %v448_v31, %v2035_v30  ;;  %v463_v39 = vrot.slane %v449_v32, %v2035_v30 }
 0x15e   : > { %v2041_v33 = vpop.permute.xlu0 %426  ;;  %v804_v34 = vpop.permute.xlu1 %803 }
 0x15f   : > { %v432_v35 = vcombine.low %v2026_v10, %v2041_v33  ;;  %v433_v36 = vcombine.high %v2026_v10, %v2041_v33 }
 0x161   : > { %v440_v40 = vrot.slane %v432_v35, %v2035_v30  ;;  %v447_v41 = vrot.slane %v433_v36, %v2035_v30 }
 0x162   : > { %v807_v42 = vpop.permute.xlu0 %806  ;;  %v810_v43 = vpop.permute.xlu1 %809 }
 0x163   : > { %v464_v44 = vcombine.low %v440_v40, %v456_v38  ;;  %v465_v45 = vcombine.high %v440_v40, %v456_v38  ;;  %v480_v46 = vcombine.low %v447_v41, %v463_v39  ;;  %v481_v47 = vcombine.high %v447_v41, %v463_v39 }
 0x164   : > { %v812_v48 = vcombine.low %v801_v18, %v807_v42  ;;  %v813_v49 = vcombine.high %v801_v18, %v807_v42  ;;  %v828_v50 = vcombine.low %v804_v34, %v810_v43  ;;  %v829_v51 = vcombine.high %v804_v34, %v810_v43 }
 0x165   : > { %v472_v52 = vrot.slane %v464_v44, %v2047_v37  ;;  %v479_v53 = vrot.slane %v465_v45, %v2047_v37  ;;  %v488_v54 = vrot.slane %v480_v46, %v2047_v37  ;;  %v495_v55 = vrot.slane %v481_v47, %v2047_v37 }
 0x166   : > { %v820_v56 = vrot.slane %v812_v48, %v2035_v30  ;;  %v827_v57 = vrot.slane %v813_v49, %v2035_v30  ;;  %v836_v58 = vrot.slane %v828_v50, %v2035_v30  ;;  %v843_v59 = vrot.slane %v829_v51, %v2035_v30 }
 0x167   : > { %v500_v60 = vcombine.low %v472_v52, %v479_v53  ;;  %v1701_v61 = vcombine.high %v472_v52, %v479_v53  ;;  %v516_v62 = vcombine.low %v488_v54, %v495_v55  ;;  %v1702_v63 = vcombine.high %v488_v54, %v495_v55 }
 0x168   : > { %v844_v0 = vcombine.low %v820_v56, %v836_v58  ;;  %v845_v2 = vcombine.high %v820_v56, %v836_v58  ;;  %v860_v3 = vcombine.low %v827_v57, %v843_v59  ;;  %v861_v4 = vcombine.high %v827_v57, %v843_v59 }
 0x169   : > { %v507_v5 = vrot.slane %v500_v60, %v2035_v30  ;;  %v515_v7 = vrot.slane %v1701_v61, %v2035_v30  ;;  %v523_v8 = vrot.slane %v516_v62, %v2035_v30  ;;  %v531_v9 = vrot.slane %v1702_v63, %v2035_v30 }
 0x16a   : > { %v852_v11 = vrot.slane %v844_v0, %v2047_v37  ;;  %v859_v12 = vrot.slane %v845_v2, %v2047_v37  ;;  %v868_v13 = vrot.slane %v860_v3, %v2047_v37  ;;  %v875_v14 = vrot.slane %v861_v4, %v2047_v37 }
 0x16b   : > { %v532_v15 = vcombine.low %v507_v5, %v515_v7  ;;  %v533_v16 = vcombine.high %v507_v5, %v515_v7  ;;  %v548_v17 = vcombine.low %v523_v8, %v531_v9  ;;  %v549_v18 = vcombine.high %v523_v8, %v531_v9 }
 0x16c   : > { %v880_v19 = vcombine.low %v852_v11, %v859_v12  ;;  %v1709_v20 = vcombine.high %v852_v11, %v859_v12  ;;  %v896_v21 = vcombine.low %v868_v13, %v875_v14  ;;  %v1710_v22 = vcombine.high %v868_v13, %v875_v14 }
 0x16d   : > { %v540_v23 = vrot.slane %v532_v15, %v2047_v37  ;;  %v547_v24 = vrot.slane %v533_v16, %v2047_v37  ;;  %v556_v25 = vrot.slane %v548_v17, %v2047_v37  ;;  %v563_v26 = vrot.slane %v549_v18, %v2047_v37 }
 0x16e   : > { %v887_v35 = vrot.slane %v880_v19, %v2035_v30  ;;  %v895_v36 = vrot.slane %v1709_v20, %v2035_v30  ;;  %v903_v38 = vrot.slane %v896_v21, %v2035_v30  ;;  %v911_v39 = vrot.slane %v1710_v22, %v2035_v30 }
 0x16f   : > { %v564_v29 = vcombine.low %v540_v23, %v556_v25  ;;  %v565_v31 = vcombine.high %v540_v23, %v556_v25  ;;  %v566_v32 = vcombine.low %v547_v24, %v563_v26  ;;  %v567_v34 = vcombine.high %v547_v24, %v563_v26 }
 0x170   : > { %v912_v44 = vcombine.low %v887_v35, %v895_v36  ;;  %v928_v45 = vcombine.low %v903_v38, %v911_v39  ;;  %v913_v52 = vcombine.high %v887_v35, %v895_v36  ;;  %v929_v53 = vcombine.high %v903_v38, %v911_v39 }
 0x171   : > { %v568_v40 = vpack.c.bf16 %v564_v29, %v564_v29  ;;  %v569_v41 = vpack.c.bf16 %v565_v31, %v565_v31  ;;  %v570_v42 = vpack.c.bf16 %v566_v32, %v566_v32  ;;  %v571_v43 = vpack.c.bf16 %v567_v34, %v567_v34 }
 0x172   : > { %v920_v46 = vrot.slane %v912_v44, %v2047_v37  ;;  %v936_v47 = vrot.slane %v928_v45, %v2047_v37  ;;  %v927_v60 = vrot.slane %v913_v52, %v2047_v37  ;;  %v943_v61 = vrot.slane %v929_v53, %v2047_v37 }
 0x173   : > { %573 = vst.msk [vmem:[#allocation2] sm:$0xf] %vm572_vm2, %v568_v40  ;;  %574 = vst.msk [vmem:[#allocation2 + $0x4] sm:$0xf] %vm572_vm2, %v569_v41 }
 0x174   : > { %575 = vst.msk [vmem:[#allocation2 + $0x8] sm:$0xf] %vm572_vm2, %v570_v42  ;;  %576 = vst.msk [vmem:[#allocation2 + $0xc] sm:$0xf] %vm572_vm2, %v571_v43  ;;  %v944_v54 = vcombine.low %v920_v46, %v936_v47  ;;  %v945_v55 = vcombine.high %v920_v46, %v936_v47  ;;  %v946_v0 = vcombine.low %v927_v60, %v943_v61 }
 0x175   : > { %v947_v2 = vcombine.high %v927_v60, %v943_v61 }
 0x176   : > { %v948_v58 = vpack.c.bf16 %v944_v54, %v944_v54  ;;  %v949_v59 = vpack.c.bf16 %v945_v55, %v945_v55  ;;  %v950_v3 = vpack.c.bf16 %v946_v0, %v946_v0 }
 0x177   : > { %v951_v4 = vpack.c.bf16 %v947_v2, %v947_v2 }
 0x17a   : > { %v952_v48 = vld [vmem:[#allocation2] sm:$0xf]  ;;  %v953_v49 = vld [vmem:[#allocation2 + $0x4] sm:$0xf] }
 0x17b   : > { %v965_v50 = vsel %vm960_vm3, %v952_v48, 0  ;;  %v1011_v51 = vsel %vm960_vm3, %v953_v49, 0  ;;  %v954_v56 = vld [vmem:[#allocation2 + $0x8] sm:$0xf]  ;;  %v955_v57 = vld [vmem:[#allocation2 + $0xc] sm:$0xf] }
 0x17c   : > { %1769 = vmatpush3.bf16.xpose.msra.mxu0 %v965_v50  ;;  %1775 = vmatpush3.bf16.xpose.msra.mxu1 %v1011_v51  ;;  %v1057_v62 = vsel %vm960_vm3, %v954_v56, 0  ;;  %v1103_v63 = vsel %vm960_vm3, %v955_v57, 0 }
 0x17d   : > { %1780 = vmatprep.subr.bf16.mxu0 %v1905_v1  ;;  %1786 = vmatprep.subr.bf16.mxu1 %v1905_v1 }
 0x183   : > { %1771 = vmatmul.mubr.msk.bf16.vlgmr.msra.gmra.mrb[4].mxu0 %vm960_vm3, %v948_v58  ;;  %1777 = vmatmul.mubr.msk.bf16.vlgmr.msra.gmra.mrb[4].mxu1 %vm960_vm3, %v949_v59 }
 0x184   : > { %1781 = vmatpush3.bf16.xpose.msra.mxu0 %v1057_v62  ;;  %1787 = vmatpush3.bf16.xpose.msra.mxu1 %v1103_v63 }
 0x185   : > { %1782 = vmatprep.mubr.msk.bf16.mxu0 %vm1906_vm0, %v1905_v1  ;;  %1788 = vmatprep.mubr.msk.bf16.mxu1 %vm1906_vm0, %v1905_v1 }
 0x186   : > { %1792 = vmatprep.subr.bf16.mxu0 %v1905_v1  ;;  %1798 = vmatprep.subr.bf16.mxu1 %v1905_v1 }
 0x18b   : > { %1783 = vmatmul.mubr.msk.bf16.vlgmr.msra.gmra.mrb[8].mxu0 %vm960_vm3, %v950_v3  ;;  %1789 = vmatmul.mubr.msk.bf16.vlgmr.msra.gmra.mrb[8].mxu1 %vm960_vm3, %v951_v4 }
 0x18c   : > { %1794 = vmatprep.mubr.msk.bf16.mxu0 %vm1906_vm0, %v1905_v1  ;;  %1800 = vmatprep.mubr.msk.bf16.mxu1 %vm1906_vm0, %v1905_v1 }
 0x256   : > { %v1001_v5 = vpop.f32.mrb[4].mxu0  ;;  %v1047_v7 = vpop.f32.mrb[4].mxu1 }
 0x257   : > { %v1772_v8 = vpop.f32.mrb[5].mxu0  ;;  %v1778_v9 = vpop.f32.mrb[5].mxu1  ;;  %v1145_v11 = vsel %vm960_vm3, %v1001_v5, -inf  ;;  %v1148_v12 = vsel %vm960_vm3, %v1047_v7, -inf }
 0x258   : > { %1146 = vmax.xlane.f32.xlu0 %v1145_v11  ;;  %v1004_v13 = vpop.f32.mrb[6].mxu0  ;;  %1149 = vmax.xlane.f32.xlu1 %v1148_v12  ;;  %v1050_v14 = vpop.f32.mrb[6].mxu1 }
 0x259   : > { %v1773_v15 = vpop.f32.mrb[7].mxu0  ;;  %v1779_v16 = vpop.f32.mrb[7].mxu1 }
 0x25e   : > { %v1093_v17 = vpop.f32.mrb[8].mxu0  ;;  %v1139_v18 = vpop.f32.mrb[8].mxu1 }
 0x25f   : > { %v1784_v19 = vpop.f32.mrb[9].mxu0  ;;  %v1790_v20 = vpop.f32.mrb[9].mxu1  ;;  %v1151_v21 = vsel %vm960_vm3, %v1093_v17, -inf  ;;  %v1154_v26 = vsel %vm960_vm3, %v1139_v18, -inf }
 0x260   : > { %1152 = vmax.xlane.f32.xlu0 %v1151_v21  ;;  %v1096_v22 = vpop.f32.mrb[10].mxu0  ;;  %v1142_v23 = vpop.f32.mrb[10].mxu1 }
 0x261   : > { %v1785_v24 = vpop.f32.mrb[11].mxu0  ;;  %v1791_v25 = vpop.f32.mrb[11].mxu1 }
 0x264   : > { %1155 = vmax.xlane.f32.xlu0 %v1154_v26 }
 0x269   : > { %577 = vrot.lane.b32.xlu1 %v2026_v10, %s1912_s12 }
 0x26d   : > { %581 = vrot.lane.b32.xlu1 %v2041_v33, %s1912_s12 }
 0x271   : > { %583 = vrot.lane.b32.xlu1 %v2031_v27, %s1912_s12 }
 0x27a   : > { %579 = vrot.lane.b32.xlu0 %v2033_v28, %s1912_s12 }
 0x2e5   : > { %v1147_v29 = vpop.xlane.xlu0 %1146  ;;  %v1150_v31 = vpop.xlane.xlu1 %1149 }
 0x2e6   : > { %v1157_v32 = vsub.f32 %v1001_v5, %v1147_v29  ;;  %v1158_v34 = vsub.f32 %v1047_v7, %v1150_v31 }
 0x2e8   : > { %v1161_v35 = vmul.f32 1.442695, %v1157_v32  ;;  %v1163_v36 = vmul.f32 1.442695, %v1158_v34 }
 0x2e9   : > { %v578_v38 = vpop.permute.xlu1 %577 }
 0x2ea   : > { %1865 = vpow2.f32 %v1161_v35 }
 0x2eb   : > { %1867 = vpow2.f32 %v1163_v36 }
 0x2ed   : > { %v1153_v39 = vpop.xlane.xlu0 %1152  ;;  %v582_v41 = vpop.permute.xlu1 %581 }
 0x2ee   : > { %v1159_v40 = vsub.f32 %v1093_v17, %v1153_v39  ;;  %v589_v27 = vcombine.low %v578_v38, %v582_v41  ;;  %v590_v28 = vcombine.high %v578_v38, %v582_v41 }
 0x2f0   : > { %v1165_v42 = vmul.f32 1.442695, %v1159_v40  ;;  %v597_v52 = vrot.slane %v589_v27, %v2035_v30  ;;  %v604_v53 = vrot.slane %v590_v28, %v2035_v30 }
 0x2f1   : > { %v1156_v10 = vpop.xlane.xlu0 %1155  ;;  %v584_v46 = vpop.permute.xlu1 %583 }
 0x2f2   : > { %1869 = vpow2.f32 %v1165_v42  ;;  %v1160_v33 = vsub.f32 %v1139_v18, %v1156_v10 }
 0x2f4   : > { %v2113_v43 = vpop.eup %1865  ;;  %v1167_v44 = vmul.f32 1.442695, %v1160_v33 }
 0x2f5   : > { %v2115_v45 = vpop.eup %1867  ;;  %v580_v47 = vpop.permute.xlu0 %579  ;;  %v1169_v48 = vsel %vm960_vm3, %v2113_v43, 0.0 }
 0x2f6   : > { %1871 = vpow2.f32 %v1167_v44  ;;  %v605_v49 = vcombine.low %v580_v47, %v584_v46  ;;  %v606_v50 = vcombine.high %v580_v47, %v584_v46  ;;  %v1172_v51 = vsel %vm960_vm3, %v2115_v45, 0.0  ;;  %1170 = vadd.xlane.f32.xlu0 %v1169_v48 }
 0x2f7   : > { %1173 = vadd.xlane.f32.xlu1 %v1172_v51 }
 0x2f8   : > { %v613_v54 = vrot.slane %v605_v49, %v2035_v30  ;;  %v620_v55 = vrot.slane %v606_v50, %v2035_v30 }
 0x2fa   : > { %v621_v56 = vcombine.low %v597_v52, %v613_v54  ;;  %v622_v57 = vcombine.high %v597_v52, %v613_v54  ;;  %v637_v58 = vcombine.low %v604_v53, %v620_v55  ;;  %v638_v59 = vcombine.high %v604_v53, %v620_v55 }
 0x2fc   : > { %v2125_v60 = vpop.eup %1869  ;;  %v629_v61 = vrot.slane %v621_v56, %v2047_v37  ;;  %v636_v62 = vrot.slane %v622_v57, %v2047_v37  ;;  %v645_v63 = vrot.slane %v637_v58, %v2047_v37  ;;  %v652_v0 = vrot.slane %v638_v59, %v2047_v37 }
 0x2fd   : > { %v1175_v2 = vsel %vm960_vm3, %v2125_v60, 0.0 }
 0x2fe   : > { %v657_v3 = vcombine.low %v629_v61, %v636_v62  ;;  %v1703_v4 = vcombine.high %v629_v61, %v636_v62  ;;  %v673_v5 = vcombine.low %v645_v63, %v652_v0  ;;  %v1704_v7 = vcombine.high %v645_v63, %v652_v0  ;;  %1176 = vadd.xlane.f32.xlu0 %v1175_v2 }
 0x300   : > { %v2133_v8 = vpop.eup %1871  ;;  %v664_v9 = vrot.slane %v657_v3, %v2035_v30  ;;  %v672_v11 = vrot.slane %v1703_v4, %v2035_v30  ;;  %v680_v12 = vrot.slane %v673_v5, %v2035_v30  ;;  %v688_v13 = vrot.slane %v1704_v7, %v2035_v30 }
 0x301   : > { %v1178_v14 = vsel %vm960_vm3, %v2133_v8, 0.0 }
 0x302   : > { %v689_v15 = vcombine.low %v664_v9, %v672_v11  ;;  %v690_v16 = vcombine.high %v664_v9, %v672_v11  ;;  %v705_v17 = vcombine.low %v680_v12, %v688_v13  ;;  %v706_v18 = vcombine.high %v680_v12, %v688_v13  ;;  %1179 = vadd.xlane.f32.xlu0 %v1178_v14 }
 0x304   : > { %v697_v19 = vrot.slane %v689_v15, %v2047_v37  ;;  %v704_v20 = vrot.slane %v690_v16, %v2047_v37  ;;  %v713_v21 = vrot.slane %v705_v17, %v2047_v37  ;;  %v720_v22 = vrot.slane %v706_v18, %v2047_v37 }
 0x306   : > { %v721_v23 = vcombine.low %v697_v19, %v713_v21  ;;  %v722_v24 = vcombine.high %v697_v19, %v713_v21  ;;  %v723_v25 = vcombine.low %v704_v20, %v720_v22  ;;  %v724_v26 = vcombine.high %v704_v20, %v720_v22 }
 0x308   : > { %v725_v29 = vpack.c.bf16 %v721_v23, %v721_v23  ;;  %v726_v31 = vpack.c.bf16 %v722_v24, %v722_v24  ;;  %v727_v32 = vpack.c.bf16 %v723_v25, %v723_v25  ;;  %v728_v34 = vpack.c.bf16 %v724_v26, %v724_v26  ;;  %v1863_v23 = vld [vmem:[%s2218_s6] sm:$0xff]  }
 0x30a   : > { %729 = vst.msk [vmem:[#allocation3] sm:$0xf] %vm572_vm2, %v725_v29  ;;  %730 = vst.msk [vmem:[#allocation3 + $0x4] sm:$0xf] %vm572_vm2, %v726_v31 }
 0x30b   : > { %731 = vst.msk [vmem:[#allocation3 + $0x8] sm:$0xf] %vm572_vm2, %v727_v32  ;;  %732 = vst.msk [vmem:[#allocation3 + $0xc] sm:$0xf] %vm572_vm2, %v728_v34 }
 0x311   : > { %v956_v35 = vld [vmem:[#allocation3] sm:$0xf]  ;;  %v957_v36 = vld [vmem:[#allocation3 + $0x4] sm:$0xf] }
 0x312   : > { %v1198_v38 = vsel %vm1196_vm4, %v956_v35, 0  ;;  %v1244_v39 = vsel %vm1196_vm4, %v957_v36, 0  ;;  %v958_v46 = vld [vmem:[#allocation3 + $0x8] sm:$0xf]  ;;  %v959_v48 = vld [vmem:[#allocation3 + $0xc] sm:$0xf] }
 0x313   : > { %1793 = vmatpush3.bf16.msra.mxu0 %v1198_v38  ;;  %1799 = vmatpush3.bf16.msra.mxu1 %v1244_v39  ;;  %v1290_v50 = vsel %vm1196_vm4, %v958_v46, 0  ;;  %v1336_v51 = vsel %vm1196_vm4, %v959_v48, 0  ;;  %v1864_v36 = vld [vmem:[%s2218_s6 + $0x8] sm:$0xff]  }
 0x314   : > { %1804 = vmatprep.subr.bf16.mxu0 %v1905_v1  ;;  %1810 = vmatprep.subr.bf16.mxu1 %v1905_v1 }
 0x383   : > { %v1171_v40 = vpop.xlane.xlu0 %1170 }
 0x384   : > { %v1174_v41 = vpop.xlane.xlu1 %1173  ;;  %1873 = vrcp.f32 %v1171_v40 }
 0x385   : > { %1875 = vrcp.f32 %v1174_v41 }
 0x38b   : > { %v1177_v42 = vpop.xlane.xlu0 %1176 }
 0x38c   : > { %1877 = vrcp.f32 %v1177_v42 }
 0x38e   : > { %v1874_v10 = vpop.eup %1873 }
 0x38f   : > { %v1876_v33 = vpop.eup %1875  ;;  %v1182_v27 = vmul.f32 %v1874_v10, %v2113_v43  ;;  %v1180_v28 = vpop.xlane.xlu0 %1179 }
 0x390   : > { %v1184_v44 = vmul.f32 %v1876_v33, %v2115_v45  ;;  %1879 = vrcp.f32 %v1180_v28 }
 0x391   : > { %v1189_v47 = vpack.c.bf16 %v1182_v27, %v1182_v27 }
 0x392   : > { %v1190_v49 = vpack.c.bf16 %v1184_v44, %v1184_v44 }
 0x393   : > { %1795 = vmatmul.mubr.msk.bf16.vlgmr.msra.gmra.mrb[12].mxu0 %vm960_vm3, %v1189_v47 }
 0x394   : > { %1801 = vmatmul.mubr.msk.bf16.vlgmr.msra.gmra.mrb[12].mxu1 %vm960_vm3, %v1190_v49  ;;  %1805 = vmatpush3.bf16.msra.mxu0 %v1290_v50 }
 0x395   : > { %1811 = vmatpush3.bf16.msra.mxu1 %v1336_v51  ;;  %1806 = vmatprep.mubr.msk.bf16.mxu0 %vm1906_vm0, %v1905_v1 }
 0x396   : > { %v1878_v43 = vpop.eup %1877  ;;  %1812 = vmatprep.mubr.msk.bf16.mxu1 %vm1906_vm0, %v1905_v1  ;;  %1816 = vmatprep.subr.bf16.mxu0 %v1905_v1 }
 0x397   : > { %v1186_v45 = vmul.f32 %v1878_v43, %v2125_v60 }
 0x399   : > { %v1191_v52 = vpack.c.bf16 %v1186_v45, %v1186_v45 }
 0x39a   : > { %v1880_v53 = vpop.eup %1879 }
 0x39b   : > { %v1188_v54 = vmul.f32 %v1880_v53, %v2133_v8  ;;  %1807 = vmatmul.mubr.msk.bf16.vlgmr.msra.gmra.mrb[16].mxu0 %vm960_vm3, %v1191_v52 }
 0x39c   : > { %1820 = vmatprep.mubr.msk.bf16.mxu0 %vm1906_vm0, %v1905_v1  ;;  %1817 = vmatpush3.bf16.msra.mxu0 %v1863_v23 }
 0x39d   : > { %v1192_v55 = vpack.c.bf16 %v1188_v54, %v1188_v54  ;;  %1818 = vmatprep.subr.bf16.mxu0 %v1905_v1  ;;  %v1721_v54 = vld [vmem:[%s2219_s7] ss:$0 sm:$0xff] }
 0x39f   : > { %1813 = vmatmul.mubr.msk.bf16.vlgmr.msra.gmra.mrb[16].mxu1 %vm960_vm3, %v1192_v55  ;;  %v1598_v55 = vunpack.c.l.bf16 %v2012_v6 }
 0x3a0   : > { %1819 = vmatpush3.bf16.msra.mxu0 %v1864_v36 }
 0x466   : > { %v1234_v56 = vpop.f32.mrb[12].mxu0 }
 0x467   : > { %v1280_v57 = vpop.f32.mrb[12].mxu1  ;;  %v1796_v58 = vpop.f32.mrb[13].mxu0 }
 0x468   : > { %v1802_v59 = vpop.f32.mrb[13].mxu1  ;;  %v1237_v61 = vpop.f32.mrb[14].mxu0 }
 0x469   : > { %v1283_v62 = vpop.f32.mrb[14].mxu1  ;;  %v1797_v63 = vpop.f32.mrb[15].mxu0 }
 0x46a   : > { %v1803_v60 = vpop.f32.mrb[15].mxu1 }
 0x46e   : > { %v1326_v0 = vpop.f32.mrb[16].mxu0 }
 0x46f   : > { %v1378_v2 = vcombine.low %v1234_v56, %v1326_v0  ;;  %v1379_v3 = vcombine.high %v1234_v56, %v1326_v0  ;;  %v1808_v4 = vpop.f32.mrb[17].mxu0 }
 0x470   : > { %v1329_v5 = vpop.f32.mrb[18].mxu0 }
 0x471   : > { %v1809_v7 = vpop.f32.mrb[19].mxu0  ;;  %v1386_v14 = vrot.slane %v1378_v2, %v2035_v30  ;;  %v1393_v15 = vrot.slane %v1379_v3, %v2035_v30 }
 0x472   : > { %v1372_v8 = vpop.f32.mrb[16].mxu1 }
 0x473   : > { %v1394_v9 = vcombine.low %v1280_v57, %v1372_v8  ;;  %v1395_v11 = vcombine.high %v1280_v57, %v1372_v8  ;;  %v1814_v12 = vpop.f32.mrb[17].mxu1 }
 0x474   : > { %v1375_v13 = vpop.f32.mrb[18].mxu1 }
 0x475   : > { %v1402_v16 = vrot.slane %v1394_v9, %v2035_v30  ;;  %v1409_v17 = vrot.slane %v1395_v11, %v2035_v30  ;;  %v1815_v18 = vpop.f32.mrb[19].mxu1 }
 0x477   : > { %v1410_v19 = vcombine.low %v1386_v14, %v1402_v16  ;;  %v1411_v20 = vcombine.high %v1386_v14, %v1402_v16  ;;  %v1426_v21 = vcombine.low %v1393_v15, %v1409_v17  ;;  %v1427_v22 = vcombine.high %v1393_v15, %v1409_v17 }
 0x479   : > { %v1418_v24 = vrot.slane %v1410_v19, %v2047_v37  ;;  %v1425_v25 = vrot.slane %v1411_v20, %v2047_v37  ;;  %v1434_v26 = vrot.slane %v1426_v21, %v2047_v37  ;;  %v1441_v29 = vrot.slane %v1427_v22, %v2047_v37 }
 0x47b   : > { %v1446_v31 = vcombine.low %v1418_v24, %v1425_v25  ;;  %v1719_v32 = vcombine.high %v1418_v24, %v1425_v25  ;;  %v1462_v34 = vcombine.low %v1434_v26, %v1441_v29  ;;  %v1720_v35 = vcombine.high %v1434_v26, %v1441_v29 }
 0x47d   : > { %v1453_v38 = vrot.slane %v1446_v31, %v2035_v30  ;;  %v1461_v39 = vrot.slane %v1719_v32, %v2035_v30  ;;  %v1469_v40 = vrot.slane %v1462_v34, %v2035_v30  ;;  %v1477_v41 = vrot.slane %v1720_v35, %v2035_v30 }
 0x47f   : > { %v1479_v42 = vcombine.high %v1453_v38, %v1461_v39  ;;  %v1495_v10 = vcombine.high %v1469_v40, %v1477_v41  ;;  %v1478_v33 = vcombine.low %v1453_v38, %v1461_v39  ;;  %v1494_v27 = vcombine.low %v1469_v40, %v1477_v41 }
 0x481   : > { %v1493_v28 = vrot.slane %v1479_v42, %v2047_v37  ;;  %v1509_v1 = vrot.slane %v1495_v10, %v2047_v37  ;;  %v1486_v44 = vrot.slane %v1478_v33, %v2047_v37  ;;  %v1502_v46 = vrot.slane %v1494_v27, %v2047_v37 }
 0x483   : > { %v1512_v47 = vcombine.low %v1493_v28, %v1509_v1  ;;  %v1511_v48 = vcombine.high %v1486_v44, %v1502_v46  ;;  %v1513_v49 = vcombine.high %v1493_v28, %v1509_v1  ;;  %v1510_v50 = vcombine.low %v1486_v44, %v1502_v46 }
 0x485   : > { %1519 = vrot.lane.b32.xlu0 %v1512_v47, %s1913_s18  ;;  %1515 = vrot.lane.b32.xlu1 %v1511_v48, %s1914_s19 }
 0x489   : > { %1523 = vrot.lane.b32.xlu1 %v1513_v49, %s1915_s20 }
 0x4f7   : > { %v1516_v30 = vpop.permute.xlu1 %1515  ;;  %v1520_v51 = vpop.permute.xlu0 %1519 }
 0x4f8   : > { %v1526_v43 = vsel %vm960_vm3, %v1510_v50, %v1516_v30 }
 0x4f9   : > { %v1528_v52 = vsel %vm1527_vm5, %v1526_v43, %v1520_v51 }
 0x4fb   : > { %v1524_v45 = vpop.permute.xlu1 %1523 }
 0x4fc   : > { %v1530_v37 = vsel %vm1529_vm6, %v1528_v52, %v1524_v45 }
 0x4fd   : > { %v1531_v53 = vpack.c.bf16 %v1530_v37, %v1530_v37 }
 0x4ff   : > { %1821 = vmatmul.mubr.msk.bf16.vlgmr.msra.gmra.mrb[20].mxu0 %vm378_vm1, %v1531_v53 }
 0x5d2   : > { %v1592_v56 = vpop.f32.mrb[20].mxu0 }
 0x5d3   : > { %v1593_v57 = vadd.f32 %v1721_v54, %v1592_v56  ;;  %v1822_v58 = vpop.f32.mrb[21].mxu0 }
 0x5d4   : > { %v1595_v59 = vpop.f32.mrb[22].mxu0 }
 0x5d5   : > { %v1599_v61 = vadd.f32 %v1598_v55, %v1593_v57  ;;  %v1823_v62 = vpop.f32.mrb[23].mxu0 }
 0x5d7   : > { %v1600_v63 = vpack.c.bf16 %v1599_v61, %v1599_v61 }
 0x5d9   : > { %1602 = vst.msk [vmem:[%s348_s25] sm:$0xf] %vm1601_vm7, %v1600_v63 }
 0x5da PF: > { %s18_s29 = sadd.s32 1, %s1903_s29   ;;  %s2221_s27 = smov %s1899_s28 }
 0x5db   : > { %p15_p5 = scmp.ge.s32.totalorder %s18_s29, 4   ;;  %s2222_s28 = smov %s2224_s30 }
 0x5dd   :  { %17 = sbr.rel (!%p15_p5) target bundleno = 2 (0x2), region = 89 }

// kernel: dit_forward.9
= control target key start
LH: loop header
LB: loop body
LE: loop exit
PB: predicated region body
PF: predicated region fallthrough
CT: control target
= control target key end

     0   :  { %s1991_s27 = smov 0   ;;  %s1993_s28 = smov 0   ;;  %s2261_s0 = inlined_call_operand.vmem [shape: bf16[2,8,32], index: 0, kind: input, shape index: {}]   ;;  %s2262_s1 = inlined_call_operand.vmem [shape: f32[2,6,32], index: 1, kind: input, shape index: {}]   ;;  %s2263_s2 = inlined_call_operand.vmem [shape: bf16[32,32], index: 2, kind: input, shape index: {}]   ;;  %s2264_s3 = inlined_call_operand.vmem [shape: f32[1,32], index: 3, kind: input, shape index: {}]   ;;  %s2265_s4 = inlined_call_operand.vmem [shape: bf16[32,64], index: 4, kind: input, shape index: {}]   ;;  %s2266_s5 = inlined_call_operand.vmem [shape: f32[1,64], index: 5, kind: input, shape index: {}]   ;;  %s2267_s6 = inlined_call_operand.vmem [shape: bf16[32,32], index: 6, kind: input, shape index: {}]   ;;  %s2268_s7 = inlined_call_operand.vmem [shape: f32[1,32], index: 7, kind: input, shape index: {}]   ;;  %s2269_s8 = inlined_call_operand.vmem [shape: bf16[2,8,32], index: 8, kind: output, shape index: {}]  }
   0x1   :  { %s1995_s29 = smov 0  }
   0x2 LB: > { %s30_s30 = sadd.s32 1, %s1929_s28  ;;  %p1721_p0 = scmp.ge.s32.totalorder %s1933_s29, 1  ;;  %s1933_s29 = sphi %s1995_s29, %s18_s29   ;;  %s1929_s28 = sphi %s1993_s28, %s2271_s28   ;;  %s1925_s27 = sphi %s1991_s27, %s2270_s27  }
   0x3   : > { %p32_p1 = scmp.ge.s32.totalorder %s30_s30, 2  ;;  %p284_p2 = scmp.lt.s32.totalorder %s1933_s29, 3 }
   0x5   : > { %s2273_s30 = smov (%p32_p1, %s30_s30), 0  ;;  %p285_p3 = pnand %p1721_p0, %p284_p2 }
   0x6   : > { %p323_p4 = scmp.lt.s32.totalorder (!%p285_p3), %s1925_s27, 1  ;;  %vm346_vm0 = vcmask (!%p285_p3), 261120   ;;  %v1887_v8 = vld [vmem:[%s2265_s4] sm:$0xff] (!%p285_p3)   ;;  %v1935_v9 = vmov (!%p285_p3), 0.0   ;;  %vm1936_vm1 = vmmov (!%p285_p3), 0   ;;  %v1888_v10 = vld [vmem:[%s2265_s4 + $0x8] sm:$0xff] (!%p285_p3)   ;;  %v362_v15 = vlaneseq (!%p285_p3) }
   0x7   : > { %288 = sbr.rel (%p285_p3) target bundleno = 1817 (0x719), region = 52  ;;  %1780 = vmatprep.subr.bf16.mxu0 (!%p285_p3), %v1935_v9  ;;  %1784 = vmatprep.mubr.msk.bf16.mxu0 (!%p285_p3), %vm1936_vm1, %v1935_v9  ;;  %v1889_v11 = vld [vmem:[%s2263_s2] sm:$0xff] (!%p285_p3)   ;;  %v1890_v12 = vld [vmem:[%s2263_s2 + $0x8] sm:$0xff] (!%p285_p3)   ;;  %vm373_vm2 = vcmask (!%p285_p3), 257024   ;;  %s1937_s10 = smov (!%p285_p3), 104   ;;  %vm591_vm3 = vcmask (!%p285_p3), 60416  }
   0x8   : > { %1781 = vmatpush3.bf16.msra.mxu0 (!%p285_p3), %v1887_v8  ;;  %1788 = vmatprep.subr.bf16.mxu1 (!%p285_p3), %v1935_v9  ;;  %v2045_v17 = vshrl.u32 (!%p285_p3), %v362_v15, 7  ;;  %v1725_v30 = vld [vmem:[%s2266_s5] ss:$0 sm:$0xff] (!%p285_p3)  ;;  %s1938_s11 = smov (!%p285_p3), 120   ;;  %s1939_s14 = smov (!%p285_p3), 112   ;;  %vm984_vm4 = vcmask (!%p285_p3), 64512  }
   0x9   : > { %1782 = vmatprep.subr.bf16.mxu0 (!%p285_p3), %v1935_v9  ;;  %1792 = vmatprep.mubr.msk.bf16.mxu1 (!%p285_p3), %vm1936_vm1, %v1935_v9  ;;  %v1733_v36 = vld [vmem:[%s2264_s3] ss:$0 sm:$0xff] (!%p285_p3)  ;;  %v1940_v43 = vmov (!%p285_p3), 1983009808   ;;  %v1941_v45 = vmov (!%p285_p3), 1934713408  }
   0xa   : > { %1789 = vmatpush3.bf16.msra.mxu1 (!%p285_p3), %v1889_v11  ;;  %v364_v20 = vsub.s32 (!%p285_p3), 1, %v2045_v17  ;;  %v369_v21 = vsub.s32 (!%p285_p3), 0, %v2045_v17  ;;  %v454_v44 = vunpack.c.l.s4 (!%p285_p3), %v1940_v43  ;;  %v486_v46 = vunpack.c.l.s4 (!%p285_p3), %v1941_v45  ;;  %s1942_s15 = smov (!%p285_p3), 96   ;;  %s1943_s20 = smov (!%p285_p3), 16  }
   0xb   : > { %1790 = vmatprep.subr.bf16.mxu1 (!%p285_p3), %v1935_v9  ;;  %vm1220_vm5 = vcmask (!%p285_p3), 1043456   ;;  %s1945_s22 = smov (!%p285_p3), 24   ;;  %vm1551_vm6 = vcmask (!%p285_p3), 130048   ;;  %vm1553_vm7 = vcmask (!%p285_p3), 195584  }
   0xc   : > { %1783 = vmatpush3.bf16.msra.mxu0 (!%p285_p3), %v1888_v10  ;;  %v455_v47 = vunpack.c.0.s8 (!%p285_p3), %v454_v44  ;;  %v487_v50 = vunpack.c.0.s8 (!%p285_p3), %v486_v46 }
   0xd   : > { %1796 = vmatprep.subr.bf16.mxu0 (!%p285_p3), %v1935_v9 }
   0xe   : > { %s2275_s27 = smov (!%p323_p4, %s1925_s27), 1  ;;  %1791 = vmatpush3.bf16.msra.mxu1 %v1890_v12  ;;  %v2079_v51 = vsub.s32 %v455_v47, %v2045_v17  ;;  %v2092_v57 = vsub.s32 %v487_v50, %v2045_v17 }
   0xf   : > { %s1722_s9 = sshll.u32 %s2275_s27, 2  ;;  %1802 = vmatprep.subr.bf16.mxu1 %v1935_v9  ;;  %s1723_s21 = sshll.u32 %s2275_s27, 3 }
  0x10   : > { %s326_s12 = scalar_lea.vmem %s2261_s0, %s1722_s9  ;;  %s330_s24 = scalar_lea.vmem %s2262_s1, %s1723_s21 }
  0x11   : > { %v344_v0 = vld [vmem:[%s326_s12] sm:$0xf]  ;;  %s1944_s21 = smov 8  }
  0x12   : > { %v345_v1 = vunpack.c.l.bf16 %v344_v0  ;;  %v2047_v18 = vld [vmem:[%s330_s24] sm:$0x3f] }
  0x13   : > { %v361_v19 = vadd.f32 1.0, %v2047_v18  ;;  %v370_v25 = vrot.slane %v2047_v18, %v369_v21 }
  0x14   : > { %v347_v2 = vsel %vm346_vm0, %v345_v1, 0.0 }
  0x15   : > { %348 = vadd.xlane.f32.xlu0 %v347_v2  ;;  %v365_v22 = vrot.slane %v361_v19, %v364_v20 }
  0xa2   : > { %v349_v3 = vpop.xlane.xlu0 %348 }
  0xa3   : > { %v351_v4 = vmul.f32 0.03125, %v349_v3 }
  0xa5   : > { %v352_v5 = vsub.f32 %v345_v1, %v351_v4 }
  0xa7   : > { %v353_v6 = vmul.f32 %v352_v5, %v352_v5 }
  0xa9   : > { %v354_v7 = vsel %vm346_vm0, %v353_v6, 0.0 }
  0xaa   : > { %355 = vadd.xlane.f32.xlu0 %v354_v7 }
 0x137   : > { %v356_v13 = vpop.xlane.xlu0 %355 }
 0x138   : > { %v357_v14 = vmul.f32 0.03125, %v356_v13 }
 0x13a   : > { %v358_v16 = vadd.f32 1e-06, %v357_v14 }
 0x13c   : > { %1893 = vrsqrt.f32 %v358_v16 }
 0x146   : > { %v1894_v23 = vpop.eup %1893 }
 0x147   : > { %v360_v24 = vmul.f32 %v1894_v23, %v352_v5 }
 0x149   : > { %v366_v26 = vmul.f32 %v365_v22, %v360_v24 }
 0x14b   : > { %v371_v27 = vadd.f32 %v370_v25, %v366_v26 }
 0x14d   : > { %v372_v28 = vpack.c.bf16 %v371_v27, %v371_v27 }
 0x14f   : > { %374 = vst.msk [vmem:[#allocation2] sm:$0xf] %vm373_vm2, %v372_v28  ;;  %1785 = vmatmul.mubr.msk.bf16.vlgmr.msra.gmra.mrb[0].mxu0 %vm346_vm0, %v372_v28 }
 0x150   : > { %1798 = vmatprep.mubr.msk.bf16.mxu0 %vm1936_vm1, %v1935_v9 }
 0x156   : > { %v2057_v29 = vld [vmem:[#allocation2] sm:$0xf] }
 0x157   : > { %1793 = vmatmul.mubr.msk.bf16.vlgmr.msra.gmra.mrb[0].mxu1 %vm346_vm0, %v2057_v29 }
 0x158   : > { %1804 = vmatprep.mubr.msk.bf16.mxu1 %vm1936_vm1, %v1935_v9 }
 0x222   : > { %v435_v31 = vpop.f32.mrb[0].mxu0 }
 0x223   : > { %v2066_v32 = vadd.f32 %v1725_v30, %v435_v31  ;;  %v1786_v33 = vpop.f32.mrb[1].mxu0 }
 0x224   : > { %v438_v34 = vpop.f32.mrb[2].mxu0 }
 0x225   : > { %448 = vrot.lane.b32.xlu0 %v2066_v32, %s1937_s10  ;;  %442 = vrot.lane.b32.xlu1 %v2066_v32, %s1938_s11  ;;  %v1787_v35 = vpop.f32.mrb[3].mxu0 }
 0x229   : > { %445 = vrot.lane.b32.xlu1 %v2066_v32, %s1939_s14 }
 0x22a   : > { %v819_v37 = vpop.f32.mrb[0].mxu1 }
 0x22b   : > { %v820_v38 = vadd.f32 %v1733_v36, %v819_v37  ;;  %v1794_v39 = vpop.f32.mrb[1].mxu1 }
 0x22c   : > { %v822_v40 = vpop.f32.mrb[2].mxu1 }
 0x22d   : > { %v825_v41 = vmul.f32 0.35355338, %v820_v38  ;;  %v1795_v42 = vpop.f32.mrb[3].mxu1 }
 0x22f   : > { %827 = vrot.lane.b32.xlu1 %v825_v41, %s1938_s11 }
 0x233   : > { %830 = vrot.lane.b32.xlu1 %v825_v41, %s1939_s14 }
 0x237   : > { %833 = vrot.lane.b32.xlu1 %v825_v41, %s1937_s10  ;;  %s337_s10 = scalar_lea.vmem %s2269_s8, %s1722_s9 }
 0x297   : > { %v2074_v48 = vpop.permute.xlu0 %448  ;;  %v2076_v49 = vpop.permute.xlu1 %442 }
 0x298   : > { %v467_v52 = vcombine.low %v2076_v49, %v2074_v48  ;;  %v468_v53 = vcombine.high %v2076_v49, %v2074_v48 }
 0x29a   : > { %v475_v58 = vrot.slane %v467_v52, %v2079_v51  ;;  %v482_v59 = vrot.slane %v468_v53, %v2079_v51 }
 0x29b   : > { %v2085_v54 = vpop.permute.xlu1 %445 }
 0x29c   : > { %v451_v55 = vcombine.low %v2066_v32, %v2085_v54  ;;  %v452_v56 = vcombine.high %v2066_v32, %v2085_v54 }
 0x29e   : > { %v459_v60 = vrot.slane %v451_v55, %v2079_v51  ;;  %v466_v61 = vrot.slane %v452_v56, %v2079_v51 }
 0x2a0   : > { %v483_v62 = vcombine.low %v459_v60, %v475_v58  ;;  %v484_v63 = vcombine.high %v459_v60, %v475_v58  ;;  %v499_v0 = vcombine.low %v466_v61, %v482_v59  ;;  %v500_v1 = vcombine.high %v466_v61, %v482_v59 }
 0x2a1   : > { %v828_v2 = vpop.permute.xlu1 %827 }
 0x2a2   : > { %v491_v3 = vrot.slane %v483_v62, %v2092_v57  ;;  %v498_v4 = vrot.slane %v484_v63, %v2092_v57  ;;  %v507_v5 = vrot.slane %v499_v0, %v2092_v57  ;;  %v514_v6 = vrot.slane %v500_v1, %v2092_v57 }
 0x2a4   : > { %v519_v7 = vcombine.low %v491_v3, %v498_v4  ;;  %v1729_v8 = vcombine.high %v491_v3, %v498_v4  ;;  %v535_v10 = vcombine.low %v507_v5, %v514_v6  ;;  %v1730_v11 = vcombine.high %v507_v5, %v514_v6 }
 0x2a5   : > { %v831_v12 = vpop.permute.xlu1 %830 }
 0x2a6   : > { %v526_v13 = vrot.slane %v519_v7, %v2079_v51  ;;  %v534_v14 = vrot.slane %v1729_v8, %v2079_v51  ;;  %v542_v15 = vrot.slane %v535_v10, %v2079_v51  ;;  %v550_v16 = vrot.slane %v1730_v11, %v2079_v51 }
 0x2a7   : > { %v836_v23 = vcombine.low %v825_v41, %v831_v12  ;;  %v837_v24 = vcombine.high %v825_v41, %v831_v12 }
 0x2a8   : > { %v551_v19 = vcombine.low %v526_v13, %v534_v14  ;;  %v552_v20 = vcombine.high %v526_v13, %v534_v14  ;;  %v567_v21 = vcombine.low %v542_v15, %v550_v16  ;;  %v568_v22 = vcombine.high %v542_v15, %v550_v16 }
 0x2a9   : > { %v834_v25 = vpop.permute.xlu1 %833  ;;  %v844_v38 = vrot.slane %v836_v23, %v2079_v51  ;;  %v851_v39 = vrot.slane %v837_v24, %v2079_v51 }
 0x2aa   : > { %v559_v26 = vrot.slane %v551_v19, %v2092_v57  ;;  %v566_v27 = vrot.slane %v552_v20, %v2092_v57  ;;  %v575_v28 = vrot.slane %v567_v21, %v2092_v57  ;;  %v582_v30 = vrot.slane %v568_v22, %v2092_v57 }
 0x2ab   : > { %v852_v31 = vcombine.low %v828_v2, %v834_v25  ;;  %v853_v33 = vcombine.high %v828_v2, %v834_v25 }
 0x2ac   : > { %v583_v34 = vcombine.low %v559_v26, %v575_v28  ;;  %v584_v35 = vcombine.high %v559_v26, %v575_v28  ;;  %v585_v36 = vcombine.low %v566_v27, %v582_v30  ;;  %v586_v37 = vcombine.high %v566_v27, %v582_v30 }
 0x2ad   : > { %v860_v40 = vrot.slane %v852_v31, %v2079_v51  ;;  %v867_v41 = vrot.slane %v853_v33, %v2079_v51 }
 0x2ae   : > { %v587_v42 = vpack.c.bf16 %v583_v34, %v583_v34  ;;  %v588_v43 = vpack.c.bf16 %v584_v35, %v584_v35  ;;  %v589_v44 = vpack.c.bf16 %v585_v36, %v585_v36  ;;  %v590_v45 = vpack.c.bf16 %v586_v37, %v586_v37 }
 0x2af   : > { %v868_v46 = vcombine.low %v844_v38, %v860_v40  ;;  %v869_v47 = vcombine.high %v844_v38, %v860_v40  ;;  %v884_v50 = vcombine.low %v851_v39, %v867_v41  ;;  %v885_v52 = vcombine.high %v851_v39, %v867_v41 }
 0x2b0   : > { %592 = vst.msk [vmem:[#allocation3] sm:$0xf] %vm591_vm3, %v587_v42  ;;  %593 = vst.msk [vmem:[#allocation3 + $0x4] sm:$0xf] %vm591_vm3, %v588_v43 }
 0x2b1   : > { %594 = vst.msk [vmem:[#allocation3 + $0x8] sm:$0xf] %vm591_vm3, %v589_v44  ;;  %595 = vst.msk [vmem:[#allocation3 + $0xc] sm:$0xf] %vm591_vm3, %v590_v45  ;;  %v876_v53 = vrot.slane %v868_v46, %v2092_v57  ;;  %v883_v55 = vrot.slane %v869_v47, %v2092_v57  ;;  %v892_v56 = vrot.slane %v884_v50, %v2092_v57 }
 0x2b2   : > { %v899_v58 = vrot.slane %v885_v52, %v2092_v57 }
 0x2b3   : > { %v904_v59 = vcombine.low %v876_v53, %v883_v55  ;;  %v1737_v60 = vcombine.high %v876_v53, %v883_v55 }
 0x2b4   : > { %v920_v61 = vcombine.low %v892_v56, %v899_v58  ;;  %v1738_v62 = vcombine.high %v892_v56, %v899_v58 }
 0x2b5   : > { %v911_v63 = vrot.slane %v904_v59, %v2079_v51  ;;  %v919_v0 = vrot.slane %v1737_v60, %v2079_v51 }
 0x2b6   : > { %v927_v1 = vrot.slane %v920_v61, %v2079_v51  ;;  %v935_v2 = vrot.slane %v1738_v62, %v2079_v51 }
 0x2b7   : > { %v936_v3 = vcombine.low %v911_v63, %v919_v0  ;;  %v976_v5 = vld [vmem:[#allocation3] sm:$0xf]  ;;  %v977_v6 = vld [vmem:[#allocation3 + $0x4] sm:$0xf]  ;;  %v937_v12 = vcombine.high %v911_v63, %v919_v0 }
 0x2b8   : > { %v952_v4 = vcombine.low %v927_v1, %v935_v2  ;;  %v989_v7 = vsel %vm984_vm4, %v976_v5, 0  ;;  %v1035_v8 = vsel %vm984_vm4, %v977_v6, 0  ;;  %v953_v13 = vcombine.high %v927_v1, %v935_v2  ;;  %v978_v16 = vld [vmem:[#allocation3 + $0x8] sm:$0xf]  ;;  %v979_v19 = vld [vmem:[#allocation3 + $0xc] sm:$0xf] }
 0x2b9   : > { %1797 = vmatpush3.bf16.xpose.msra.mxu0 %v989_v7  ;;  %1803 = vmatpush3.bf16.xpose.msra.mxu1 %v1035_v8  ;;  %v944_v10 = vrot.slane %v936_v3, %v2092_v57  ;;  %v951_v22 = vrot.slane %v937_v12, %v2092_v57  ;;  %v1081_v24 = vsel %vm984_vm4, %v978_v16, 0  ;;  %v1127_v25 = vsel %vm984_vm4, %v979_v19, 0 }
 0x2ba   : > { %v960_v11 = vrot.slane %v952_v4, %v2092_v57  ;;  %1808 = vmatprep.subr.bf16.mxu0 %v1935_v9  ;;  %1814 = vmatprep.subr.bf16.mxu1 %v1935_v9  ;;  %v967_v23 = vrot.slane %v953_v13, %v2092_v57 }
 0x2bc   : > { %v968_v14 = vcombine.low %v944_v10, %v960_v11  ;;  %v969_v15 = vcombine.high %v944_v10, %v960_v11  ;;  %v970_v26 = vcombine.low %v951_v22, %v967_v23  ;;  %v971_v27 = vcombine.high %v951_v22, %v967_v23 }
 0x2be   : > { %v972_v20 = vpack.c.bf16 %v968_v14, %v968_v14  ;;  %v973_v21 = vpack.c.bf16 %v969_v15, %v969_v15  ;;  %v974_v28 = vpack.c.bf16 %v970_v26, %v970_v26  ;;  %v975_v30 = vpack.c.bf16 %v971_v27, %v971_v27 }
 0x2c0   : > { %1799 = vmatmul.mubr.msk.bf16.vlgmr.msra.gmra.mrb[4].mxu0 %vm984_vm4, %v972_v20  ;;  %1805 = vmatmul.mubr.msk.bf16.vlgmr.msra.gmra.mrb[4].mxu1 %vm984_vm4, %v973_v21 }
 0x2c1   : > { %1809 = vmatpush3.bf16.xpose.msra.mxu0 %v1081_v24  ;;  %1815 = vmatpush3.bf16.xpose.msra.mxu1 %v1127_v25 }
 0x2c2   : > { %1810 = vmatprep.mubr.msk.bf16.mxu0 %vm1936_vm1, %v1935_v9  ;;  %1816 = vmatprep.mubr.msk.bf16.mxu1 %vm1936_vm1, %v1935_v9 }
 0x2c3   : > { %1820 = vmatprep.subr.bf16.mxu0 %v1935_v9  ;;  %1826 = vmatprep.subr.bf16.mxu1 %v1935_v9 }
 0x2c8   : > { %1811 = vmatmul.mubr.msk.bf16.vlgmr.msra.gmra.mrb[8].mxu0 %vm984_vm4, %v974_v28  ;;  %1817 = vmatmul.mubr.msk.bf16.vlgmr.msra.gmra.mrb[8].mxu1 %vm984_vm4, %v975_v30 }
 0x2c9   : > { %1822 = vmatprep.mubr.msk.bf16.mxu0 %vm1936_vm1, %v1935_v9  ;;  %1828 = vmatprep.mubr.msk.bf16.mxu1 %vm1936_vm1, %v1935_v9 }
 0x393   : > { %v1025_v31 = vpop.f32.mrb[4].mxu0  ;;  %v1071_v33 = vpop.f32.mrb[4].mxu1 }
 0x394   : > { %v1800_v34 = vpop.f32.mrb[5].mxu0  ;;  %v1806_v35 = vpop.f32.mrb[5].mxu1  ;;  %v1169_v36 = vsel %vm984_vm4, %v1025_v31, -inf  ;;  %v1172_v37 = vsel %vm984_vm4, %v1071_v33, -inf }
 0x395   : > { %1170 = vmax.xlane.f32.xlu1 %v1169_v36  ;;  %v1028_v38 = vpop.f32.mrb[6].mxu0  ;;  %1173 = vmax.xlane.f32.xlu0 %v1172_v37  ;;  %v1074_v39 = vpop.f32.mrb[6].mxu1 }
 0x396   : > { %v1801_v40 = vpop.f32.mrb[7].mxu0  ;;  %v1807_v41 = vpop.f32.mrb[7].mxu1 }
 0x39b   : > { %v1117_v42 = vpop.f32.mrb[8].mxu0  ;;  %v1163_v43 = vpop.f32.mrb[8].mxu1 }
 0x39c   : > { %v1812_v44 = vpop.f32.mrb[9].mxu0  ;;  %v1818_v45 = vpop.f32.mrb[9].mxu1  ;;  %v1175_v46 = vsel %vm984_vm4, %v1117_v42, -inf  ;;  %v1178_v55 = vsel %vm984_vm4, %v1163_v43, -inf }
 0x39d   : > { %1176 = vmax.xlane.f32.xlu1 %v1175_v46  ;;  %v1120_v47 = vpop.f32.mrb[10].mxu0  ;;  %v1166_v50 = vpop.f32.mrb[10].mxu1 }
 0x39e   : > { %v1813_v52 = vpop.f32.mrb[11].mxu0  ;;  %v1819_v53 = vpop.f32.mrb[11].mxu1 }
 0x3a1   : > { %1179 = vmax.xlane.f32.xlu1 %v1178_v55 }
 0x3ab   : > { %596 = vrot.lane.b32.xlu0 %v2066_v32, %s1942_s15 }
 0x3af   : > { %602 = vrot.lane.b32.xlu0 %v2074_v48, %s1942_s15 }
 0x3b2   : > { %598 = vrot.lane.b32.xlu1 %v2076_v49, %s1942_s15 }
 0x3b6   : > { %600 = vrot.lane.b32.xlu1 %v2085_v54, %s1942_s15 }
 0x422   : > { %v1171_v56 = vpop.xlane.xlu1 %1170  ;;  %v1174_v58 = vpop.xlane.xlu0 %1173 }
 0x423   : > { %v1181_v59 = vsub.f32 %v1025_v31, %v1171_v56  ;;  %v1182_v60 = vsub.f32 %v1071_v33, %v1174_v58 }
 0x425   : > { %v1185_v61 = vmul.f32 1.442695, %v1181_v59  ;;  %v1187_v62 = vmul.f32 1.442695, %v1182_v60 }
 0x426   : > { %v597_v2 = vpop.permute.xlu0 %596 }
 0x427   : > { %1895 = vpow2.f32 %v1185_v61 }
 0x428   : > { %1897 = vpow2.f32 %v1187_v62 }
 0x42a   : > { %v1177_v63 = vpop.xlane.xlu1 %1176  ;;  %v603_v7 = vpop.permute.xlu0 %602 }
 0x42b   : > { %v1183_v0 = vsub.f32 %v1117_v42, %v1177_v63 }
 0x42d   : > { %v1189_v1 = vmul.f32 1.442695, %v1183_v0 }
 0x42e   : > { %v1180_v3 = vpop.xlane.xlu1 %1179 }
 0x42f   : > { %1899 = vpow2.f32 %v1189_v1  ;;  %v1184_v32 = vsub.f32 %v1163_v43, %v1180_v3 }
 0x431   : > { %v2158_v48 = vpop.eup %1895  ;;  %v1191_v49 = vmul.f32 1.442695, %v1184_v32 }
 0x432   : > { %v2160_v4 = vpop.eup %1897  ;;  %v599_v54 = vpop.permute.xlu1 %598  ;;  %v1193_v5 = vsel %vm984_vm4, %v2158_v48, 0.0 }
 0x433   : > { %1901 = vpow2.f32 %v1191_v49  ;;  %v1196_v6 = vsel %vm984_vm4, %v2160_v4, 0.0  ;;  %1194 = vadd.xlane.f32.xlu1 %v1193_v5  ;;  %v624_v8 = vcombine.low %v599_v54, %v603_v7  ;;  %v625_v10 = vcombine.high %v599_v54, %v603_v7 }
 0x434   : > { %1197 = vadd.xlane.f32.xlu0 %v1196_v6 }
 0x435   : > { %v632_v15 = vrot.slane %v624_v8, %v2079_v51  ;;  %v639_v16 = vrot.slane %v625_v10, %v2079_v51 }
 0x436   : > { %v601_v11 = vpop.permute.xlu1 %600 }
 0x437   : > { %v608_v12 = vcombine.low %v597_v2, %v601_v11  ;;  %v609_v13 = vcombine.high %v597_v2, %v601_v11 }
 0x439   : > { %v2166_v14 = vpop.eup %1899  ;;  %v616_v19 = vrot.slane %v608_v12, %v2079_v51  ;;  %v623_v20 = vrot.slane %v609_v13, %v2079_v51 }
 0x43a   : > { %v1199_v21 = vsel %vm984_vm4, %v2166_v14, 0.0 }
 0x43b   : > { %v640_v22 = vcombine.low %v616_v19, %v632_v15  ;;  %v641_v23 = vcombine.high %v616_v19, %v632_v15  ;;  %v656_v24 = vcombine.low %v623_v20, %v639_v16  ;;  %v657_v25 = vcombine.high %v623_v20, %v639_v16  ;;  %1200 = vadd.xlane.f32.xlu0 %v1199_v21 }
 0x43d   : > { %v2174_v26 = vpop.eup %1901  ;;  %v648_v27 = vrot.slane %v640_v22, %v2092_v57  ;;  %v655_v28 = vrot.slane %v641_v23, %v2092_v57  ;;  %v664_v30 = vrot.slane %v656_v24, %v2092_v57  ;;  %v671_v31 = vrot.slane %v657_v25, %v2092_v57 }
 0x43e   : > { %v1202_v33 = vsel %vm984_vm4, %v2174_v26, 0.0 }
 0x43f   : > { %v676_v34 = vcombine.low %v648_v27, %v655_v28  ;;  %v1731_v35 = vcombine.high %v648_v27, %v655_v28  ;;  %v692_v36 = vcombine.low %v664_v30, %v671_v31  ;;  %v1732_v37 = vcombine.high %v664_v30, %v671_v31  ;;  %1203 = vadd.xlane.f32.xlu1 %v1202_v33 }
 0x441   : > { %v683_v38 = vrot.slane %v676_v34, %v2079_v51  ;;  %v691_v39 = vrot.slane %v1731_v35, %v2079_v51  ;;  %v699_v40 = vrot.slane %v692_v36, %v2079_v51  ;;  %v707_v41 = vrot.slane %v1732_v37, %v2079_v51 }
 0x443   : > { %v708_v42 = vcombine.low %v683_v38, %v691_v39  ;;  %v709_v43 = vcombine.high %v683_v38, %v691_v39  ;;  %v724_v44 = vcombine.low %v699_v40, %v707_v41  ;;  %v725_v45 = vcombine.high %v699_v40, %v707_v41 }
 0x445   : > { %v716_v46 = vrot.slane %v708_v42, %v2092_v57  ;;  %v723_v47 = vrot.slane %v709_v43, %v2092_v57  ;;  %v732_v50 = vrot.slane %v724_v44, %v2092_v57  ;;  %v739_v52 = vrot.slane %v725_v45, %v2092_v57 }
 0x447   : > { %v740_v53 = vcombine.low %v716_v46, %v732_v50  ;;  %v741_v55 = vcombine.high %v716_v46, %v732_v50  ;;  %v742_v56 = vcombine.low %v723_v47, %v739_v52  ;;  %v743_v58 = vcombine.high %v723_v47, %v739_v52 }
 0x449   : > { %v744_v59 = vpack.c.bf16 %v740_v53, %v740_v53  ;;  %v745_v60 = vpack.c.bf16 %v741_v55, %v741_v55  ;;  %v746_v61 = vpack.c.bf16 %v742_v56, %v742_v56  ;;  %v747_v62 = vpack.c.bf16 %v743_v58, %v743_v58  ;;  %v1891_v56 = vld [vmem:[%s2267_s6] sm:$0xff]  }
 0x44b   : > { %748 = vst.msk [vmem:[#allocation4] sm:$0xf] %vm591_vm3, %v744_v59  ;;  %749 = vst.msk [vmem:[#allocation4 + $0x4] sm:$0xf] %vm591_vm3, %v745_v60 }
 0x44c   : > { %750 = vst.msk [vmem:[#allocation4 + $0x8] sm:$0xf] %vm591_vm3, %v746_v61  ;;  %751 = vst.msk [vmem:[#allocation4 + $0xc] sm:$0xf] %vm591_vm3, %v747_v62 }
 0x452   : > { %v980_v63 = vld [vmem:[#allocation4] sm:$0xf]  ;;  %v981_v0 = vld [vmem:[#allocation4 + $0x4] sm:$0xf] }
 0x453   : > { %v1222_v1 = vsel %vm1220_vm5, %v980_v63, 0  ;;  %v1268_v2 = vsel %vm1220_vm5, %v981_v0, 0  ;;  %v982_v10 = vld [vmem:[#allocation4 + $0x8] sm:$0xf]  ;;  %v983_v12 = vld [vmem:[#allocation4 + $0xc] sm:$0xf] }
 0x454   : > { %1821 = vmatpush3.bf16.msra.mxu0 %v1222_v1  ;;  %1827 = vmatpush3.bf16.msra.mxu1 %v1268_v2  ;;  %v1314_v15 = vsel %vm1220_vm5, %v982_v10, 0  ;;  %v1360_v16 = vsel %vm1220_vm5, %v983_v12, 0  ;;  %v1892_v2 = vld [vmem:[%s2267_s6 + $0x8] sm:$0xff]  }
 0x455   : > { %1832 = vmatprep.subr.bf16.mxu0 %v1935_v9  ;;  %1838 = vmatprep.subr.bf16.mxu1 %v1935_v9 }
 0x4c0   : > { %v1195_v3 = vpop.xlane.xlu1 %1194 }
 0x4c1   : > { %v1198_v32 = vpop.xlane.xlu0 %1197  ;;  %1903 = vrcp.f32 %v1195_v3 }
 0x4c2   : > { %1905 = vrcp.f32 %v1198_v32 }
 0x4c8   : > { %v1201_v49 = vpop.xlane.xlu0 %1200 }
 0x4c9   : > { %1907 = vrcp.f32 %v1201_v49 }
 0x4cb   : > { %v1904_v54 = vpop.eup %1903 }
 0x4cc   : > { %v1906_v5 = vpop.eup %1905  ;;  %v1206_v6 = vmul.f32 %v1904_v54, %v2158_v48  ;;  %v1204_v7 = vpop.xlane.xlu1 %1203 }
 0x4cd   : > { %v1208_v8 = vmul.f32 %v1906_v5, %v2160_v4  ;;  %1909 = vrcp.f32 %v1204_v7 }
 0x4ce   : > { %v1213_v11 = vpack.c.bf16 %v1206_v6, %v1206_v6 }
 0x4cf   : > { %v1214_v13 = vpack.c.bf16 %v1208_v8, %v1208_v8 }
 0x4d0   : > { %1823 = vmatmul.mubr.msk.bf16.vlgmr.msra.gmra.mrb[12].mxu0 %vm984_vm4, %v1213_v11 }
 0x4d1   : > { %1829 = vmatmul.mubr.msk.bf16.vlgmr.msra.gmra.mrb[12].mxu1 %vm984_vm4, %v1214_v13  ;;  %1833 = vmatpush3.bf16.msra.mxu0 %v1314_v15 }
 0x4d2   : > { %1839 = vmatpush3.bf16.msra.mxu1 %v1360_v16  ;;  %1834 = vmatprep.mubr.msk.bf16.mxu0 %vm1936_vm1, %v1935_v9 }
 0x4d3   : > { %v1908_v48 = vpop.eup %1907  ;;  %1840 = vmatprep.mubr.msk.bf16.mxu1 %vm1936_vm1, %v1935_v9  ;;  %1844 = vmatprep.subr.bf16.mxu0 %v1935_v9 }
 0x4d4   : > { %v1210_v4 = vmul.f32 %v1908_v48, %v2166_v14 }
 0x4d6   : > { %v1215_v19 = vpack.c.bf16 %v1210_v4, %v1210_v4 }
 0x4d7   : > { %v1910_v20 = vpop.eup %1909 }
 0x4d8   : > { %v1212_v21 = vmul.f32 %v1910_v20, %v2174_v26  ;;  %1835 = vmatmul.mubr.msk.bf16.vlgmr.msra.gmra.mrb[16].mxu0 %vm984_vm4, %v1215_v19 }
 0x4d9   : > { %1848 = vmatprep.mubr.msk.bf16.mxu0 %vm1936_vm1, %v1935_v9  ;;  %1845 = vmatpush3.bf16.msra.mxu0 %v1891_v56 }
 0x4da   : > { %v1216_v22 = vpack.c.bf16 %v1212_v21, %v1212_v21  ;;  %1846 = vmatprep.subr.bf16.mxu0 %v1935_v9 }
 0x4dc   : > { %1841 = vmatmul.mubr.msk.bf16.vlgmr.msra.gmra.mrb[16].mxu1 %vm984_vm4, %v1216_v22 }
 0x4dd   : > { %1847 = vmatpush3.bf16.msra.mxu0 %v1892_v2 }
 0x5a3   : > { %v1258_v23 = vpop.f32.mrb[12].mxu0 }
 0x5a4   : > { %v1304_v24 = vpop.f32.mrb[12].mxu1  ;;  %v1824_v25 = vpop.f32.mrb[13].mxu0 }
 0x5a5   : > { %v1830_v27 = vpop.f32.mrb[13].mxu1  ;;  %v1261_v28 = vpop.f32.mrb[14].mxu0 }
 0x5a6   : > { %v1307_v30 = vpop.f32.mrb[14].mxu1  ;;  %v1825_v31 = vpop.f32.mrb[15].mxu0 }
 0x5a7   : > { %v1831_v14 = vpop.f32.mrb[15].mxu1 }
 0x5a8   : > { %v1622_v14 = vunpack.c.l.bf16 %v2057_v29 }
 0x5ab   : > { %v1350_v33 = vpop.f32.mrb[16].mxu0 }
 0x5ac   : > { %v1402_v34 = vcombine.low %v1258_v23, %v1350_v33  ;;  %v1403_v35 = vcombine.high %v1258_v23, %v1350_v33  ;;  %v1836_v26 = vpop.f32.mrb[17].mxu0  ;;  %v1625_v23 = vsub.s32 2, %v2045_v17 }
 0x5ad   : > { %v1353_v36 = vpop.f32.mrb[18].mxu0 }
 0x5ae   : > { %v1837_v37 = vpop.f32.mrb[19].mxu0  ;;  %v1410_v43 = vrot.slane %v1402_v34, %v2079_v51  ;;  %v1417_v44 = vrot.slane %v1403_v35, %v2079_v51  ;;  %v1626_v25 = vrot.slane %v2047_v18, %v1625_v23 }
 0x5af   : > { %v1396_v38 = vpop.f32.mrb[16].mxu1 }
 0x5b0   : > { %v1418_v39 = vcombine.low %v1304_v24, %v1396_v38  ;;  %v1419_v40 = vcombine.high %v1304_v24, %v1396_v38  ;;  %v1842_v41 = vpop.f32.mrb[17].mxu1  ;;  %v1749_v24 = vld [vmem:[%s2268_s7] ss:$0 sm:$0xff] }
 0x5b1   : > { %v1399_v42 = vpop.f32.mrb[18].mxu1 }
 0x5b2   : > { %v1426_v45 = vrot.slane %v1418_v39, %v2079_v51  ;;  %v1433_v46 = vrot.slane %v1419_v40, %v2079_v51  ;;  %v1843_v47 = vpop.f32.mrb[19].mxu1 }
 0x5b4   : > { %v1434_v50 = vcombine.low %v1410_v43, %v1426_v45  ;;  %v1435_v52 = vcombine.high %v1410_v43, %v1426_v45  ;;  %v1450_v53 = vcombine.low %v1417_v44, %v1433_v46  ;;  %v1451_v55 = vcombine.high %v1417_v44, %v1433_v46 }
 0x5b6   : > { %v1442_v58 = vrot.slane %v1434_v50, %v2092_v57  ;;  %v1449_v59 = vrot.slane %v1435_v52, %v2092_v57  ;;  %v1458_v60 = vrot.slane %v1450_v53, %v2092_v57  ;;  %v1465_v61 = vrot.slane %v1451_v55, %v2092_v57 }
 0x5b8   : > { %v1470_v62 = vcombine.low %v1442_v58, %v1449_v59  ;;  %v1747_v63 = vcombine.high %v1442_v58, %v1449_v59  ;;  %v1486_v0 = vcombine.low %v1458_v60, %v1465_v61  ;;  %v1748_v1 = vcombine.high %v1458_v60, %v1465_v61 }
 0x5ba   : > { %v1477_v3 = vrot.slane %v1470_v62, %v2079_v51  ;;  %v1485_v32 = vrot.slane %v1747_v63, %v2079_v51  ;;  %v1493_v49 = vrot.slane %v1486_v0, %v2079_v51  ;;  %v1501_v54 = vrot.slane %v1748_v1, %v2079_v51 }
 0x5bc   : > { %v1503_v5 = vcombine.high %v1477_v3, %v1485_v32  ;;  %v1519_v6 = vcombine.high %v1493_v49, %v1501_v54  ;;  %v1502_v7 = vcombine.low %v1477_v3, %v1485_v32  ;;  %v1518_v8 = vcombine.low %v1493_v49, %v1501_v54 }
 0x5be   : > { %v1517_v10 = vrot.slane %v1503_v5, %v2092_v57  ;;  %v1533_v9 = vrot.slane %v1519_v6, %v2092_v57  ;;  %v1510_v11 = vrot.slane %v1502_v7, %v2092_v57  ;;  %v1526_v12 = vrot.slane %v1518_v8, %v2092_v57 }
 0x5c0   : > { %v1536_v13 = vcombine.low %v1517_v10, %v1533_v9  ;;  %v1535_v15 = vcombine.high %v1510_v11, %v1526_v12  ;;  %v1537_v16 = vcombine.high %v1517_v10, %v1533_v9  ;;  %v1534_v48 = vcombine.low %v1510_v11, %v1526_v12 }
 0x5c2   : > { %1543 = vrot.lane.b32.xlu1 %v1536_v13, %s1943_s20  ;;  %1539 = vrot.lane.b32.xlu0 %v1535_v15, %s1944_s21 }
 0x5c6   : > { %1547 = vrot.lane.b32.xlu1 %v1537_v16, %s1945_s22 }
 0x634   : > { %v1544_v51 = vpop.permute.xlu1 %1543  ;;  %v1540_v4 = vpop.permute.xlu0 %1539 }
 0x635   : > { %v1550_v19 = vsel %vm984_vm4, %v1534_v48, %v1540_v4 }
 0x636   : > { %v1552_v21 = vsel %vm1551_vm6, %v1550_v19, %v1544_v51 }
 0x638   : > { %v1548_v20 = vpop.permute.xlu1 %1547 }
 0x639   : > { %v1554_v57 = vsel %vm1553_vm7, %v1552_v21, %v1548_v20 }
 0x63a   : > { %v1555_v22 = vpack.c.bf16 %v1554_v57, %v1554_v57 }
 0x63c   : > { %1849 = vmatmul.mubr.msk.bf16.vlgmr.msra.gmra.mrb[20].mxu0 %vm346_vm0, %v1555_v22 }
 0x70f   : > { %v1616_v27 = vpop.f32.mrb[20].mxu0 }
 0x710   : > { %v1617_v28 = vadd.f32 %v1749_v24, %v1616_v27  ;;  %v1850_v30 = vpop.f32.mrb[21].mxu0 }
 0x711   : > { %v1619_v31 = vpop.f32.mrb[22].mxu0 }
 0x712   : > { %v1627_v33 = vmul.f32 %v1626_v25, %v1617_v28  ;;  %v1851_v34 = vpop.f32.mrb[23].mxu0 }
 0x714   : > { %v1628_v35 = vadd.f32 %v1627_v33, %v1622_v14 }
 0x716   : > { %v1629_v17 = vpack.c.bf16 %v1628_v35, %v1628_v35 }
 0x718   : > { %1631 = vst.msk [vmem:[%s337_s10] sm:$0xf] %vm373_vm2, %v1629_v17 }
 0x719 PF: > { %s18_s29 = sadd.s32 1, %s1933_s29   ;;  %s2270_s27 = smov %s1929_s28 }
 0x71a   : > { %p15_p5 = scmp.ge.s32.totalorder %s18_s29, 4   ;;  %s2271_s28 = smov %s2273_s30 }
 0x71c   :  { %17 = sbr.rel (!%p15_p5) target bundleno = 2 (0x2), region = 90 }

// kernel: dit_forward.15
= control target key start
LH: loop header
LB: loop body
LE: loop exit
PB: predicated region body
PF: predicated region fallthrough
CT: control target
= control target key end

     0   :  { %9 = vsyncpa [#allocation3], 0  ;;  %s758_s0 = inlined_call_operand.vmem [shape: bf16[2,8,32], index: 0, kind: input, shape index: {}]   ;;  %s759_s1 = inlined_call_operand.vmem [shape: f32[2,2,32], index: 1, kind: input, shape index: {}]   ;;  %s760_s2 = inlined_call_operand.vmem [shape: bf16[32,128], index: 2, kind: input, shape index: {}]   ;;  %s761_s3 = inlined_call_operand.vmem [shape: f32[1,128], index: 3, kind: input, shape index: {}]   ;;  %s762_s4 = inlined_call_operand.hbm [shape: f32[2,8,128], index: 4, kind: output, shape index: {}]  }
   0x1   :  { %11 = vsyncpa [#allocation3 + $0x1], 0  ;;  %s627_s15 = smov 0   ;;  %s629_s16 = smov 0  }
   0x2   :  { %s631_s17 = smov 0   ;;  %s633_s18 = smov 0  }
   0x3   :  { %s635_s19 = smov 0   ;;  %s637_s20 = smov 0  }
   0x4 LB: > { %s431_s21 = sadd.s32 4294967295, %s597_s20   ;;  %s432_s22 = sadd.s32 4294967294, %s597_s20   ;;  %s597_s20 = sphi %s637_s20, %s17_s20   ;;  %s593_s19 = sphi %s635_s19, %s769_s19   ;;  %s589_s18 = sphi %s633_s18, %s768_s18   ;;  %s585_s17 = sphi %s631_s17, %s767_s17   ;;  %s581_s16 = sphi %s629_s16, %s766_s16   ;;  %s577_s15 = sphi %s627_s15, %s765_s15  }
   0x5   : > { %s29_s23 = sadd.s32 1, %s593_s19  ;;  %s134_s24 = sadd.s32 1, %s585_s17 }
   0x6   : > { %p31_p0 = scmp.ge.s32.totalorder %s29_s23, 2  ;;  %p144_p1 = scmp.ne.s32.totalorder %s585_s17, %s581_s16 }
   0x7   : > { %p145_p2 = scmp.eq.s32.totalorder %s431_s21, 1  ;;  %p150_p3 = scmp.ne.s32.totalorder %s581_s16, %s577_s15 }
   0x8   : > { %s771_s23 = smov (%p31_p0, %s29_s23), 0  ;;  %p151_p5 = scmp.eq.s32.totalorder %s432_s22, 1 }
   0x9   : > { %p667_p4 = por %p145_p2, %p144_p1  ;;  %s129_s26 = ssub.s32 %s593_s19, %s771_s23 }
   0xa   : > { %p435_p6 = scmp.ge.s32.totalorder %s597_s20, 1  ;;  %p132_p7 = scmp.eq.s32.totalorder %s129_s26, 0 }
   0xb   : > { %p674_p8 = por %p151_p5, %p150_p3  ;;  %p192_p9 = scmp.lt.s32.totalorder %s597_s20, 3 }
   0xc   : > { %s680_s28 = scalar_select %p132_p7, %s585_s17, %s134_s24  }
   0xd   : > { %p193_p10 = pnand %p435_p6, %p192_p9 }
   0xe   : > { %p224_p11 = scmp.lt.s32.totalorder (!%p193_p10), %s589_s18, 1  ;;  %vm239_vm0 = vcmask (!%p193_p10), 261120   ;;  %v515_v8 = vld [vmem:[%s760_s2] sm:$0xff] (!%p193_p10)   ;;  %v599_v9 = vmov (!%p193_p10), 0.0   ;;  %v516_v10 = vld [vmem:[%s760_s2 + $0x8] sm:$0xff] (!%p193_p10)   ;;  %vm600_vm1 = vmmov (!%p193_p10), 0   ;;  %v255_v13 = vlaneseq (!%p193_p10) }
   0xf   : > { %196 = sbr.rel (%p193_p10) target bundleno = 572 (0x23c), region = 36  ;;  %450 = vmatprep.subr.bf16.mxu0 (!%p193_p10), %v599_v9  ;;  %454 = vmatprep.mubr.msk.bf16.mxu0 (!%p193_p10), %vm600_vm1, %v599_v9  ;;  %s221_s22 = sand.u32 (!%p193_p10), 1, %s581_s16   ;;  %v439_v27 = vld [vmem:[%s761_s3] ss:$0 sm:$0xff] (!%p193_p10) }
  0x10   : > { %451 = vmatpush3.bf16.msra.mxu0 (!%p193_p10), %v515_v8  ;;  %v256_v15 = vshrl.u32 (!%p193_p10), %v255_v13, 7  ;;  %s436_s24 = sshll.u32 (!%p193_p10), %s221_s22, 3  ;;  %s334_s10 = scalar_lea.sflag (!%p193_p10), [#allocation3], %s221_s22 }
  0x11   : > { %452 = vmatprep.subr.bf16.mxu0 (!%p193_p10), %v599_v9  ;;  %s223_s5 = scalar_lea.vmem (!%p193_p10), [#allocation2], %s436_s24  ;;  %s601_s11 = smov (!%p193_p10), [#allocation2]  }
  0x12   : > { %v257_v18 = vsub.s32 (!%p193_p10), 1, %v256_v15  ;;  %v262_v19 = vsub.s32 (!%p193_p10), 0, %v256_v15  ;;  %s348_s6 = sshll.u32 (!%p193_p10), %s223_s5, 4  ;;  %s713_s6 = int_to_ptr.vmem [resolvable:$true] %s348_s6 }
  0x14   : > { %453 = vmatpush3.bf16.msra.mxu0 (!%p193_p10), %v516_v10 }
  0x16   : > { %s684_s29 = scalar_select %p224_p11, %s589_s18, 1 }
  0x18   : > { %s437_s30 = sshll.u32 %s684_s29, 2  ;;  %s438_s12 = sshll.u32 %s684_s29, 1 }
  0x19   : > { %s230_s7 = scalar_lea.vmem %s758_s0, %s437_s30  ;;  %s234_s21 = scalar_lea.vmem %s759_s1, %s438_s12 }
  0x1a   : > { %v236_v0 = vld [vmem:[%s230_s7] sm:$0xf]  ;;  %s444_s30 = sshll.u32 %s589_s18, 7  ;;  %s519_s18 = scalar_lea.vmem %s713_s6, 128 }
  0x1b   : > { %v237_v1 = vunpack.c.l.bf16 %v236_v0  ;;  %v238_v16 = vld [vmem:[%s234_s21] sm:$0x3]  ;;  %s711_s9 = scalar_lea.hbm %s762_s4, %s444_s30  ;;  %p520_p12 = scmp.ne.s32.totalorder %s713_s6, %s519_s18 }
  0x1c   : > { %v254_v17 = vadd.f32 1.0, %v238_v16  ;;  %v263_v22 = vrot.slane %v238_v16, %v262_v19  ;;  %s523_s12 = sshll.u32 %s601_s11, 4  ;;  %s524_s12 = int_to_ptr.vmem [resolvable:$false] %s523_s12 }
  0x1d   : > { %v240_v2 = vsel %vm239_vm0, %v237_v1, 0.0  ;;  %p521_p13 = pnand %p520_p12, %p667_p4  ;;  %s525_s13 = scalar_lea.vmem %s524_s12, 256 }
  0x1e   : > { %241 = vadd.xlane.f32.xlu0 %v240_v2  ;;  %v258_v20 = vrot.slane %v254_v17, %v257_v18  ;;  %p526_p1 = scmp.lt.s32.totalorder %s713_s6, %s524_s12  ;;  %p527_p2 = scmp.lt.s32.totalorder %s525_s13, %s519_s18 }
  0x1f   : > { %p522_p0 = pneg %p521_p13 }
  0x20   : > { %p528_p3 = por %p527_p2, %p526_p1 }
  0x22   : > { %p529_p5 = pnand %p528_p3, %p522_p0 }
  0xab   : > { %v242_v3 = vpop.xlane.xlu0 %241 }
  0xac   : > { %v244_v4 = vmul.f32 0.03125, %v242_v3 }
  0xae   : > { %v245_v5 = vsub.f32 %v237_v1, %v244_v4 }
  0xb0   : > { %v246_v6 = vmul.f32 %v245_v5, %v245_v5 }
  0xb2   : > { %v247_v7 = vsel %vm239_vm0, %v246_v6, 0.0 }
  0xb3   : > { %248 = vadd.xlane.f32.xlu0 %v247_v7 }
 0x140   : > { %v249_v11 = vpop.xlane.xlu0 %248 }
 0x141   : > { %v250_v12 = vmul.f32 0.03125, %v249_v11 }
 0x143   : > { %v251_v14 = vadd.f32 1e-06, %v250_v12 }
 0x145   : > { %517 = vrsqrt.f32 %v251_v14 }
 0x14f   : > { %v518_v21 = vpop.eup %517 }
 0x150   : > { %v253_v23 = vmul.f32 %v518_v21, %v245_v5 }
 0x152   : > { %v259_v24 = vmul.f32 %v258_v20, %v253_v23 }
 0x154   : > { %v264_v25 = vadd.f32 %v263_v22, %v259_v24 }
 0x156   : > { %v265_v26 = vpack.c.bf16 %v264_v25, %v264_v25 }
 0x158   : > { %455 = vmatmul.mubr.msk.bf16.vlgmr.msra.gmra.mrb[0].mxu0 %vm239_vm0, %v265_v26 }
 0x22b   : > { %v326_v28 = vpop.f32.mrb[0].mxu0 }
 0x22c   : > { %v327_v29 = vadd.f32 %v439_v27, %v326_v28  ;;  %v456_v30 = vpop.f32.mrb[1].mxu0 }
 0x22d   : > { %v329_v31 = vpop.f32.mrb[2].mxu0 }
 0x22e   : > { %332 = vst [vmem:[%s223_s5] sm:$0xff] %v327_v29  ;;  %v457_v32 = vpop.f32.mrb[3].mxu0 }
 0x22f   : > { %532 = shalt.err (!%p529_p5)
}
 0x230   : > { %s533_s14 = scalar_lea.hbm %s711_s9, 128  ;;  %s537_s24 = scalar_lea.hbm %s762_s4, 256 }
 0x231   : > { %p534_p6 = scmp.ne.s32.totalorder %s711_s9, %s533_s14  ;;  %p538_p10 = scmp.lt.u32.totalorder %s711_s9, %s762_s4 }
 0x232   : > { %p539_p11 = scmp.lt.u32.totalorder %s537_s24, %s533_s14  ;;  %p541_p13 = scmp.lt.u32.totalorder %s533_s14, %s711_s9 }
 0x233   : > { %p535_p7 = pnand %p534_p6, %p667_p4 }
 0x234   : > { %p540_p12 = por %p539_p11, %p538_p10 }
 0x235   : > { %p536_p9 = pneg %p535_p7 }
 0x236   : > { %p542_p0 = por %p541_p13, %p540_p12 }
 0x238   : > { %p543_p1 = pnand %p542_p0, %p536_p9 }
 0x23a   : > { %546 = shalt.err (!%p543_p1)
}
 0x23b   : > { %458 = dma.vmem_to_hbm [thread:$0]  (%p667_p4), %s713_s6, 128, %s711_s9, %s334_s10  }
 0x23c PF: > { %p464_p2 = scmp.ge.s32.totalorder %s597_s20, 2  ;;  %s360_s30 = sand.u32 1, %s577_s15  }
 0x23d   : > { %s361_s5 = scalar_lea.sflag [#allocation3], %s360_s30 }
 0x23e   : > { %p461_p3 = pnand %p464_p2, %p674_p8 }
 0x240   : > { %572 = dma.done.wait (!%p461_p3), %s361_s5, 128  }
 0x241   : > { %574 = vsyncadd (!%p461_p3), %s361_s5, 4294967168  ;;  %s17_s20 = sadd.s32 1, %s597_s20   ;;  %s765_s15 = smov %s581_s16 }
 0x242   : > { %p14_p5 = scmp.ge.s32.totalorder %s17_s20, 4   ;;  %s766_s16 = smov %s585_s17 }
 0x243   : > { %s767_s17 = smov %s680_s28  ;;  %s768_s18 = smov %s593_s19 }
 0x244   : > { %s769_s19 = smov %s771_s23  ;;  %16 = sbr.rel (!%p14_p5) target bundleno = 4 (0x4), region = 74 }
 0x24b   :  { %366 = vsyncpa [#allocation3], 1 }
 0x24c   :  { %368 = vsyncpa [#allocation3 + $0x1], 1 }

</bundles_post_ra>
